<compile_context>
chip_gen: v7x
topology: tpu7x:2x2x1
jax: 0.10.0
libtpu: 0.0.40
codegen_flags: <defaults>
</compile_context>

<pallas_src>
import jax
import jax.numpy as jnp
from jax import lax
from jax.experimental import pallas as pl
from jax.experimental.pallas import tpu as pltpu

EPS = 1e-5
LANES = 128


# --------------------------------------------------------------------------------------
# Pass A: per-image 3x3 conv (im2col -> single MXU matmul) + per-image BN1 partial stats
# --------------------------------------------------------------------------------------
def conv_stats_kernel(x_ref, w_ref, y_ref, stats_ref, xpad_scr):
    """x_ref: (1,H,W,Ci) bf16 | w_ref: (9*Ci,Co) bf16 | y_ref: (1,H*W,Co) f32
    stats_ref: (1,2,Co) f32 (per-tile sum / sum_sq) | xpad_scr: (H+2,W+2,Ci) bf16 VMEM."""
    _, H, W, C = x_ref.shape
    Co = y_ref.shape[-1]
    HW = H * W

    # Build the zero-padded halo inside VMEM (avoids an HBM round-trip of a padded copy).
    # Zeroed every grid step: safe under "parallel" (megacore) semantics.
    xpad_scr[...] = jnp.zeros_like(xpad_scr)
    xpad_scr[1:H + 1, 1:W + 1, :] = x_ref[0]

    # im2col: one (HW, 9*Ci) patch tensor -> ONE matmul (vs. 9 K=Ci matmuls before).
    cols = [xpad_scr[dy:dy + H, dx:dx + W, :].reshape(HW, C)
            for dy in range(3) for dx in range(3)]
    patches = jnp.concatenate(cols, axis=-1)                              # (HW, 9*Ci) bf16

    # bf16 operands, f32 accumulation on the MXU.
    y = jnp.dot(patches, w_ref[...], preferred_element_type=jnp.float32)  # (HW, Co) f32
    # conv bias intentionally omitted: BN1's mean subtraction cancels it exactly.
    y_ref[0] = y

    # Single-pass BN1 partials (sum, sum of squares) — reduced across tiles in the wrapper.
    stats_ref[0, 0:1, :] = jnp.sum(y, axis=0, keepdims=True)
    stats_ref[0, 1:2, :] = jnp.sum(y * y, axis=0, keepdims=True)


# --------------------------------------------------------------------------------------
# Pass B: lane-dense BN1 apply + ReLU + per-tile BN2 partial stats
# --------------------------------------------------------------------------------------
def bn_relu_stats_kernel(y_ref, scale_ref, shift_ref, z_ref, stats_ref):
    """y_ref/z_ref: (TR,128) f32 | scale/shift: (1,128) lane-tiled per-channel params
    stats_ref: (1,2,128) f32 per-lane partials (folded lane->channel in the wrapper)."""
    z = jnp.maximum(y_ref[...] * scale_ref[...] + shift_ref[...], 0.0)
    z_ref[...] = z
    stats_ref[0, 0:1, :] = jnp.sum(z, axis=0, keepdims=True)
    stats_ref[0, 1:2, :] = jnp.sum(z * z, axis=0, keepdims=True)


# --------------------------------------------------------------------------------------
# Pass C: lane-dense BN2 apply + identity residual + ReLU
# --------------------------------------------------------------------------------------
def bn_add_relu_kernel(z_ref, x_ref, scale_ref, shift_ref, out_ref):
    out_ref[...] = jnp.maximum(
        z_ref[...] * scale_ref[...] + shift_ref[...] + x_ref[...], 0.0)


def _row_tile(rows, max_tile=512):
    """Largest row-tile (multiple of 8, divides rows) — 512 rows ~ 85% of HBM roofline."""
    for t in (max_tile, 256, 128, 64, 32, 16, 8):
        if t <= rows and rows % t == 0:
            return t
    return rows  # single full block (still legal: equals full array dim)


def residual_forward(x_nchw, w1, b1, gamma1, beta1, gamma2, beta2):
    """NCHW in / NCHW out (PyTorch convention); kernels run in NHWC / lane-dense layouts."""
    N, C, H, W = x_nchw.shape
    KH, KW, Ci, Co = w1.shape
    assert (KH, KW) == (3, 3) and Ci == C
    assert Ci == Co, "identity shortcut requires input_channel == output_channel"
    assert LANES % Co == 0 and (N * H * W * Co) % LANES == 0, (
        "lane-dense apply path requires C | 128 and N*H*W*C % 128 == 0")
    del b1  # cancelled exactly by BN1's mean subtraction (mathematically a no-op)

    # One NCHW->NHWC transpose on the way in (see TODO at top).
    x_nhwc = jnp.transpose(x_nchw, (0, 2, 3, 1)).astype(jnp.float32)
    x_bf = x_nhwc.astype(jnp.bfloat16)
    w_mat = w1.astype(jnp.bfloat16).reshape(9 * Ci, Co)   # [dy, dx, ci] row order

    HW = H * W
    Mtot = N * H * W

    # ---------------- pass A: conv + BN1 partial stats (grid over images) ----------------
    y, stats1 = pl.pallas_call(
        conv_stats_kernel,
        out_shape=(jax.ShapeDtypeStruct((N, HW, Co), jnp.float32),
                   jax.ShapeDtypeStruct((N, 2, Co), jnp.float32)),
        grid_spec=pltpu.PrefetchScalarGridSpec(
            num_scalar_prefetch=0,
            grid=(N,),
            in_specs=[pl.BlockSpec((1, H, W, Ci), lambda n: (n, 0, 0, 0)),
                      pl.BlockSpec((9 * Ci, Co), lambda n: (0, 0))],
            out_specs=[pl.BlockSpec((1, HW, Co), lambda n: (n, 0, 0)),
                       pl.BlockSpec((1, 2, Co), lambda n: (n, 0, 0))],
            scratch_shapes=[pltpu.VMEM((H + 2, W + 2, Ci), jnp.bfloat16)]),
        compiler_params=pltpu.CompilerParams(
            dimension_semantics=("parallel",),          # megacore split on v7x
            # Safe on all generations (v5e phys 128 MiB, v6e 128 MiB, v7x 64 MiB);
            # for large H*W re-derive the per-image tile vs. this budget (esp. v7x).
            vmem_limit_bytes=32 * 1024 * 1024),
    )(x_bf, w_mat)

    # BN1 parameters from global batch stats (tiny per-channel math, plain JAX).
    s1 = jnp.sum(stats1, axis=0)                                   # (2, Co)
    mean1 = s1[0] / Mtot
    var1 = jnp.maximum(s1[1] / Mtot - mean1 * mean1, 0.0)
    scale1 = gamma1.astype(jnp.float32) * lax.rsqrt(var1 + EPS)
    shift1 = beta1.astype(jnp.float32) - mean1 * scale1

    # Lane-dense view: (N,H,W,C)-ordered data as (R, 128); channel = lane % C.
    rep = LANES // Co
    R = (N * H * W * Co) // LANES
    y_flat = y.reshape(R, LANES)                                   # contiguous, free
    x_flat = x_nhwc.reshape(R, LANES)
    scale1_l = jnp.tile(scale1, rep).reshape(1, LANES)
    shift1_l = jnp.tile(shift1, rep).reshape(1, LANES)

    TR = _row_tile(R)
    nb = R // TR

    # ---------------- pass B: BN1 apply + ReLU + BN2 partial stats ----------------
    z_flat, stats2 = pl.pallas_call(
        bn_relu_stats_kernel,
        out_shape=(jax.ShapeDtypeStruct((R, LANES), jnp.float32),
                   jax.ShapeDtypeStruct((nb, 2, LANES), jnp.float32)),
        grid_spec=pltpu.PrefetchScalarGridSpec(
            num_scalar_prefetch=0,
            grid=(nb,),
            in_specs=[pl.BlockSpec((TR, LANES), lambda i: (i, 0)),
                      pl.BlockSpec((1, LANES), lambda i: (0, 0)),
                      pl.BlockSpec((1, LANES), lambda i: (0, 0))],
            out_specs=[pl.BlockSpec((TR, LANES), lambda i: (i, 0)),
                       pl.BlockSpec((1, 2, LANES), lambda i: (i, 0, 0))]),
        compiler_params=pltpu.CompilerParams(dimension_semantics=("parallel",)),
    )(y_flat, scale1_l, shift1_l)

    # Fold per-lane partials back to per-channel (lane % C == channel).
    lane_sums = jnp.sum(stats2, axis=0)                            # (2, 128)
    ch_sums = lane_sums.reshape(2, rep, Co).sum(axis=1)            # (2, Co)
    mean2 = ch_sums[0] / Mtot
    var2 = jnp.maximum(ch_sums[1] / Mtot - mean2 * mean2, 0.0)
    scale2 = gamma2.astype(jnp.float32) * lax.rsqrt(var2 + EPS)
    shift2 = beta2.astype(jnp.float32) - mean2 * scale2
    scale2_l = jnp.tile(scale2, rep).reshape(1, LANES)
    shift2_l = jnp.tile(shift2, rep).reshape(1, LANES)

    # ---------------- pass C: BN2 apply + residual + ReLU ----------------
    out_flat = pl.pallas_call(
        bn_add_relu_kernel,
        out_shape=jax.ShapeDtypeStruct((R, LANES), jnp.float32),
        grid_spec=pltpu.PrefetchScalarGridSpec(
            num_scalar_prefetch=0,
            grid=(nb,),
            in_specs=[pl.BlockSpec((TR, LANES), lambda i: (i, 0)),
                      pl.BlockSpec((TR, LANES), lambda i: (i, 0)),
                      pl.BlockSpec((1, LANES), lambda i: (0, 0)),
                      pl.BlockSpec((1, LANES), lambda i: (0, 0))],
            out_specs=pl.BlockSpec((TR, LANES), lambda i: (i, 0))),
        compiler_params=pltpu.CompilerParams(dimension_semantics=("parallel",)),
    )(z_flat, x_flat, scale2_l, shift2_l)

    out_nhwc = out_flat.reshape(N, H, W, Co)
    return jnp.transpose(out_nhwc, (0, 3, 1, 2))


def residual_reference(x_nchw, w1, b1, gamma1, beta1, gamma2, beta2):
    """Pure-JAX reference (same math; conv operands cast to bf16 like the kernel,
    f32 accumulation), PyTorch training-mode BN semantics."""
    x = jnp.transpose(x_nchw, (0, 2, 3, 1)).astype(jnp.float32)
    y = lax.conv_general_dilated(
        x.astype(jnp.bfloat16), w1.astype(jnp.bfloat16),
        window_strides=(1, 1), padding=((1, 1), (1, 1)),
        dimension_numbers=("NHWC", "HWIO", "NHWC"),
        preferred_element_type=jnp.float32)
    y = y + b1.reshape(1, 1, 1, -1).astype(jnp.float32)   # kept (cancels in BN1)

    m1 = y.mean(axis=(0, 1, 2))
    v1 = ((y - m1) ** 2).mean(axis=(0, 1, 2))
    y = (y - m1) * lax.rsqrt(v1 + EPS) * gamma1 + beta1
    y = jnp.maximum(y, 0.0)

    m2 = y.mean(axis=(0, 1, 2))
    v2 = ((y - m2) ** 2).mean(axis=(0, 1, 2))
    y = (y - m2) * lax.rsqrt(v2 + EPS) * gamma2 + beta2

    out = jnp.maximum(y + x, 0.0)
    return jnp.transpose(out, (0, 3, 1, 2))


if __name__ == "__main__":
    # Small shapes consistent with the module: Residual(input_channel=4, output_channel=4)
    N, C, H, W = 2, 4, 16, 16

    key = jax.random.PRNGKey(0)
    kx, kw, kb, kg1, kb1, kg2, kb2 = jax.random.split(key, 7)

    x = jax.random.normal(kx, (N, C, H, W), jnp.float32)
    w1 = jax.random.normal(kw, (3, 3, C, C), jnp.float32) * 0.1   # conv1 weight (HWIO)
    b1 = jax.random.normal(kb, (C,), jnp.float32) * 0.1           # conv1 bias
    gamma1 = 1.0 + 0.1 * jax.random.normal(kg1, (C,), jnp.float32)
    beta1 = 0.1 * jax.random.normal(kb1, (C,), jnp.float32)
    gamma2 = 1.0 + 0.1 * jax.random.normal(kg2, (C,), jnp.float32)
    beta2 = 0.1 * jax.random.normal(kb2, (C,), jnp.float32)

    out = jax.block_until_ready(
        residual_forward(x, w1, b1, gamma1, beta1, gamma2, beta2))
    ref = residual_reference(x, w1, b1, gamma1, beta1, gamma2, beta2)

    assert out.shape == (N, C, H, W)
    max_err = jnp.max(jnp.abs(out - ref))
    assert jnp.allclose(out, ref, atol=2e-3, rtol=2e-3), f"max abs diff = {max_err}"

    print("KERNEL_OK")
</pallas_src>

<mosaic_0001>
module attributes {stable_mosaic.version = 11 : i64} {
  func.func @conv_stats_kernel(%arg0: i32, %arg1: memref<1x16x16x4xbf16, #tpu.memory_space<vmem>>, %arg2: memref<36x4xbf16, #tpu.memory_space<vmem>>, %arg3: memref<1x256x4xf32, #tpu.memory_space<vmem>>, %arg4: memref<1x2x4xf32, #tpu.memory_space<vmem>>, %arg5: memref<18x18x4xbf16, #tpu.memory_space<vmem>>) attributes {dimension_semantics = [#tpu.dimension_semantics<parallel>], iteration_bounds = array<i64: 2>, scalar_prefetch = 0 : i64, scratch_operands = 1 : i64, tpu.core_type = #tpu.core_type<tc>, window_params = [{transform_indices = @transform_0, window_bounds = array<i64: 1, 16, 16, 4>}, {pipeline_mode = #tpu.pipeline_mode<synchronous>, transform_indices = @transform_1, window_bounds = array<i64: 36, 4>}, {transform_indices = @transform_2, window_bounds = array<i64: 1, 256, 4>}, {transform_indices = @transform_3, window_bounds = array<i64: 1, 2, 4>}]} {
    %cst = arith.constant 0.000000e+00 : bf16
    %0 = vector.broadcast %cst : bf16 to vector<18x18x4xbf16>
    %c0 = arith.constant 0 : index
    %c0_0 = arith.constant 0 : index
    %c0_1 = arith.constant 0 : index
    %1 = vector.load %arg5[%c0, %c0_0, %c0_1] : memref<18x18x4xbf16, #tpu.memory_space<vmem>>, vector<18x18x4xbf16>
    tpu.vector_store %arg5[%c0, %c0_0, %c0_1], %0 {strides = array<i32>} : memref<18x18x4xbf16, #tpu.memory_space<vmem>>, vector<18x18x4xbf16>,
    %c0_2 = arith.constant 0 : index
    %c0_3 = arith.constant 0 : index
    %c0_4 = arith.constant 0 : index
    %c0_5 = arith.constant 0 : index
    %2 = vector.load %arg1[%c0_2, %c0_3, %c0_4, %c0_5] : memref<1x16x16x4xbf16, #tpu.memory_space<vmem>>, vector<1x16x16x4xbf16>
    %3 = vector.shape_cast %2 : vector<1x16x16x4xbf16> to vector<16x16x4xbf16>
    %c1 = arith.constant 1 : index
    %c1_6 = arith.constant 1 : index
    %c0_7 = arith.constant 0 : index
    %4 = vector.load %arg5[%c1, %c1_6, %c0_7] : memref<18x18x4xbf16, #tpu.memory_space<vmem>>, vector<16x16x4xbf16>
    tpu.vector_store %arg5[%c1, %c1_6, %c0_7], %3 {strides = array<i32>} : memref<18x18x4xbf16, #tpu.memory_space<vmem>>, vector<16x16x4xbf16>,
    %c0_8 = arith.constant 0 : index
    %c0_9 = arith.constant 0 : index
    %c0_10 = arith.constant 0 : index
    %5 = vector.load %arg5[%c0_8, %c0_9, %c0_10] : memref<18x18x4xbf16, #tpu.memory_space<vmem>>, vector<16x16x4xbf16>
    %6 = vector.shape_cast %5 : vector<16x16x4xbf16> to vector<256x4xbf16>
    %c0_11 = arith.constant 0 : index
    %c1_12 = arith.constant 1 : index
    %c0_13 = arith.constant 0 : index
    %7 = vector.load %arg5[%c0_11, %c1_12, %c0_13] : memref<18x18x4xbf16, #tpu.memory_space<vmem>>, vector<16x16x4xbf16>
    %8 = vector.shape_cast %7 : vector<16x16x4xbf16> to vector<256x4xbf16>
    %c0_14 = arith.constant 0 : index
    %c2 = arith.constant 2 : index
    %c0_15 = arith.constant 0 : index
    %9 = vector.load %arg5[%c0_14, %c2, %c0_15] : memref<18x18x4xbf16, #tpu.memory_space<vmem>>, vector<16x16x4xbf16>
    %10 = vector.shape_cast %9 : vector<16x16x4xbf16> to vector<256x4xbf16>
    %c1_16 = arith.constant 1 : index
    %c0_17 = arith.constant 0 : index
    %c0_18 = arith.constant 0 : index
    %11 = vector.load %arg5[%c1_16, %c0_17, %c0_18] : memref<18x18x4xbf16, #tpu.memory_space<vmem>>, vector<16x16x4xbf16>
    %12 = vector.shape_cast %11 : vector<16x16x4xbf16> to vector<256x4xbf16>
    %c1_19 = arith.constant 1 : index
    %c1_20 = arith.constant 1 : index
    %c0_21 = arith.constant 0 : index
    %13 = vector.load %arg5[%c1_19, %c1_20, %c0_21] : memref<18x18x4xbf16, #tpu.memory_space<vmem>>, vector<16x16x4xbf16>
    %14 = vector.shape_cast %13 : vector<16x16x4xbf16> to vector<256x4xbf16>
    %c1_22 = arith.constant 1 : index
    %c2_23 = arith.constant 2 : index
    %c0_24 = arith.constant 0 : index
    %15 = vector.load %arg5[%c1_22, %c2_23, %c0_24] : memref<18x18x4xbf16, #tpu.memory_space<vmem>>, vector<16x16x4xbf16>
    %16 = vector.shape_cast %15 : vector<16x16x4xbf16> to vector<256x4xbf16>
    %c2_25 = arith.constant 2 : index
    %c0_26 = arith.constant 0 : index
    %c0_27 = arith.constant 0 : index
    %17 = vector.load %arg5[%c2_25, %c0_26, %c0_27] : memref<18x18x4xbf16, #tpu.memory_space<vmem>>, vector<16x16x4xbf16>
    %18 = vector.shape_cast %17 : vector<16x16x4xbf16> to vector<256x4xbf16>
    %c2_28 = arith.constant 2 : index
    %c1_29 = arith.constant 1 : index
    %c0_30 = arith.constant 0 : index
    %19 = vector.load %arg5[%c2_28, %c1_29, %c0_30] : memref<18x18x4xbf16, #tpu.memory_space<vmem>>, vector<16x16x4xbf16>
    %20 = vector.shape_cast %19 : vector<16x16x4xbf16> to vector<256x4xbf16>
    %c2_31 = arith.constant 2 : index
    %c2_32 = arith.constant 2 : index
    %c0_33 = arith.constant 0 : index
    %21 = vector.load %arg5[%c2_31, %c2_32, %c0_33] : memref<18x18x4xbf16, #tpu.memory_space<vmem>>, vector<16x16x4xbf16>
    %22 = vector.shape_cast %21 : vector<16x16x4xbf16> to vector<256x4xbf16>
    %23 = tpu.concatenate %6, %8, %10, %12, %14, %16, %18, %20, %22 in 1 : vector<256x4xbf16>, vector<256x4xbf16>, vector<256x4xbf16>, vector<256x4xbf16>, vector<256x4xbf16>, vector<256x4xbf16>, vector<256x4xbf16>, vector<256x4xbf16>, vector<256x4xbf16> -> vector<256x36xbf16>
    %c0_34 = arith.constant 0 : index
    %c0_35 = arith.constant 0 : index
    %24 = vector.load %arg2[%c0_34, %c0_35] : memref<36x4xbf16, #tpu.memory_space<vmem>>, vector<36x4xbf16>
    %cst_36 = arith.constant dense<0.000000e+00> : vector<256x4xf32>
    %25 = tpu.matmul %23, %24, %cst_36 {dimension_numbers = #tpu.dot_dimension_numbers<[1], [0], [0], [1], [0, 0, 1, 1], [], []>} : vector<256x36xbf16>, vector<36x4xbf16>, vector<256x4xf32> -> vector<256x4xf32>
    %c0_37 = arith.constant 0 : index
    %c0_38 = arith.constant 0 : index
    %c0_39 = arith.constant 0 : index
    %26 = vector.load %arg3[%c0_37, %c0_38, %c0_39] : memref<1x256x4xf32, #tpu.memory_space<vmem>>, vector<1x256x4xf32>
    %27 = vector.shape_cast %26 : vector<1x256x4xf32> to vector<256x4xf32>
    %28 = vector.shape_cast %25 : vector<256x4xf32> to vector<1x256x4xf32>
    tpu.vector_store %arg3[%c0_37, %c0_38, %c0_39], %28 {strides = array<i32>} : memref<1x256x4xf32, #tpu.memory_space<vmem>>, vector<1x256x4xf32>,
    %cst_40 = arith.constant dense<0.000000e+00> : vector<4xf32>
    %29 = vector.multi_reduction <add>, %25, %cst_40 [0] : vector<256x4xf32> to vector<4xf32>
    %30 = vector.shape_cast %29 : vector<4xf32> to vector<1x4xf32>
    %c0_41 = arith.constant 0 : index
    %c0_42 = arith.constant 0 : index
    %c0_43 = arith.constant 0 : index
    %31 = vector.load %arg4[%c0_41, %c0_42, %c0_43] : memref<1x2x4xf32, #tpu.memory_space<vmem>>, vector<1x1x4xf32>
    %32 = vector.shape_cast %31 : vector<1x1x4xf32> to vector<1x4xf32>
    %33 = vector.shape_cast %30 : vector<1x4xf32> to vector<1x1x4xf32>
    tpu.vector_store %arg4[%c0_41, %c0_42, %c0_43], %33 {strides = array<i32>} : memref<1x2x4xf32, #tpu.memory_space<vmem>>, vector<1x1x4xf32>,
    %34 = arith.mulf %25, %25 : vector<256x4xf32>
    %cst_44 = arith.constant dense<0.000000e+00> : vector<4xf32>
    %35 = vector.multi_reduction <add>, %34, %cst_44 [0] : vector<256x4xf32> to vector<4xf32>
    %36 = vector.shape_cast %35 : vector<4xf32> to vector<1x4xf32>
    %c0_45 = arith.constant 0 : index
    %c1_46 = arith.constant 1 : index
    %c0_47 = arith.constant 0 : index
    %37 = vector.load %arg4[%c0_45, %c1_46, %c0_47] : memref<1x2x4xf32, #tpu.memory_space<vmem>>, vector<1x1x4xf32>
    %38 = vector.shape_cast %37 : vector<1x1x4xf32> to vector<1x4xf32>
    %39 = vector.shape_cast %36 : vector<1x4xf32> to vector<1x1x4xf32>
    tpu.vector_store %arg4[%c0_45, %c1_46, %c0_47], %39 {strides = array<i32>} : memref<1x2x4xf32, #tpu.memory_space<vmem>>, vector<1x1x4xf32>,
    return
  }
  func.func @transform_0(%arg0: i32) -> (i32, i32, i32, i32) {
    %c0_i32 = arith.constant 0 : i32
    %c0_i32_0 = arith.constant 0 : i32
    %c0_i32_1 = arith.constant 0 : i32
    %c0_i32_2 = arith.constant 0 : i32
    return %arg0, %c0_i32, %c0_i32_0, %c0_i32_1 : i32, i32, i32, i32
  }
  func.func @transform_1(%arg0: i32) -> (i32, i32) {
    %c0_i32 = arith.constant 0 : i32
    %c0_i32_0 = arith.constant 0 : i32
    %c0_i32_1 = arith.constant 0 : i32
    return %c0_i32, %c0_i32_0 : i32, i32
  }
  func.func @transform_2(%arg0: i32) -> (i32, i32, i32) {
    %c0_i32 = arith.constant 0 : i32
    %c0_i32_0 = arith.constant 0 : i32
    %c0_i32_1 = arith.constant 0 : i32
    return %arg0, %c0_i32, %c0_i32_0 : i32, i32, i32
  }
  func.func @transform_3(%arg0: i32) -> (i32, i32, i32) {
    %c0_i32 = arith.constant 0 : i32
    %c0_i32_0 = arith.constant 0 : i32
    %c0_i32_1 = arith.constant 0 : i32
    return %arg0, %c0_i32, %c0_i32_0 : i32, i32, i32
  }
}

</mosaic_0001>

<bundles_post_ra>
// kernel: tpu_custom_call.1
= control target key start
LH: loop header
LB: loop body
LE: loop exit
PB: predicated region body
PF: predicated region fallthrough
CT: control target
= control target key end

     0   :  { %9 = vsyncpa [#allocation4], 0  ;;  %s6447_s0 = inlined_call_operand.vmem [shape: bf16[2,16,16,4], index: 0, kind: input, shape index: {}]   ;;  %s6448_s1 = inlined_call_operand.vmem [shape: bf16[36,4], index: 1, kind: input, shape index: {}]   ;;  %s6449_s2 = inlined_call_operand.vmem [shape: f32[2,256,4], index: 2, kind: output, shape index: {0}]   ;;  %s6450_s3 = inlined_call_operand.hbm [shape: f32[2,2,4], index: 3, kind: output, shape index: {1}]  }
   0x1   :  { %11 = vsyncpa [#allocation4 + $0x1], 0  ;;  %s4579_s12 = smov 0   ;;  %s4581_s13 = smov 0  }
   0x2   :  { %s4583_s14 = smov 0   ;;  %s4585_s15 = smov 0  }
   0x3 LB: > { %s4600_s16 = sadd.s32 4294967295, %s4547_s15   ;;  %s4087_s17 = sadd.s32 4294967294, %s4547_s15   ;;  %s4547_s15 = sphi %s4585_s15, %s6469_s15   ;;  %s4543_s14 = sphi %s4583_s14, %s6468_s14   ;;  %s4539_s13 = sphi %s4581_s13, %s6467_s13   ;;  %s4535_s12 = sphi %s4579_s12, %s6466_s12  }
   0x4   : > { %s4604_s18 = sadd.s32 1, %s4547_s15   ;;  %s97_s19 = sadd.s32 1, %s4543_s14 }
   0x5   : > { %s94_s20 = ssub.s32 %s4547_s15, %s4604_s18  ;;  %p107_p0 = scmp.ne.s32.totalorder %s4543_s14, %s4539_s13 }
   0x6   : > { %p95_p1 = scmp.eq.s32.totalorder %s94_s20, 0  ;;  %p108_p2 = scmp.eq.s32.totalorder %s4600_s16, 1 }
   0x7   : > { %p113_p3 = scmp.ne.s32.totalorder %s4539_s13, %s4535_s12  ;;  %p114_p4 = scmp.eq.s32.totalorder %s4087_s17, 1 }
   0x8   : > { %s4615_s21 = scalar_select %p95_p1, %s4543_s14, %s97_s19  }
   0x9   : > { %p4617_p5 = por %p108_p2, %p107_p0  ;;  %p4621_p6 = por %p114_p4, %p113_p3 }
   0xa   : > { %p4090_p7 = scmp.ge.s32.totalorder %s4547_s15, 1  ;;  %p143_p8 = scmp.lt.s32.totalorder %s4547_s15, 3 }
   0xc   : > { %p144_p9 = pnand %p4090_p7, %p143_p8 }
   0xd   : > { %vm183_vm0 = vcmask (!%p144_p9), 27648   ;;  %vm186_vm1 = vcmask (!%p144_p9), 24576   ;;  %v4549_v0 = vmov (!%p144_p9), 0   ;;  %p172_p10 = scmp.lt.s32.totalorder (!%p144_p9), %s4600_s16, 1  ;;  %vm1211_vm2 = vcmask (!%p144_p9), 1042432   ;;  %s4550_s29 = smov (!%p144_p9), 8  }
   0xe   : > { %147 = sbr.rel (%p144_p9) target bundleno = 786 (0x312), region = 28  ;;  %184 = vst.msk [vmem:[#allocation2] sm:$0xf] (!%p144_p9), %vm183_vm0, %v4549_v0  ;;  %185 = vst.msk [vmem:[#allocation2 + $0x4] sm:$0xf] (!%p144_p9), %vm183_vm0, %v4549_v0  ;;  %vm1212_vm3 = vcmask (!%p144_p9), 1046532  }
   0xf   : > { %187 = vst.msk [vmem:[#allocation2 + $0x8] sm:$0x1] (!%p144_p9), %vm186_vm1, %v4549_v0  ;;  %190 = vst.msk [vmem:[#allocation2 + $0x14] sm:$0x1] (!%p144_p9), %vm186_vm1, %v4549_v0  ;;  %vm760_vm4 = vsmask.f32 (!%p144_p9), 3328 }
  0x10   : > { %188 = vst.msk [vmem:[#allocation2 + $0xc] sm:$0xf] (!%p144_p9), %vm183_vm0, %v4549_v0  ;;  %189 = vst.msk [vmem:[#allocation2 + $0x10] sm:$0xf] (!%p144_p9), %vm183_vm0, %v4549_v0  ;;  %vm761_vm5 = vsmask.f32 (!%p144_p9), 7440 }
  0x11   : > { %191 = vst.msk [vmem:[#allocation2 + $0x18] sm:$0xf] (!%p144_p9), %vm183_vm0, %v4549_v0  ;;  %192 = vst.msk [vmem:[#allocation2 + $0x1c] sm:$0xf] (!%p144_p9), %vm183_vm0, %v4549_v0  ;;  %vm271_vm6 = vsmask.f32 (!%p144_p9), 256 }
  0x12   : > { %193 = vst.msk [vmem:[#allocation2 + $0x20] sm:$0x1] (!%p144_p9), %vm186_vm1, %v4549_v0  ;;  %196 = vst.msk [vmem:[#allocation2 + $0x2c] sm:$0x1] (!%p144_p9), %vm186_vm1, %v4549_v0  ;;  %vm272_vm8 = vsmask.f32 (!%p144_p9), 4368 }
  0x13   : > { %194 = vst.msk [vmem:[#allocation2 + $0x24] sm:$0xf] (!%p144_p9), %vm183_vm0, %v4549_v0  ;;  %195 = vst.msk [vmem:[#allocation2 + $0x28] sm:$0xf] (!%p144_p9), %vm183_vm0, %v4549_v0  ;;  %vm596_vm9 = vsmask.f32 (!%p144_p9), 7938 }
  0x14   : > { %197 = vst.msk [vmem:[#allocation2 + $0x30] sm:$0xf] (!%p144_p9), %vm183_vm0, %v4549_v0  ;;  %198 = vst.msk [vmem:[#allocation2 + $0x34] sm:$0xf] (!%p144_p9), %vm183_vm0, %v4549_v0  ;;  %s4551_s30 = smov (!%p144_p9), 4   ;;  %s4552_s4 = smov (!%p144_p9), 12  }
  0x15   : > { %199 = vst.msk [vmem:[#allocation2 + $0x38] sm:$0x1] %vm186_vm1, %v4549_v0  ;;  %202 = vst.msk [vmem:[#allocation2 + $0x44] sm:$0x1] %vm186_vm1, %v4549_v0  ;;  %s4683_s24 = scalar_select %p172_p10, %s4600_s16, 1  ;;  %vm3279_vm14 = vcmask 31744  }
  0x16   : > { %200 = vst.msk [vmem:[#allocation2 + $0x3c] sm:$0xf] %vm183_vm0, %v4549_v0  ;;  %201 = vst.msk [vmem:[#allocation2 + $0x40] sm:$0xf] %vm183_vm0, %v4549_v0  ;;  %v713_v3 = vld [vmem:[#allocation2 + $0x4] sm:$0xf] }
  0x17   : > { %203 = vst.msk [vmem:[#allocation2 + $0x48] sm:$0xf] %vm183_vm0, %v4549_v0  ;;  %204 = vst.msk [vmem:[#allocation2 + $0x4c] sm:$0xf] %vm183_vm0, %v4549_v0  ;;  %s4311_s25 = sshll.u32 %s4683_s24, 7  ;;  %v1216_v7 = vrot.slane %v713_v3, 5 }
  0x18   : > { %205 = vst.msk [vmem:[#allocation2 + $0x50] sm:$0x1] %vm186_vm1, %v4549_v0  ;;  %208 = vst.msk [vmem:[#allocation2 + $0x5c] sm:$0x1] %vm186_vm1, %v4549_v0  ;;  %s4689_s28 = scalar_lea.vmem %s6447_s0, %s4311_s25  ;;  %v744_v4 = vld [vmem:[#allocation2 + $0x8] sm:$0x1] }
  0x19   : > { %206 = vst.msk [vmem:[#allocation2 + $0x54] sm:$0xf] %vm183_vm0, %v4549_v0  ;;  %207 = vst.msk [vmem:[#allocation2 + $0x58] sm:$0xf] %vm183_vm0, %v4549_v0  ;;  %v241_v2 = vld [vmem:[%s4689_s28 + $0x8] sm:$0xf] }
  0x1a   : > { %209 = vst.msk [vmem:[#allocation2 + $0x60] sm:$0xf] %vm183_vm0, %v4549_v0  ;;  %210 = vst.msk [vmem:[#allocation2 + $0x64] sm:$0xf] %vm183_vm0, %v4549_v0  ;;  %v1147_v5 = vld [vmem:[#allocation2] sm:$0xe] }
  0x1b   : > { %211 = vst.msk [vmem:[#allocation2 + $0x68] sm:$0x1] %vm186_vm1, %v4549_v0  ;;  %214 = vst.msk [vmem:[#allocation2 + $0x74] sm:$0x1] %vm186_vm1, %v4549_v0  ;;  %v4096_v6 = vrot.slane %v1147_v5, 9  ;;  %v1219_v8 = vrot.slane %v744_v4, 5 }
  0x1c   : > { %212 = vst.msk [vmem:[#allocation2 + $0x6c] sm:$0xf] %vm183_vm0, %v4549_v0  ;;  %213 = vst.msk [vmem:[#allocation2 + $0x70] sm:$0xf] %vm183_vm0, %v4549_v0  ;;  %v712_v9 = vld [vmem:[#allocation2] sm:$0xf] }
  0x1d   : > { %215 = vst.msk [vmem:[#allocation2 + $0x78] sm:$0xf] %vm183_vm0, %v4549_v0  ;;  %216 = vst.msk [vmem:[#allocation2 + $0x7c] sm:$0xf] %vm183_vm0, %v4549_v0  ;;  %v773_v10 = vshll.u32 %v713_v3, 16  ;;  %v764_v11 = vshrl.u32 %v712_v9, 16 }
  0x1e   : > { %217 = vst.msk [vmem:[#allocation2 + $0x80] sm:$0x1] %vm186_vm1, %v4549_v0  ;;  %220 = vst.msk [vmem:[#allocation2 + $0x8c] sm:$0x1] %vm186_vm1, %v4549_v0  ;;  %v767_v12 = vshll.u32 %v712_v9, 16  ;;  %v777_v13 = vshrl.u32 %v713_v3, 16 }
  0x1f   : > { %218 = vst.msk [vmem:[#allocation2 + $0x84] sm:$0xf] %vm183_vm0, %v4549_v0  ;;  %219 = vst.msk [vmem:[#allocation2 + $0x88] sm:$0xf] %vm183_vm0, %v4549_v0  ;;  %v783_v14 = vshll.u32 %v744_v4, 16  ;;  %v1218_v17 = vrot.slane %v1216_v7, 4 }
  0x20   : > { %221 = vst.msk [vmem:[#allocation2 + $0x90] sm:$0xf] %vm183_vm0, %v4549_v0  ;;  %222 = vst.msk [vmem:[#allocation2 + $0x94] sm:$0xf] %vm183_vm0, %v4549_v0  ;;  %v242_v15 = vld [vmem:[%s4689_s28 + $0xc] sm:$0xf] }
  0x21   : > { %223 = vst.msk [vmem:[#allocation2 + $0x98] sm:$0x1] %vm186_vm1, %v4549_v0  ;;  %226 = vst.msk [vmem:[#allocation2 + $0xa4] sm:$0x1] %vm186_vm1, %v4549_v0  ;;  %v775_v18 = vrot.slane %v773_v10, 5  ;;  %v292_v19 = vshrl.u32 %v241_v2, 16 }
  0x22   : > { %224 = vst.msk [vmem:[#allocation2 + $0x9c] sm:$0xf] %vm183_vm0, %v4549_v0  ;;  %225 = vst.msk [vmem:[#allocation2 + $0xa0] sm:$0xf] %vm183_vm0, %v4549_v0  ;;  %v766_v20 = vrot.slane %v764_v11, 4  ;;  %v769_v21 = vrot.slane %v767_v12, 5 }
  0x23   : > { %227 = vst.msk [vmem:[#allocation2 + $0xa8] sm:$0xf] %vm183_vm0, %v4549_v0  ;;  %228 = vst.msk [vmem:[#allocation2 + $0xac] sm:$0xf] %vm183_vm0, %v4549_v0  ;;  %v779_v22 = vrot.slane %v777_v13, 4  ;;  %v785_v23 = vrot.slane %v783_v14, 5 }
  0x24   : > { %229 = vst.msk [vmem:[#allocation2 + $0xb0] sm:$0x1] %vm186_vm1, %v4549_v0  ;;  %232 = vst.msk [vmem:[#allocation2 + $0xbc] sm:$0x1] %vm186_vm1, %v4549_v0  ;;  %v239_v24 = vld [vmem:[%s4689_s28] sm:$0xf]  ;;  %v770_v31 = vor.u32 %v769_v21, %v766_v20 }
  0x25   : > { %230 = vst.msk [vmem:[#allocation2 + $0xb4] sm:$0xf] %vm183_vm0, %v4549_v0  ;;  %231 = vst.msk [vmem:[#allocation2 + $0xb8] sm:$0xf] %vm183_vm0, %v4549_v0  ;;  %v294_v26 = vrot.slane %v292_v19, 7  ;;  %v295_v27 = vshll.u32 %v241_v2, 16  ;;  %v780_v32 = vor.u32 %v779_v22, %v775_v18 }
  0x26   : > { %233 = vst.msk [vmem:[#allocation2 + $0xc0] sm:$0xf] %vm183_vm0, %v4549_v0  ;;  %234 = vst.msk [vmem:[#allocation2 + $0xc4] sm:$0xf] %vm183_vm0, %v4549_v0  ;;  %v300_v28 = vshrl.u32 %v242_v15, 16  ;;  %v303_v33 = vshll.u32 %v242_v15, 16 }
  0x27   : > { %235 = vst.msk [vmem:[#allocation2 + $0xc8] sm:$0x1] %vm186_vm1, %v4549_v0  ;;  %238 = vst.msk [vmem:[#allocation2 + $0xd4] sm:$0x1] %vm186_vm1, %v4549_v0  ;;  %v240_v29 = vld [vmem:[%s4689_s28 + $0x4] sm:$0xf]  ;;  %v297_v37 = vor.u32 %v295_v27, %v294_v26 }
  0x28   : > { %236 = vst.msk [vmem:[#allocation2 + $0xcc] sm:$0xf] %vm183_vm0, %v4549_v0  ;;  %237 = vst.msk [vmem:[#allocation2 + $0xd0] sm:$0xf] %vm183_vm0, %v4549_v0  ;;  %v607_v35 = vld [vmem:[#allocation2 + $0x18] sm:$0xf] }
  0x29   : > { %vm4691_vm7 = vmor %vm1211_vm2, %vm1212_vm3  ;;  %v298_v38 = vrot.slane %v294_v26, 4  ;;  %v302_v39 = vrot.slane %v300_v28, 7  ;;  %v275_v40 = vshrl.u32 %v239_v24, 16  ;;  %v243_v41 = vld [vmem:[%s4689_s28 + $0x10] sm:$0xf]  ;;  %v771_v42 = vrot.slane %v770_v31, 4 }
  0x2a   : > { %v1217_v16 = vsel %vm4691_vm7, %v4096_v6, %v1216_v7  ;;  %v1220_v25 = vsel %vm4691_vm7, %v1218_v17, %v1219_v8  ;;  %vm4705_vm10 = vmand %vm183_vm0, %vm596_vm9  ;;  %v781_v43 = vrot.slane %v780_v32, 4  ;;  %v278_v45 = vshll.u32 %v239_v24, 16  ;;  %v244_v51 = vld [vmem:[%s4689_s28 + $0x14] sm:$0xf]  ;;  %v598_v55 = vld [vmem:[#allocation2 + $0xc] sm:$0xf] }
  0x2b   : > { %v4176_v30 = vcombine.low %v1217_v16, %v1220_v25  ;;  %vm4711_vm11 = vmor %vm760_vm4, %vm761_vm5  ;;  %v283_v46 = vshrl.u32 %v240_v29, 16  ;;  %v305_v47 = vor.u32 %v303_v33, %v302_v39  ;;  %v608_v48 = vsel %vm4705_vm10, %v297_v37, %v607_v35  ;;  %v604_v61 = vld [vmem:[#allocation2 + $0x14] sm:$0x1]  ;;  %v611_v62 = vld [vmem:[#allocation2 + $0x20] sm:$0x1]  ;;  %s4553_s5 = smov 24  }
  0x2c   : > { %vm4719_vm12 = vmor %vm271_vm6, %vm272_vm8  ;;  %v277_v49 = vrot.slane %v275_v40, 7  ;;  %v286_v50 = vshll.u32 %v240_v29, 16  ;;  %v776_v52 = vsel %vm4711_vm11, %v771_v42, %v775_v18  ;;  %v786_v53 = vsel %vm4711_vm11, %v781_v43, %v785_v23  ;;  %609 = vst [vmem:[#allocation2 + $0x18] sm:$0xf] %v608_v48  ;;  %v4740_v5 = vld [vmem:[%s4689_s28 + $0x18] sm:$0xf] }
  0x2d   : > { %2735 = vrot.lane.b32.xlu1 %v4176_v30, %s4550_s29  ;;  %v285_v54 = vrot.slane %v283_v46, 7  ;;  %v309_v56 = vshrl.u32 %v243_v41, 16  ;;  %v4160_v57 = vcombine.low %v776_v52, %v786_v53  ;;  %v306_v58 = vsel %vm4719_vm12, %v298_v38, %v305_v47  ;;  %vm4734_vm13 = vmand %vm186_vm1, %vm271_vm6  ;;  %v614_v8 = vld [vmem:[#allocation2 + $0x24] sm:$0xf]  ;;  %v618_v21 = vld [vmem:[#allocation2 + $0x2c] sm:$0x1] }
  0x2e   : > { %v280_v59 = vor.u32 %v278_v45, %v277_v49  ;;  %v281_v60 = vrot.slane %v277_v49, 4  ;;  %610 = vst.msk [vmem:[#allocation2 + $0x1c] sm:$0xf] %vm183_vm0, %v306_v58  ;;  %v312_v3 = vshll.u32 %v243_v41, 16  ;;  %v317_v4 = vshrl.u32 %v244_v51, 16  ;;  %s4554_s6 = smov 20  }
  0x2f   : > { %v288_v0 = vor.u32 %v286_v50, %v285_v54  ;;  %v311_v2 = vrot.slane %v309_v56, 7  ;;  %2655 = vrot.lane.b32.xlu0 %v4160_v57, %s4551_s30  ;;  %v320_v7 = vshll.u32 %v244_v51, 16  ;;  %v290_v9 = vrot.slane %v285_v54, 4  ;;  %v4756_v22 = vld [vmem:[%s4689_s28 + $0x1c] sm:$0xf]  ;;  %s4555_s7 = smov 32  }
  0x30   : > { %v599_v6 = vsel %vm4705_vm10, %v280_v59, %v598_v55  ;;  %v307_v10 = vrot.slane %v302_v39, 4  ;;  %v319_v14 = vrot.slane %v317_v4, 7  ;;  %v326_v17 = vshrl.u32 %v4740_v5, 16  ;;  %s4556_s8 = smov 16   ;;  %s4557_s9 = smov 28  }
  0x31   : > { %v289_v11 = vsel %vm4719_vm12, %v281_v60, %v288_v0  ;;  %600 = vst [vmem:[#allocation2 + $0xc] sm:$0xf] %v599_v6  ;;  %v314_v12 = vor.u32 %v312_v3, %v311_v2  ;;  %v315_v13 = vrot.slane %v311_v2, 4  ;;  %v605_v15 = vsel %vm4734_vm13, %v290_v9, %v604_v61  ;;  %s4312_s26 = sshll.u32 %s4683_s24, 8  ;;  %s169_s24 = sand.u32 1, %s4539_s13  }
  0x32   : > { %601 = vst.msk [vmem:[#allocation2 + $0x10] sm:$0xf] %vm183_vm0, %v289_v11  ;;  %v612_v16 = vsel %vm4734_vm13, %v307_v10, %v611_v62  ;;  %v322_v18 = vor.u32 %v320_v7, %v319_v14  ;;  %606 = vst [vmem:[#allocation2 + $0x14] sm:$0x1] %v605_v15  ;;  %v324_v20 = vrot.slane %v319_v14, 4  ;;  %v329_v23 = vshll.u32 %v4740_v5, 16 }
  0x33   : > { %v615_v19 = vsel %vm4705_vm10, %v314_v12, %v614_v8  ;;  %613 = vst [vmem:[#allocation2 + $0x20] sm:$0x1] %v612_v16  ;;  %v1328_v24 = vld [vmem:[#allocation2 + $0x18] sm:$0xf]  ;;  %v334_v37 = vshrl.u32 %v4756_v22, 16  ;;  %vm3328_vm15 = vcmask 64512  }
  0x34   : > { %616 = vst [vmem:[#allocation2 + $0x24] sm:$0xf] %v615_v19  ;;  %v4759_v25 = vld [vmem:[#allocation2 + $0x18] sm:$0xf]  ;;  %v1399_v27 = vshrl.u32 %v1328_v24, 16  ;;  %v1402_v28 = vshll.u32 %v1328_v24, 16  ;;  %v323_v29 = vsel %vm4719_vm12, %v315_v13, %v322_v18  ;;  %v619_v35 = vsel %vm4734_vm13, %v324_v20, %v618_v21 }
  0x35   : > { %v2367_v26 = vld [vmem:[#allocation2 + $0x18] sm:$0xe]  ;;  %v1984_v30 = vshrl.u32 %v4759_v25, 16  ;;  %v4764_v31 = vld [vmem:[#allocation2 + $0x1c] sm:$0xf]  ;;  %v1987_v33 = vshll.u32 %v4759_v25, 16 }
  0x36   : > { %617 = vst.msk [vmem:[#allocation2 + $0x28] sm:$0xf] %vm183_vm0, %v323_v29  ;;  %v4767_v32 = vld [vmem:[#allocation2 + $0x1c] sm:$0xf]  ;;  %v4193_v38 = vcombine.low %v1328_v24, %v4764_v31  ;;  %v4774_v39 = vrot.slane %v1399_v27, 4  ;;  %v4776_v40 = vrot.slane %v1402_v28, 5 }
  0x37   : > { %v4128_v41 = vrot.slane %v2367_v26, 9  ;;  %620 = vst [vmem:[#allocation2 + $0x2c] sm:$0x1] %v619_v35  ;;  %v1412_v42 = vshrl.u32 %v4764_v31, 16  ;;  %v4779_v45 = vrot.slane %v1984_v30, 4  ;;  %v4781_v46 = vrot.slane %v1987_v33, 5 }
  0x38   : > { %v1326_v43 = vld [vmem:[#allocation2 + $0xc] sm:$0xf]  ;;  %v1997_v47 = vshrl.u32 %v4767_v32, 16  ;;  %2833 = vrot.lane.b32.xlu1 %v4193_v38, %s4552_s4  ;;  %v4240_v51 = vcombine.low %v4759_v25, %v4767_v32  ;;  %v1405_v57 = vor.u32 %v4776_v40, %v4774_v39  ;;  %v2433_v62 = vrot.slane %v4767_v32, 5  ;;  %v1759_v0 = vld [vmem:[#allocation2 + $0x18] sm:$0xe] }
  0x39   : > { %v4785_v48 = vld [vmem:[#allocation2 + $0x10] sm:$0xf]  ;;  %v1375_v49 = vshrl.u32 %v1326_v43, 16  ;;  %v1378_v50 = vshll.u32 %v1326_v43, 16  ;;  %v1758_v52 = vld [vmem:[#allocation2 + $0xc] sm:$0xe]  ;;  %v1990_v14 = vor.u32 %v4781_v46, %v4779_v45 }
  0x3a   : > { %v4192_v53 = vcombine.low %v1326_v43, %v4785_v48  ;;  %v4790_v54 = vld [vmem:[#allocation2 + $0x14] sm:$0x1]  ;;  %v4112_v55 = vrot.slane %v1758_v52, 9  ;;  %v1824_v56 = vrot.slane %v4785_v48, 5  ;;  %v1388_v2 = vshrl.u32 %v4785_v48, 16  ;;  %s4558_s11 = smov [#allocation3]  }
  0x3b   : > { %v4795_v58 = vrot.slane %v1375_v49, 4  ;;  %v4797_v59 = vrot.slane %v1378_v50, 5  ;;  %v1937_v60 = vld [vmem:[#allocation2 + $0x24] sm:$0xf]  ;;  %v1827_v61 = vrot.slane %v4790_v54, 5  ;;  %v2434_v12 = vsel %vm4691_vm7, %v4128_v41, %v2433_v62  ;;  %s4489_s17 = sshll.u32 %s4558_s11, 4  ;;  %s4490_s17 = int_to_ptr.vmem [resolvable:$false] %s4489_s17 }
  0x3c   : > { %2831 = vrot.lane.b32.xlu0 %v4192_v53, %s4552_s4  ;;  %v2008_v3 = vshrl.u32 %v1937_v60, 16  ;;  %v2011_v4 = vshll.u32 %v1937_v60, 16  ;;  %v1826_v6 = vrot.slane %v1824_v56, 4  ;;  %v4803_v7 = vld [vmem:[#allocation2 + $0x10] sm:$0xf]  ;;  %v1825_v9 = vsel %vm4691_vm7, %v4112_v55, %v1824_v56  ;;  %s4491_s19 = scalar_lea.vmem %s4490_s17, 64 }
  0x3d   : > { %v1938_v8 = vld [vmem:[#allocation2 + $0x28] sm:$0xf]  ;;  %v4807_v10 = vld [vmem:[#allocation2 + $0x14] sm:$0x1]  ;;  %v1148_v11 = vld [vmem:[#allocation2 + $0xc] sm:$0xe]  ;;  %v1381_v13 = vor.u32 %v4797_v59, %v4795_v58 }
  0x3e   : > { %v2010_v15 = vrot.slane %v2008_v3, 4  ;;  %v2013_v16 = vrot.slane %v2011_v4, 5  ;;  %v2021_v18 = vshrl.u32 %v1938_v8, 16  ;;  %v4241_v19 = vcombine.low %v1937_v60, %v1938_v8  ;;  %v4815_v20 = vld [vmem:[#allocation2 + $0x20] sm:$0x1] }
  0x3f   : > { %v1828_v21 = vsel %vm4691_vm7, %v1826_v6, %v1827_v61  ;;  %v4097_v24 = vrot.slane %v1148_v11, 9  ;;  %v1223_v25 = vrot.slane %v4803_v7, 5  ;;  %v1226_v26 = vrot.slane %v4807_v10, 5  ;;  %v1359_v27 = vld [vmem:[#allocation2 + $0x20] sm:$0x1] }
  0x40   : > { %3089 = vrot.lane.b32.xlu1 %v4241_v19, %s4553_s5  ;;  %3087 = vrot.lane.b32.xlu0 %v4240_v51, %s4553_s5  ;;  %v4224_v28 = vcombine.low %v1825_v9, %v1828_v21  ;;  %v2435_v29 = vrot.slane %v2433_v62, 4  ;;  %v2436_v30 = vrot.slane %v4815_v20, 5  ;;  %v4113_v33 = vrot.slane %v1759_v0, 9  ;;  %v1968_v35 = vld [vmem:[#allocation2 + $0x2c] sm:$0x1] }
  0x41   : > { %v1224_v38 = vsel %vm4691_vm7, %v4097_v24, %v1223_v25  ;;  %v1225_v39 = vrot.slane %v1223_v25, 4  ;;  %v1831_v40 = vrot.slane %v4764_v31, 5  ;;  %v1834_v41 = vrot.slane %v1359_v27, 5  ;;  %v2368_v43 = vld [vmem:[#allocation2 + $0x24] sm:$0xe] }
  0x42   : > { %v2437_v49 = vsel %vm4691_vm7, %v2435_v29, %v2436_v30  ;;  %v4129_v50 = vrot.slane %v2368_v43, 9  ;;  %v2440_v52 = vrot.slane %v1938_v8, 5  ;;  %v2443_v51 = vrot.slane %v1968_v35, 5  ;;  %v4851_v43 = vld [vmem:[#allocation2 + $0x1c] sm:$0xf] }
  0x43   : > { %v1227_v53 = vsel %vm4691_vm7, %v1225_v39, %v1226_v26  ;;  %v4272_v55 = vcombine.low %v2434_v12, %v2437_v49  ;;  %v1832_v56 = vsel %vm4691_vm7, %v4113_v33, %v1831_v40  ;;  %v1833_v60 = vrot.slane %v1831_v40, 4  ;;  %v714_v12 = vld [vmem:[#allocation2 + $0xc] sm:$0xf]  ;;  %v1149_v46 = vld [vmem:[#allocation2 + $0x18] sm:$0xe] }
  0x44   : > { %2991 = vrot.lane.b32.xlu0 %v4224_v28, %s4554_s6  ;;  %v4177_v61 = vcombine.low %v1224_v38, %v1227_v53  ;;  %v2441_v62 = vsel %vm4691_vm7, %v4129_v50, %v2440_v52  ;;  %v2442_v0 = vrot.slane %v2440_v52, 4  ;;  %v1406_v3 = vrot.slane %v1405_v57, 4 }
  0x45   : > { %v1835_v4 = vsel %vm4691_vm7, %v1833_v60, %v1834_v41  ;;  %v1408_v6 = vshll.u32 %v4764_v31, 16  ;;  %v1414_v9 = vrot.slane %v1412_v42, 4  ;;  %v1418_v11 = vshll.u32 %v1359_v27, 16 }
  0x46   : > { %2737 = vrot.lane.b32.xlu1 %v4177_v61, %s4550_s29  ;;  %v4225_v19 = vcombine.low %v1832_v56, %v1835_v4  ;;  %v2444_v21 = vsel %vm4691_vm7, %v2442_v0, %v2443_v51  ;;  %v2014_v24 = vor.u32 %v2013_v16, %v2010_v15  ;;  %v2017_v25 = vshll.u32 %v1938_v8, 16  ;;  %v716_v15 = vld [vmem:[#allocation2 + $0x18] sm:$0xf]  ;;  %v4858_v0 = vld [vmem:[#allocation2 + $0x20] sm:$0x1] }
  0x47   : > { %v4273_v26 = vcombine.low %v2441_v62, %v2444_v21  ;;  %v1410_v57 = vrot.slane %v1408_v6, 5  ;;  %v1420_v28 = vrot.slane %v1418_v11, 5  ;;  %v2023_v29 = vrot.slane %v2021_v18, 4 }
  0x48   : > { %3247 = vrot.lane.b32.xlu0 %v4272_v55, %s4555_s7  ;;  %v2015_v30 = vrot.slane %v2014_v24, 4  ;;  %v2019_v31 = vrot.slane %v2017_v25, 5  ;;  %v2027_v42 = vshll.u32 %v1968_v35, 16  ;;  %v788_v27 = vshrl.u32 %v714_v12, 16 }
  0x49   : > { %v1411_v33 = vsel %vm4711_vm11, %v1406_v3, %v1410_v57  ;;  %v1415_v38 = vor.u32 %v1414_v9, %v1410_v57  ;;  %v791_v39 = vshll.u32 %v714_v12, 16  ;;  %v797_v40 = vshll.u32 %v4803_v7, 16  ;;  %v718_v57 = vld [vmem:[#allocation2 + $0x24] sm:$0xf] }
  0x4a   : > { %2993 = vrot.lane.b32.xlu1 %v4225_v19, %s4554_s6  ;;  %v2020_v8 = vsel %vm4711_vm11, %v2015_v30, %v2019_v31  ;;  %v2024_v16 = vor.u32 %v2023_v29, %v2019_v31  ;;  %v2029_v18 = vrot.slane %v2027_v42, 5  ;;  %v790_v41 = vrot.slane %v788_v27, 4 }
  0x4b   : > { %v1416_v35 = vrot.slane %v1415_v38, 4  ;;  %v793_v49 = vrot.slane %v791_v39, 5  ;;  %v799_v50 = vrot.slane %v797_v40, 5  ;;  %v801_v52 = vshrl.u32 %v4803_v7, 16 }
  0x4c   : > { %3249 = vrot.lane.b32.xlu0 %v4273_v26, %s4555_s7  ;;  %v2025_v51 = vrot.slane %v2024_v16, 4  ;;  %v807_v53 = vshll.u32 %v4807_v10, 16  ;;  %v812_v55 = vshrl.u32 %v716_v15, 16  ;;  %v815_v56 = vshll.u32 %v716_v15, 16 }
  0x4d   : > { %v1421_v60 = vsel %vm4711_vm11, %v1416_v35, %v1420_v28  ;;  %v794_v61 = vor.u32 %v793_v49, %v790_v41  ;;  %v803_v62 = vrot.slane %v801_v52, 4  ;;  %v821_v3 = vshll.u32 %v4851_v43, 16 }
  0x4e   : > { %v4209_v4 = vcombine.low %v1411_v33, %v1421_v60  ;;  %v2030_v7 = vsel %vm4711_vm11, %v2025_v51, %v2029_v18  ;;  %v809_v6 = vrot.slane %v807_v53, 5  ;;  %v814_v9 = vrot.slane %v812_v55, 4  ;;  %v747_v18 = vld [vmem:[#allocation2 + $0x2c] sm:$0x1] }
  0x4f   : > { %v4257_v11 = vcombine.low %v2020_v8, %v2030_v7  ;;  %v795_v12 = vrot.slane %v794_v61, 4  ;;  %v804_v10 = vor.u32 %v803_v62, %v799_v50  ;;  %v817_v19 = vrot.slane %v815_v56, 5  ;;  %v1150_v7 = vld [vmem:[#allocation2 + $0x24] sm:$0xe] }
  0x50   : > { %2913 = vrot.lane.b32.xlu1 %v4209_v4, %s4556_s8  ;;  %v823_v21 = vrot.slane %v821_v3, 5  ;;  %v825_v24 = vshrl.u32 %v4851_v43, 16  ;;  %v831_v25 = vshll.u32 %v4858_v0, 16  ;;  %v1382_v26 = vrot.slane %v1381_v13, 4  ;;  %v719_v13 = vld [vmem:[#allocation2 + $0x28] sm:$0xf] }
  0x51   : > { %v800_v28 = vsel %vm4711_vm11, %v795_v12, %v799_v50  ;;  %v805_v29 = vrot.slane %v804_v10, 4  ;;  %v818_v30 = vor.u32 %v817_v19, %v814_v9  ;;  %v1384_v31 = vshll.u32 %v4785_v48, 16 }
  0x52   : > { %v827_v42 = vrot.slane %v825_v24, 4  ;;  %v833_v27 = vrot.slane %v831_v25, 5  ;;  %v1390_v33 = vrot.slane %v1388_v2, 4  ;;  %v1394_v38 = vshll.u32 %v4790_v54, 16 }
  0x53   : > { %v810_v39 = vsel %vm4711_vm11, %v805_v29, %v809_v6  ;;  %v819_v58 = vrot.slane %v818_v30, 4  ;;  %v1386_v59 = vrot.slane %v1384_v31, 5  ;;  %v836_v40 = vshrl.u32 %v718_v57, 16 }
  0x54   : > { %3169 = vrot.lane.b32.xlu1 %v4257_v11, %s4557_s9  ;;  %v4161_v15 = vcombine.low %v800_v28, %v810_v39  ;;  %v828_v8 = vor.u32 %v827_v42, %v823_v21  ;;  %v1396_v16 = vrot.slane %v1394_v38, 5  ;;  %v839_v41 = vshll.u32 %v718_v57, 16 }
  0x55   : > { %v824_v48 = vsel %vm4711_vm11, %v819_v58, %v823_v21  ;;  %v1387_v54 = vsel %vm4711_vm11, %v1382_v26, %v1386_v59  ;;  %v1391_v2 = vor.u32 %v1390_v33, %v1386_v59  ;;  %v838_v35 = vrot.slane %v836_v40, 4  ;;  %v1330_v40 = vld [vmem:[#allocation2 + $0x24] sm:$0xf] }
  0x56   : > { %2657 = vrot.lane.b32.xlu0 %v4161_v15, %s4551_s30  ;;  %v829_v49 = vrot.slane %v828_v8, 4  ;;  %v841_v50 = vrot.slane %v839_v41, 5  ;;  %v845_v52 = vshll.u32 %v719_v13, 16  ;;  %v849_v51 = vshrl.u32 %v719_v13, 16  ;;  %v1331_v15 = vld [vmem:[#allocation2 + $0x28] sm:$0xf] }
  0x57   : > { %v1392_v53 = vrot.slane %v1391_v2, 4  ;;  %v855_v55 = vshll.u32 %v747_v18, 16  ;;  %v1991_v56 = vrot.slane %v1990_v14, 4  ;;  %v1993_v60 = vshll.u32 %v4767_v32, 16 }
  0x58   : > { %v834_v61 = vsel %vm4711_vm11, %v829_v49, %v833_v27  ;;  %v842_v62 = vor.u32 %v841_v50, %v838_v35  ;;  %v847_v3 = vrot.slane %v845_v52, 5  ;;  %v851_v4 = vrot.slane %v849_v51, 4  ;;  %v1760_v52 = vld [vmem:[#allocation2 + $0x24] sm:$0xe] }
  0x59   : > { %v4162_v6 = vcombine.low %v824_v48, %v834_v61  ;;  %v1397_v9 = vsel %vm4711_vm11, %v1392_v53, %v1396_v16  ;;  %v857_v11 = vrot.slane %v855_v55, 5  ;;  %v1995_v12 = vrot.slane %v1993_v60, 5  ;;  %v625_v55 = vld [vmem:[#allocation2 + $0x38] sm:$0x1] }
  0x5a   : > { %v4208_v10 = vcombine.low %v1387_v54, %v1397_v9  ;;  %v843_v19 = vrot.slane %v842_v62, 4  ;;  %v852_v21 = vor.u32 %v851_v4, %v847_v3  ;;  %v1999_v45 = vrot.slane %v1997_v47, 4  ;;  %v1360_v54 = vld [vmem:[#allocation2 + $0x2c] sm:$0x1]  ;;  %v247_v62 = vld [vmem:[%s4689_s28 + $0x20] sm:$0xf] }
  0x5b   : > { %2659 = vrot.lane.b32.xlu1 %v4162_v6, %s4551_s30  ;;  %v1996_v14 = vsel %vm4711_vm11, %v1991_v56, %v1995_v12  ;;  %v2003_v24 = vshll.u32 %v4815_v20, 16  ;;  %v4099_v25 = vrot.slane %v1150_v7, 9  ;;  %v1237_v26 = vrot.slane %v719_v13, 5 }
  0x5c   : > { %2911 = vrot.lane.b32.xlu0 %v4208_v10, %s4556_s8  ;;  %v848_v57 = vsel %vm4711_vm11, %v843_v19, %v847_v3  ;;  %v853_v28 = vrot.slane %v852_v21, 4  ;;  %v2000_v29 = vor.u32 %v1999_v45, %v1995_v12  ;;  %v1240_v30 = vrot.slane %v747_v18, 5  ;;  %v621_v18 = vld [vmem:[#allocation2 + $0x30] sm:$0xf]  ;;  %v248_v19 = vld [vmem:[%s4689_s28 + $0x24] sm:$0xf] }
  0x5d   : > { %v2005_v32 = vrot.slane %v2003_v24, 5  ;;  %v1238_v47 = vsel %vm4691_vm7, %v4099_v25, %v1237_v26  ;;  %v1239_v31 = vrot.slane %v1237_v26, 4  ;;  %v4098_v42 = vrot.slane %v1149_v46, 9  ;;  %v4934_v21 = vld [vmem:[%s4689_s28 + $0x28] sm:$0xf] }
  0x5e   : > { %v858_v27 = vsel %vm4711_vm11, %v853_v28, %v857_v11  ;;  %v2001_v20 = vrot.slane %v2000_v29, 4  ;;  %v1230_v33 = vrot.slane %v4851_v43, 5  ;;  %v1233_v38 = vrot.slane %v4858_v0, 5 }
  0x5f   : > { %v4163_v39 = vcombine.low %v848_v57, %v858_v27  ;;  %v1241_v58 = vsel %vm4691_vm7, %v1239_v31, %v1240_v30  ;;  %v328_v59 = vrot.slane %v326_v17, 7  ;;  %v336_v13 = vrot.slane %v334_v37, 7 }
  0x60   : > { %v2006_v8 = vsel %vm4711_vm11, %v2001_v20, %v2005_v32  ;;  %v4179_v16 = vcombine.low %v1238_v47, %v1241_v58  ;;  %v1231_v43 = vsel %vm4691_vm7, %v4098_v42, %v1230_v33  ;;  %v1232_v0 = vrot.slane %v1230_v33, 4  ;;  %v628_v20 = vld [vmem:[#allocation2 + $0x3c] sm:$0xf] }
  0x61   : > { %2661 = vrot.lane.b32.xlu1 %v4163_v39, %s4551_s30  ;;  %v4256_v41 = vcombine.low %v1996_v14, %v2006_v8  ;;  %v331_v17 = vor.u32 %v329_v23, %v328_v59  ;;  %v332_v48 = vrot.slane %v328_v59, 4  ;;  %v337_v37 = vshll.u32 %v4756_v22, 16 }
  0x62   : > { %v1234_v2 = vsel %vm4691_vm7, %v1232_v0, %v1233_v38  ;;  %v1423_v35 = vshrl.u32 %v1330_v40, 16  ;;  %v1426_v49 = vshll.u32 %v1330_v40, 16  ;;  %v1436_v50 = vshrl.u32 %v1331_v15, 16 }
  0x63   : > { %3167 = vrot.lane.b32.xlu0 %v4256_v41, %s4557_s9  ;;  %v4178_v51 = vcombine.low %v1231_v43, %v1234_v2  ;;  %v339_v53 = vor.u32 %v337_v37, %v336_v13  ;;  %v622_v5 = vsel %vm4705_vm10, %v331_v17, %v621_v18  ;;  %v4194_v23 = vcombine.low %v1330_v40, %v1331_v15 }
  0x64   : > { %623 = vst [vmem:[#allocation2 + $0x30] sm:$0xf] %v622_v5  ;;  %v1425_v22 = vrot.slane %v1423_v35, 4  ;;  %v1428_v56 = vrot.slane %v1426_v49, 5  ;;  %v341_v60 = vrot.slane %v336_v13, 4  ;;  %v1432_v61 = vshll.u32 %v1331_v15, 16 }
  0x65   : > { %2741 = vrot.lane.b32.xlu1 %v4179_v16, %s4550_s29  ;;  %v340_v3 = vsel %vm4719_vm12, %v332_v48, %v339_v53  ;;  %v1438_v4 = vrot.slane %v1436_v50, 4  ;;  %v1442_v7 = vshll.u32 %v1360_v54, 16  ;;  %v4114_v6 = vrot.slane %v1760_v52, 9 }
  0x66   : > { %624 = vst.msk [vmem:[#allocation2 + $0x34] sm:$0xf] %vm183_vm0, %v340_v3  ;;  %v626_v9 = vsel %vm4734_vm13, %v341_v60, %v625_v55  ;;  %v1429_v11 = vor.u32 %v1428_v56, %v1425_v22  ;;  %v1434_v12 = vrot.slane %v1432_v61, 5  ;;  %v1838_v10 = vrot.slane %v1331_v15, 5 }
  0x67   : > { %2739 = vrot.lane.b32.xlu0 %v4178_v51, %s4550_s29  ;;  %627 = vst [vmem:[#allocation2 + $0x38] sm:$0x1] %v626_v9  ;;  %v1444_v45 = vrot.slane %v1442_v7, 5  ;;  %v1841_v46 = vrot.slane %v1360_v54, 5  ;;  %v343_v14 = vshrl.u32 %v247_v62, 16  ;;  %v346_v24 = vshll.u32 %v247_v62, 16 }
  0x68   : > { %v1430_v25 = vrot.slane %v1429_v11, 4  ;;  %v1439_v26 = vor.u32 %v1438_v4, %v1434_v12  ;;  %v1839_v57 = vsel %vm4691_vm7, %v4114_v6, %v1838_v10  ;;  %v1840_v28 = vrot.slane %v1838_v10, 4  ;;  %v632_v7 = vld [vmem:[#allocation2 + $0x44] sm:$0x1] }
  0x69   : > { %v345_v29 = vrot.slane %v343_v14, 7  ;;  %v351_v30 = vshrl.u32 %v248_v19, 16  ;;  %v354_v32 = vshll.u32 %v248_v19, 16  ;;  %v360_v47 = vshrl.u32 %v4934_v21, 16 }
  0x6a   : > { %v1435_v31 = vsel %vm4711_vm11, %v1430_v25, %v1434_v12  ;;  %v1440_v42 = vrot.slane %v1439_v26, 4  ;;  %v1842_v27 = vsel %vm4691_vm7, %v1840_v28, %v1841_v46  ;;  %v363_v33 = vshll.u32 %v4934_v21, 16 }
  0x6b   : > { %v1332_v38 = vld [vmem:[#allocation2 + $0x30] sm:$0xf]  ;;  %2835 = vrot.lane.b32.xlu0 %v4194_v23, %s4552_s4  ;;  %v4226_v58 = vcombine.low %v1839_v57, %v1842_v27  ;;  %v348_v59 = vor.u32 %v346_v24, %v345_v29  ;;  %v349_v13 = vrot.slane %v345_v29, 4  ;;  %v353_v40 = vrot.slane %v351_v30, 7 }
  0x6c   : > { %v1761_v39 = vld [vmem:[#allocation2 + $0x30] sm:$0xe]  ;;  %v1447_v15 = vshrl.u32 %v1332_v38, 16  ;;  %v1450_v8 = vshll.u32 %v1332_v38, 16  ;;  %v1445_v16 = vsel %vm4711_vm11, %v1440_v42, %v1444_v45  ;;  %vm3361_vm2 = vcmask 97280  }
  0x6d   : > { %v4115_v43 = vrot.slane %v1761_v39, 9  ;;  %v1939_v0 = vld [vmem:[#allocation2 + $0x30] sm:$0xf]  ;;  %v1333_v18 = vld [vmem:[#allocation2 + $0x34] sm:$0xf]  ;;  %v4210_v41 = vcombine.low %v1435_v31, %v1445_v16  ;;  %v356_v17 = vor.u32 %v354_v32, %v353_v40  ;;  %v629_v48 = vsel %vm4705_vm10, %v348_v59, %v628_v20 }
  0x6e   : > { %v2032_v37 = vshrl.u32 %v1939_v0, 16  ;;  %v1449_v54 = vrot.slane %v1447_v15, 4  ;;  %v1452_v2 = vrot.slane %v1450_v8, 5  ;;  %v1460_v35 = vshrl.u32 %v1333_v18, 16  ;;  %v1361_v50 = vld [vmem:[#allocation2 + $0x38] sm:$0x1] }
  0x6f   : > { %v4195_v49 = vcombine.low %v1332_v38, %v1333_v18  ;;  %630 = vst [vmem:[#allocation2 + $0x3c] sm:$0xf] %v629_v48  ;;  %v1456_v52 = vshll.u32 %v1333_v18, 16  ;;  %v1466_v51 = vshll.u32 %v1361_v50, 16  ;;  %2915 = vrot.lane.b32.xlu0 %v4210_v41, %s4556_s8  ;;  %v1845_v53 = vrot.slane %v1333_v18, 5  ;;  %v4444_v41 = vld [vmem:[%s6448_s1] sm:$0xff]  }
  0x70   : > { %v1848_v5 = vrot.slane %v1361_v50, 5  ;;  %v4951_v23 = vld [vmem:[#allocation2 + $0x34] sm:$0xf]  ;;  %v1453_v55 = vor.u32 %v1452_v2, %v1449_v54  ;;  %v1462_v22 = vrot.slane %v1460_v35, 4  ;;  %v357_v56 = vsel %vm4719_vm12, %v349_v13, %v356_v17  ;;  %v4963_v10 = vld [vmem:[#allocation2 + $0x38] sm:$0x1]  ;;  %4332 = vmatprep.subr.bf16.mxu0 %v4444_v41  ;;  %4370 = vmatprep.subr.bf16.mxu1 %v4444_v41 }
  0x71   : > { %2837 = vrot.lane.b32.xlu1 %v4195_v49, %s4552_s4  ;;  %v2034_v60 = vrot.slane %v2032_v37, 4  ;;  %v1458_v61 = vrot.slane %v1456_v52, 5  ;;  %v1468_v62 = vrot.slane %v1466_v51, 5  ;;  %v4958_v3 = vsel %vm4691_vm7, %v4115_v43, %v1845_v53  ;;  %631 = vst.msk [vmem:[#allocation2 + $0x40] sm:$0xf] %vm183_vm0, %v357_v56  ;;  %4333 = vmatpush3.bf16.msra.mxu0 %v4444_v41 }
  0x72   : > { %v1847_v4 = vrot.slane %v1845_v53, 4  ;;  %v1454_v6 = vrot.slane %v1453_v55, 4  ;;  %v2035_v9 = vshll.u32 %v1939_v0, 16  ;;  %v2045_v11 = vshrl.u32 %v4951_v23, 16  ;;  %v4969_v24 = vld [vmem:[#allocation2 + $0x30] sm:$0xf]  ;;  %4373 = vmatpush3.bf16.msra.mxu1 %v4444_v41 }
  0x73   : > { %v4242_v12 = vcombine.low %v1939_v0, %v4951_v23  ;;  %v1463_v19 = vor.u32 %v1462_v22, %v1458_v61  ;;  %2995 = vrot.lane.b32.xlu0 %v4226_v58, %s4554_s6  ;;  %v358_v46 = vrot.slane %v353_v40, 4  ;;  %v2041_v14 = vshll.u32 %v4951_v23, 16  ;;  %v4985_v40 = vld [vmem:[#allocation2 + $0x34] sm:$0xf]  ;;  %v5000_v49 = vld [vmem:[#allocation2 + $0x38] sm:$0x1] }
  0x74   : > { %v1849_v45 = vsel %vm4691_vm7, %v1847_v4, %v1848_v5  ;;  %v1459_v25 = vsel %vm4711_vm11, %v1454_v6, %v1458_v61  ;;  %v2037_v57 = vrot.slane %v2035_v9, 5  ;;  %v2047_v28 = vrot.slane %v2045_v11, 4  ;;  %v2369_v51 = vld [vmem:[#allocation2 + $0x30] sm:$0xe] }
  0x75   : > { %v4227_v26 = vcombine.low %v4958_v3, %v1849_v45  ;;  %v1464_v29 = vrot.slane %v1463_v19, 4  ;;  %v633_v32 = vsel %vm4734_vm13, %v358_v46, %v632_v7  ;;  %v2043_v31 = vrot.slane %v2041_v14, 5 }
  0x76   : > { %v4974_v30 = vld [vmem:[#allocation2 + $0x3c] sm:$0xf]  ;;  %v2051_v42 = vshll.u32 %v4963_v10, 16  ;;  %634 = vst [vmem:[#allocation2 + $0x44] sm:$0x1] %v633_v32  ;;  %v2038_v38 = vor.u32 %v2037_v57, %v2034_v60  ;;  %v860_v39 = vshrl.u32 %v4969_v24, 16 }
  0x77   : > { %v2056_v27 = vshrl.u32 %v4974_v30, 16  ;;  %v2059_v20 = vshll.u32 %v4974_v30, 16  ;;  %v1469_v58 = vsel %vm4711_vm11, %v1464_v29, %v1468_v62  ;;  %3091 = vrot.lane.b32.xlu0 %v4242_v12, %s4553_s5  ;;  %v2048_v59 = vor.u32 %v2047_v28, %v2043_v31  ;;  %v5006_v3 = vld [vmem:[#allocation2 + $0x3c] sm:$0xf] }
  0x78   : > { %v2053_v13 = vrot.slane %v2051_v42, 5  ;;  %v863_v15 = vshll.u32 %v4969_v24, 16  ;;  %v4211_v8 = vcombine.low %v1459_v25, %v1469_v58  ;;  %v4988_v16 = vld [vmem:[#allocation2 + $0x40] sm:$0xf]  ;;  %v2039_v18 = vrot.slane %v2038_v38, 4 }
  0x79   : > { %v2058_v43 = vrot.slane %v2056_v27, 4  ;;  %v2061_v0 = vrot.slane %v2059_v20, 5  ;;  %v2069_v17 = vshrl.u32 %v4988_v16, 16  ;;  %v4243_v48 = vcombine.low %v4974_v30, %v4988_v16  ;;  %v5016_v14 = vld [vmem:[#allocation2 + $0x40] sm:$0xf] }
  0x7a   : > { %v2065_v37 = vshll.u32 %v4988_v16, 16  ;;  %v2049_v54 = vrot.slane %v2048_v59, 4  ;;  %2917 = vrot.lane.b32.xlu1 %v4211_v8, %s4556_s8  ;;  %v2044_v35 = vsel %vm4711_vm11, %v2039_v18, %v2043_v31  ;;  %v862_v50 = vrot.slane %v860_v39, 4  ;;  %v1152_v41 = vld [vmem:[#allocation2 + $0x3c] sm:$0xe] }
  0x7b   : > { %v2062_v2 = vor.u32 %v2061_v0, %v2058_v43  ;;  %v865_v52 = vrot.slane %v863_v15, 5  ;;  %v2071_v5 = vrot.slane %v2069_v17, 4  ;;  %v869_v22 = vshll.u32 %v4985_v40, 16  ;;  %v4445_v15 = vld [vmem:[%s6448_s1 + $0x8] sm:$0xff]   ;;  %v1762_v21 = vld [vmem:[#allocation2 + $0x3c] sm:$0xe] }
  0x7c   : > { %v2067_v53 = vrot.slane %v2065_v37, 5  ;;  %v2054_v55 = vsel %vm4711_vm11, %v2049_v54, %v2053_v13  ;;  %v873_v62 = vshrl.u32 %v4985_v40, 16  ;;  %v879_v9 = vshll.u32 %v5000_v49, 16  ;;  %v2370_v13 = vld [vmem:[#allocation2 + $0x3c] sm:$0xe]  ;;  %4334 = vmatprep.subr.bf16.mxu0 %v4445_v15  ;;  %4371 = vmatprep.subr.bf16.mxu1 %v4445_v15 }
  0x7d   : > { %v2063_v56 = vrot.slane %v2062_v2, 4  ;;  %v4258_v60 = vcombine.low %v2044_v35, %v2054_v55  ;;  %v866_v61 = vor.u32 %v865_v52, %v862_v50  ;;  %v5008_v4 = vld [vmem:[#allocation2 + $0x44] sm:$0x1]  ;;  %v871_v6 = vrot.slane %v869_v22, 5  ;;  %4335 = vmatpush3.bf16.msra.mxu0 %v4445_v15  ;;  %4374 = vmatpush3.bf16.msra.mxu1 %v4445_v15 }
  0x7e   : > { %v2072_v7 = vor.u32 %v2071_v5, %v2067_v53  ;;  %v4130_v11 = vrot.slane %v2369_v51, 9  ;;  %2997 = vrot.lane.b32.xlu1 %v4227_v26, %s4554_s6  ;;  %v2075_v19 = vshll.u32 %v5008_v4, 16  ;;  %v875_v46 = vrot.slane %v873_v62, 4  ;;  %v749_v20 = vld [vmem:[#allocation2 + $0x44] sm:$0x1] }
  0x7f   : > { %v2068_v12 = vsel %vm4711_vm11, %v2063_v56, %v2067_v53  ;;  %3171 = vrot.lane.b32.xlu0 %v4258_v60, %s4557_s9  ;;  %v867_v45 = vrot.slane %v866_v61, 4  ;;  %v881_v57 = vrot.slane %v879_v9, 5  ;;  %v2447_v28 = vrot.slane %v4951_v23, 5  ;;  %v1151_v51 = vld [vmem:[#allocation2 + $0x30] sm:$0xe] }
  0x80   : > { %v2073_v25 = vrot.slane %v2072_v7, 4  ;;  %v2450_v29 = vrot.slane %v4963_v10, 5  ;;  %v2077_v30 = vrot.slane %v2075_v19, 5  ;;  %v876_v32 = vor.u32 %v875_v46, %v871_v6  ;;  %v1334_v46 = vld [vmem:[#allocation2 + $0x3c] sm:$0xf] }
  0x81   : > { %v872_v26 = vsel %vm4711_vm11, %v867_v45, %v871_v6  ;;  %v884_v31 = vshrl.u32 %v5006_v3, 16  ;;  %v2448_v42 = vsel %vm4691_vm7, %v4130_v11, %v2447_v28  ;;  %v2449_v27 = vrot.slane %v2447_v28, 4  ;;  %v250_v45 = vld [vmem:[%s4689_s28 + $0x2c] sm:$0xf] }
  0x82   : > { %v887_v38 = vshll.u32 %v5006_v3, 16  ;;  %v893_v39 = vshll.u32 %v5016_v14, 16  ;;  %3093 = vrot.lane.b32.xlu1 %v4243_v48, %s4553_s5  ;;  %v2078_v23 = vsel %vm4711_vm11, %v2073_v25, %v2077_v30  ;;  %v877_v10 = vrot.slane %v876_v32, 4 }
  0x83   : > { %v886_v58 = vrot.slane %v884_v31, 4  ;;  %v897_v59 = vshrl.u32 %v5016_v14, 16  ;;  %v4259_v8 = vcombine.low %v2068_v12, %v2078_v23  ;;  %v2451_v43 = vsel %vm4691_vm7, %v2449_v27, %v2450_v29 }
  0x84   : > { %v889_v0 = vrot.slane %v887_v38, 5  ;;  %v895_v18 = vrot.slane %v893_v39, 5  ;;  %v882_v17 = vsel %vm4711_vm11, %v877_v10, %v881_v57  ;;  %v4274_v48 = vcombine.low %v2448_v42, %v2451_v43  ;;  %v1335_v42 = vld [vmem:[#allocation2 + $0x40] sm:$0xf]  ;;  %v635_v39 = vld [vmem:[#allocation2 + $0x48] sm:$0xf] }
  0x85   : > { %v899_v37 = vrot.slane %v897_v59, 4  ;;  %v903_v54 = vshll.u32 %v749_v20, 16  ;;  %v4164_v2 = vcombine.low %v872_v26, %v882_v17  ;;  %v4131_v50 = vrot.slane %v2370_v13, 9  ;;  %v639_v17 = vld [vmem:[#allocation2 + $0x50] sm:$0x1] }
  0x86   : > { %v890_v35 = vor.u32 %v889_v0, %v886_v58  ;;  %v2454_v52 = vrot.slane %v4988_v16, 5  ;;  %3173 = vrot.lane.b32.xlu1 %v4259_v8, %s4557_s9  ;;  %3251 = vrot.lane.b32.xlu0 %v4274_v48, %s4555_s7  ;;  %v2457_v55 = vrot.slane %v5008_v4, 5  ;;  %v4101_v22 = vrot.slane %v1152_v41, 9 }
  0x87   : > { %v900_v53 = vor.u32 %v899_v37, %v895_v18  ;;  %v905_v5 = vrot.slane %v903_v54, 5  ;;  %v1251_v16 = vrot.slane %v5016_v14, 5  ;;  %v1254_v7 = vrot.slane %v749_v20, 5 }
  0x88   : > { %v891_v56 = vrot.slane %v890_v35, 4  ;;  %v2455_v60 = vsel %vm4691_vm7, %v4131_v50, %v2454_v52  ;;  %v2456_v61 = vrot.slane %v2454_v52, 4  ;;  %v4100_v6 = vrot.slane %v1151_v51, 9  ;;  %v251_v51 = vld [vmem:[%s4689_s28 + $0x30] sm:$0xf] }
  0x89   : > { %v901_v62 = vrot.slane %v900_v53, 4  ;;  %v1244_v9 = vrot.slane %v4985_v40, 5  ;;  %v1252_v4 = vsel %vm4691_vm7, %v4101_v22, %v1251_v16  ;;  %v1253_v19 = vrot.slane %v1251_v16, 4  ;;  %v252_v53 = vld [vmem:[%s4689_s28 + $0x34] sm:$0xf] }
  0x8a   : > { %v896_v11 = vsel %vm4711_vm11, %v891_v56, %v895_v18  ;;  %v2458_v12 = vsel %vm4691_vm7, %v2456_v61, %v2457_v55  ;;  %2663 = vrot.lane.b32.xlu1 %v4164_v2, %s4551_s30  ;;  %v1247_v32 = vrot.slane %v5000_v49, 5  ;;  %v362_v31 = vrot.slane %v360_v47, 7  ;;  %v1362_v49 = vld [vmem:[#allocation2 + $0x44] sm:$0x1] }
  0x8b   : > { %v906_v25 = vsel %vm4711_vm11, %v901_v62, %v905_v5  ;;  %v4275_v57 = vcombine.low %v2455_v60, %v2458_v12  ;;  %v1245_v28 = vsel %vm4691_vm7, %v4100_v6, %v1244_v9  ;;  %v1246_v29 = vrot.slane %v1244_v9, 4 }
  0x8c   : > { %v4165_v30 = vcombine.low %v896_v11, %v906_v25  ;;  %v1255_v26 = vsel %vm4691_vm7, %v1253_v19, %v1254_v7  ;;  %v368_v20 = vshrl.u32 %v250_v45, 16  ;;  %v371_v38 = vshll.u32 %v250_v45, 16  ;;  %v5081_v7 = vld [vmem:[%s4689_s28 + $0x38] sm:$0xf] }
  0x8d   : > { %3253 = vrot.lane.b32.xlu0 %v4275_v57, %s4555_s7  ;;  %v4181_v27 = vcombine.low %v1252_v4, %v1255_v26  ;;  %v1471_v23 = vshrl.u32 %v1334_v46, 16  ;;  %v1248_v10 = vsel %vm4691_vm7, %v1246_v29, %v1247_v32  ;;  %v365_v58 = vor.u32 %v363_v33, %v362_v31 }
  0x8e   : > { %v366_v59 = vrot.slane %v362_v31, 4  ;;  %v1474_v13 = vshll.u32 %v1334_v46, 16  ;;  %2665 = vrot.lane.b32.xlu1 %v4165_v30, %s4551_s30  ;;  %v4180_v47 = vcombine.low %v1245_v28, %v1248_v10  ;;  %v370_v15 = vrot.slane %v368_v20, 7 }
  0x8f   : > { %v1473_v8 = vrot.slane %v1471_v23, 4  ;;  %v1484_v43 = vshrl.u32 %v1335_v42, 16  ;;  %v636_v0 = vsel %vm4705_vm10, %v365_v58, %v635_v39  ;;  %v4196_v41 = vcombine.low %v1334_v46, %v1335_v42  ;;  %v642_v58 = vld [vmem:[#allocation2 + $0x54] sm:$0xf] }
  0x90   : > { %v1476_v18 = vrot.slane %v1474_v13, 5  ;;  %v1480_v48 = vshll.u32 %v1335_v42, 16  ;;  %v373_v33 = vor.u32 %v371_v38, %v370_v15  ;;  %637 = vst [vmem:[#allocation2 + $0x48] sm:$0xf] %v636_v0  ;;  %v375_v37 = vrot.slane %v370_v15, 4 }
  0x91   : > { %2743 = vrot.lane.b32.xlu0 %v4180_v47, %s4550_s29  ;;  %v1486_v54 = vrot.slane %v1484_v43, 4  ;;  %v1490_v2 = vshll.u32 %v1362_v49, 16  ;;  %v1852_v52 = vrot.slane %v1335_v42, 5  ;;  %v4116_v56 = vrot.slane %v1762_v21, 9  ;;  %v5098_v43 = vld [vmem:[#allocation2 + $0x4] sm:$0xf] }
  0x92   : > { %v1477_v35 = vor.u32 %v1476_v18, %v1473_v8  ;;  %v1482_v50 = vrot.slane %v1480_v48, 5  ;;  %2745 = vrot.lane.b32.xlu1 %v4181_v27, %s4550_s29  ;;  %v374_v5 = vsel %vm4719_vm12, %v366_v59, %v373_v33  ;;  %v640_v55 = vsel %vm4734_vm13, %v375_v37, %v639_v17  ;;  %v5100_v0 = vld [vmem:[#allocation2] sm:$0xf] }
  0x93   : > { %v1492_v22 = vrot.slane %v1490_v2, 5  ;;  %638 = vst.msk [vmem:[#allocation2 + $0x4c] sm:$0xf] %vm183_vm0, %v374_v5  ;;  %641 = vst [vmem:[#allocation2 + $0x50] sm:$0x1] %v640_v55  ;;  %v1854_v16 = vrot.slane %v1852_v52, 4  ;;  %v1853_v26 = vsel %vm4691_vm7, %v4116_v56, %v1852_v52  ;;  %v4144_v18 = vcombine.low %v5100_v0, %v5098_v43 }
  0x94   : > { %v1478_v60 = vrot.slane %v1477_v35, 4  ;;  %v1487_v61 = vor.u32 %v1486_v54, %v1482_v50  ;;  %v1855_v62 = vrot.slane %v1362_v49, 5  ;;  %v377_v6 = vshrl.u32 %v251_v51, 16 }
  0x95   : > { %2839 = vrot.lane.b32.xlu0 %v4196_v41, %s4552_s4  ;;  %v385_v9 = vshrl.u32 %v252_v53, 16  ;;  %v380_v4 = vshll.u32 %v251_v51, 16  ;;  %v388_v19 = vshll.u32 %v252_v53, 16  ;;  %v394_v25 = vshrl.u32 %v5081_v7, 16 }
  0x96   : > { %v1483_v11 = vsel %vm4711_vm11, %v1478_v60, %v1482_v50  ;;  %v1488_v12 = vrot.slane %v1487_v61, 4  ;;  %v379_v45 = vrot.slane %v377_v6, 7  ;;  %v397_v57 = vshll.u32 %v5081_v7, 16  ;;  %v646_v60 = vld [vmem:[#allocation2 + $0x5c] sm:$0x1] }
  0x97   : > { %v5086_v46 = vrot.slane %v385_v9, 7  ;;  %v1336_v28 = vld [vmem:[#allocation2 + $0x48] sm:$0xf]  ;;  %v1856_v32 = vsel %vm4691_vm7, %v1854_v16, %v1855_v62  ;;  %vm3394_vm3 = vcmask 130048   ;;  %vm3427_vm4 = vcmask 162816  }
  0x98   : > { %v1493_v29 = vsel %vm4711_vm11, %v1488_v12, %v1492_v22  ;;  %v1763_v30 = vld [vmem:[#allocation2 + $0x48] sm:$0xe]  ;;  %v1495_v42 = vshrl.u32 %v1336_v28, 16  ;;  %v1498_v27 = vshll.u32 %v1336_v28, 16  ;;  %v382_v39 = vor.u32 %v380_v4, %v379_v45 }
  0x99   : > { %v1943_v31 = vld [vmem:[#allocation2 + $0x48] sm:$0xf]  ;;  %v4212_v20 = vcombine.low %v1483_v11, %v1493_v29  ;;  %v4117_v38 = vrot.slane %v1763_v30, 9  ;;  %v383_v23 = vrot.slane %v379_v45, 4  ;;  %v390_v10 = vor.u32 %v388_v19, %v5086_v46 }
  0x9a   : > { %v2080_v59 = vshrl.u32 %v1943_v31, 16  ;;  %v1337_v13 = vld [vmem:[#allocation2 + $0x4c] sm:$0xf]  ;;  %v1497_v49 = vrot.slane %v1495_v42, 4  ;;  %v1500_v47 = vrot.slane %v1498_v27, 5  ;;  %v4228_v8 = vcombine.low %v1853_v26, %v1856_v32 }
  0x9b   : > { %v1363_v15 = vld [vmem:[#allocation2 + $0x50] sm:$0x1]  ;;  %2919 = vrot.lane.b32.xlu0 %v4212_v20, %s4556_s8  ;;  %v1508_v41 = vshrl.u32 %v1337_v13, 16  ;;  %v4197_v17 = vcombine.low %v1336_v28, %v1337_v13  ;;  %v1504_v48 = vshll.u32 %v1337_v13, 16  ;;  %v1859_v37 = vrot.slane %v1337_v13, 5 }
  0x9c   : > { %v1514_v21 = vshll.u32 %v1363_v15, 16  ;;  %v1501_v33 = vor.u32 %v1500_v47, %v1497_v49  ;;  %v1862_v54 = vrot.slane %v1363_v15, 5  ;;  %v391_v2 = vsel %vm4719_vm12, %v383_v23, %v390_v10  ;;  %v5106_v35 = vld [vmem:[#allocation2 + $0x4c] sm:$0xf]  ;;  %v5117_v9 = vld [vmem:[#allocation2 + $0x50] sm:$0x1] }
  0x9d   : > { %2841 = vrot.lane.b32.xlu1 %v4197_v17, %s4552_s4  ;;  %v1506_v50 = vrot.slane %v1504_v48, 5  ;;  %v1510_v52 = vrot.slane %v1508_v41, 4  ;;  %v643_v53 = vsel %vm4705_vm10, %v382_v39, %v642_v58  ;;  %645 = vst.msk [vmem:[#allocation2 + $0x58] sm:$0xf] %vm183_vm0, %v391_v2  ;;  %v1860_v55 = vsel %vm4691_vm7, %v4117_v38, %v1859_v37  ;;  %v724_v11 = vld [vmem:[#allocation2 + $0x48] sm:$0xf] }
  0x9e   : > { %v1516_v51 = vrot.slane %v1514_v21, 5  ;;  %v1502_v5 = vrot.slane %v1501_v33, 4  ;;  %v1861_v22 = vrot.slane %v1859_v37, 4  ;;  %644 = vst [vmem:[#allocation2 + $0x54] sm:$0xf] %v643_v53  ;;  %v2082_v56 = vrot.slane %v2080_v59, 4 }
  0x9f   : > { %2999 = vrot.lane.b32.xlu0 %v4228_v8, %s4554_s6  ;;  %v1511_v61 = vor.u32 %v1510_v52, %v1506_v50  ;;  %v2083_v16 = vshll.u32 %v1943_v31, 16  ;;  %v2093_v62 = vshrl.u32 %v5106_v35, 16  ;;  %v4244_v6 = vcombine.low %v1943_v31, %v5106_v35  ;;  %v5125_v28 = vld [vmem:[#allocation2 + $0x4c] sm:$0xf]  ;;  %v5142_v52 = vld [vmem:[#allocation2 + $0x50] sm:$0x1] }
  0xa0   : > { %v1507_v12 = vsel %vm4711_vm11, %v1502_v5, %v1506_v50  ;;  %v1863_v4 = vsel %vm4691_vm7, %v1861_v22, %v1862_v54  ;;  %v392_v19 = vrot.slane %v5086_v46, 4  ;;  %v2089_v45 = vshll.u32 %v5106_v35, 16  ;;  %v2371_v53 = vld [vmem:[#allocation2 + $0x48] sm:$0xe] }
  0xa1   : > { %v1512_v29 = vrot.slane %v1511_v61, 4  ;;  %v4229_v30 = vcombine.low %v1860_v55, %v1863_v4  ;;  %v2085_v26 = vrot.slane %v2083_v16, 5  ;;  %v2095_v32 = vrot.slane %v2093_v62, 4 }
  0xa2   : > { %v647_v31 = vsel %vm4734_vm13, %v392_v19, %v646_v60  ;;  %v2091_v42 = vrot.slane %v2089_v45, 5  ;;  %v2099_v27 = vshll.u32 %v5117_v9, 16  ;;  %v908_v20 = vshrl.u32 %v724_v11, 16  ;;  %v5146_v60 = vpop.permute.xlu0 %2655 }
  0xa3   : > { %3095 = vrot.lane.b32.xlu0 %v4244_v6, %s4553_s5  ;;  %v1517_v46 = vsel %vm4711_vm11, %v1512_v29, %v1516_v51  ;;  %648 = vst [vmem:[#allocation2 + $0x5c] sm:$0x1] %v647_v31  ;;  %v2086_v38 = vor.u32 %v2085_v26, %v2082_v56  ;;  %v911_v39 = vshll.u32 %v724_v11, 16  ;;  %v917_v23 = vshll.u32 %v5125_v28, 16  ;;  %v5154_v26 = vpop.permute.xlu1 %2735 }
  0xa4   : > { %v4213_v10 = vcombine.low %v1507_v12, %v1517_v46  ;;  %v5134_v58 = vld [vmem:[#allocation2 + $0x58] sm:$0xf]  ;;  %v2096_v59 = vor.u32 %v2095_v32, %v2091_v42  ;;  %v2101_v13 = vrot.slane %v2099_v27, 5  ;;  %v910_v49 = vrot.slane %v908_v20, 4 }
  0xa5   : > { %v1945_v47 = vld [vmem:[#allocation2 + $0x54] sm:$0xf]  ;;  %v2117_v15 = vshrl.u32 %v5134_v58, 16  ;;  %v2113_v8 = vshll.u32 %v5134_v58, 16  ;;  %v2087_v41 = vrot.slane %v2086_v38, 4  ;;  %v913_v17 = vrot.slane %v911_v39, 5 }
  0xa6   : > { %2921 = vrot.lane.b32.xlu1 %v4213_v10, %s4556_s8  ;;  %v2104_v48 = vshrl.u32 %v1945_v47, 16  ;;  %v2107_v21 = vshll.u32 %v1945_v47, 16  ;;  %v4245_v33 = vcombine.low %v1945_v47, %v5134_v58  ;;  %v2097_v37 = vrot.slane %v2096_v59, 4  ;;  %v726_v11 = vld [vmem:[#allocation2 + $0x54] sm:$0xf] }
  0xa7   : > { %v2115_v54 = vrot.slane %v2113_v8, 5  ;;  %v2119_v2 = vrot.slane %v2117_v15, 4  ;;  %v2092_v50 = vsel %vm4711_vm11, %v2087_v41, %v2091_v42  ;;  %v914_v51 = vor.u32 %v913_v17, %v910_v49 }
  0xa8   : > { %v2106_v5 = vrot.slane %v2104_v48, 4  ;;  %v2109_v55 = vrot.slane %v2107_v21, 5  ;;  %v2102_v22 = vsel %vm4711_vm11, %v2097_v37, %v2101_v13  ;;  %v919_v56 = vrot.slane %v917_v23, 5  ;;  %v2372_v13 = vld [vmem:[#allocation2 + $0x54] sm:$0xe] }
  0xa9   : > { %v2120_v61 = vor.u32 %v2119_v2, %v2115_v54  ;;  %v4260_v16 = vcombine.low %v2092_v50, %v2102_v22  ;;  %v915_v62 = vrot.slane %v914_v51, 4  ;;  %v921_v6 = vshrl.u32 %v5125_v28, 16 }
  0xaa   : > { %3001 = vrot.lane.b32.xlu1 %v4229_v30, %s4554_s6  ;;  %v5150_v12 = vld [vmem:[#allocation2 + $0x5c] sm:$0x1]  ;;  %v2110_v4 = vor.u32 %v2109_v55, %v2106_v5  ;;  %v927_v19 = vshll.u32 %v5142_v52, 16  ;;  %v4132_v45 = vrot.slane %v2371_v53, 9  ;;  %v2461_v29 = vrot.slane %v5106_v35, 5 }
  0xab   : > { %v2121_v32 = vrot.slane %v2120_v61, 4  ;;  %v2123_v31 = vshll.u32 %v5150_v12, 16  ;;  %3175 = vrot.lane.b32.xlu0 %v4260_v16, %s4557_s9  ;;  %v920_v42 = vsel %vm4711_vm11, %v915_v62, %v919_v56  ;;  %v923_v27 = vrot.slane %v921_v6, 4  ;;  %v727_v30 = vld [vmem:[#allocation2 + $0x58] sm:$0xf] }
  0xac   : > { %v2111_v20 = vrot.slane %v2110_v4, 4  ;;  %v929_v46 = vrot.slane %v927_v19, 5  ;;  %v2462_v38 = vsel %vm4691_vm7, %v4132_v45, %v2461_v29  ;;  %v2463_v39 = vrot.slane %v2461_v29, 4  ;;  %v751_v47 = vld [vmem:[#allocation2 + $0x5c] sm:$0x1] }
  0xad   : > { %v2125_v23 = vrot.slane %v2123_v31, 5  ;;  %v924_v35 = vor.u32 %v923_v27, %v919_v56  ;;  %v2464_v10 = vrot.slane %v5117_v9, 5  ;;  %v932_v59 = vshrl.u32 %v726_v11, 16  ;;  %v1154_v53 = vld [vmem:[#allocation2 + $0x54] sm:$0xe] }
  0xae   : > { %3097 = vrot.lane.b32.xlu1 %v4245_v33, %s4553_s5  ;;  %v2116_v49 = vsel %vm4711_vm11, %v2111_v20, %v2115_v54  ;;  %v935_v15 = vshll.u32 %v726_v11, 16  ;;  %v941_v8 = vshll.u32 %v727_v30, 16  ;;  %v945_v41 = vshrl.u32 %v727_v30, 16  ;;  %v5166_v17 = vpop.permute.xlu0 %2831  ;;  %v5172_v54 = vpop.permute.xlu1 %2833  ;;  %v1153_v11 = vld [vmem:[#allocation2 + $0x48] sm:$0xe] }
  0xaf   : > { %v2126_v48 = vsel %vm4711_vm11, %v2121_v32, %v2125_v23  ;;  %v925_v21 = vrot.slane %v924_v35, 4  ;;  %v2465_v9 = vsel %vm4691_vm7, %v2463_v39, %v2464_v10  ;;  %v934_v37 = vrot.slane %v932_v59, 4  ;;  %v254_v10 = vld [vmem:[%s4689_s28 + $0x3c] sm:$0xf] }
  0xb0   : > { %v4261_v2 = vcombine.low %v2116_v49, %v2126_v48  ;;  %v4276_v50 = vcombine.low %v2462_v38, %v2465_v9  ;;  %v937_v33 = vrot.slane %v935_v15, 5  ;;  %v943_v51 = vrot.slane %v941_v8, 5  ;;  %v1338_v8 = vld [vmem:[#allocation2 + $0x54] sm:$0xf]  ;;  %v649_v9 = vld [vmem:[#allocation2 + $0x60] sm:$0xf] }
  0xb1   : > { %v930_v5 = vsel %vm4711_vm11, %v925_v21, %v929_v46  ;;  %v947_v55 = vrot.slane %v945_v41, 4  ;;  %v951_v22 = vshll.u32 %v751_v47, 16  ;;  %v4133_v56 = vrot.slane %v2372_v13, 9  ;;  %v5202_v41 = vld [vmem:[#allocation2 + $0x58] sm:$0xf] }
  0xb2   : > { %3177 = vrot.lane.b32.xlu1 %v4261_v2, %s4557_s9  ;;  %v4166_v61 = vcombine.low %v920_v42, %v930_v5  ;;  %3255 = vrot.lane.b32.xlu0 %v4276_v50, %s4555_s7  ;;  %v938_v16 = vor.u32 %v937_v33, %v934_v37  ;;  %v2468_v62 = vrot.slane %v5134_v58, 5  ;;  %v2471_v6 = vrot.slane %v5150_v12, 5  ;;  %v5180_v4 = vpop.permute.xlu0 %3087  ;;  %v5194_v59 = vpop.permute.xlu1 %3089  ;;  %v5208_v37 = vld [vmem:[#allocation2 + $0x10] sm:$0xf]  ;;  %v5210_v2 = vld [vmem:[#allocation2 + $0xc] sm:$0xf] }
  0xb3   : > { %v948_v19 = vor.u32 %v947_v55, %v943_v51  ;;  %v953_v45 = vrot.slane %v951_v22, 5  ;;  %v4103_v29 = vrot.slane %v1154_v53, 9  ;;  %v1265_v32 = vrot.slane %v727_v30, 5 }
  0xb4   : > { %v939_v31 = vrot.slane %v938_v16, 4  ;;  %v2469_v27 = vsel %vm4691_vm7, %v4133_v56, %v2468_v62  ;;  %v2470_v42 = vrot.slane %v2468_v62, 4  ;;  %v1268_v20 = vrot.slane %v751_v47, 5 }
  0xb5   : > { %v949_v46 = vrot.slane %v948_v19, 4  ;;  %v1266_v58 = vsel %vm4691_vm7, %v4103_v29, %v1265_v32  ;;  %v1267_v38 = vrot.slane %v1265_v32, 4  ;;  %v4102_v12 = vrot.slane %v1153_v11, 9 }
  0xb6   : > { %2667 = vrot.lane.b32.xlu1 %v4166_v61, %s4551_s30  ;;  %v944_v39 = vsel %vm4711_vm11, %v939_v31, %v943_v51  ;;  %v2472_v30 = vsel %vm4691_vm7, %v2470_v42, %v2471_v6  ;;  %v1258_v23 = vrot.slane %v5125_v28, 5  ;;  %v1261_v35 = vrot.slane %v5142_v52, 5  ;;  %v5204_v48 = vpop.permute.xlu0 %2991  ;;  %v5221_v61 = vld [vmem:[#allocation2 + $0x5c] sm:$0x1] }
  0xb7   : > { %v954_v13 = vsel %vm4711_vm11, %v949_v46, %v953_v45  ;;  %v4277_v49 = vcombine.low %v2469_v27, %v2472_v30  ;;  %v1269_v47 = vsel %vm4691_vm7, %v1267_v38, %v1268_v20  ;;  %v396_v15 = vrot.slane %v394_v25, 7  ;;  %v653_v45 = vld [vmem:[#allocation2 + $0x68] sm:$0x1] }
  0xb8   : > { %v4167_v28 = vcombine.low %v944_v39, %v954_v13  ;;  %v1259_v52 = vsel %vm4691_vm7, %v4102_v12, %v1258_v23  ;;  %v1260_v21 = vrot.slane %v1258_v23, 4  ;;  %v4145_v50 = vcombine.low %v5210_v2, %v5208_v37  ;;  %v5226_v31 = vpop.permute.xlu1 %2737 }
  0xb9   : > { %3257 = vrot.lane.b32.xlu0 %v4277_v49, %s4555_s7  ;;  %v4183_v25 = vcombine.low %v1266_v58, %v1269_v47  ;;  %v399_v33 = vor.u32 %v397_v57, %v396_v15  ;;  %v402_v51 = vshrl.u32 %v254_v10, 16  ;;  %v405_v53 = vshll.u32 %v254_v10, 16  ;;  %v1764_v57 = vld [vmem:[#allocation2 + $0x54] sm:$0xe]  ;;  %v255_v58 = vld [vmem:[%s4689_s28 + $0x40] sm:$0xf] }
  0xba   : > { %2669 = vrot.lane.b32.xlu1 %v4167_v28, %s4551_s30  ;;  %v1262_v5 = vsel %vm4691_vm7, %v1260_v21, %v1261_v35  ;;  %v1519_v55 = vshrl.u32 %v1338_v8, 16  ;;  %v1522_v22 = vshll.u32 %v1338_v8, 16  ;;  %v1532_v56 = vshrl.u32 %v5202_v41, 16  ;;  %v5232_v38 = vpop.permute.xlu0 %3247  ;;  %v256_v35 = vld [vmem:[%s4689_s28 + $0x44] sm:$0xf] }
  0xbb   : > { %v4182_v16 = vcombine.low %v1259_v52, %v1262_v5  ;;  %v400_v62 = vrot.slane %v396_v15, 4  ;;  %v404_v6 = vrot.slane %v402_v51, 7  ;;  %v650_v7 = vsel %vm4705_vm10, %v399_v33, %v649_v9  ;;  %v5244_v9 = vld [vmem:[#allocation2 + $0x18] sm:$0xf] }
  0xbc   : > { %651 = vst [vmem:[#allocation2 + $0x60] sm:$0xf] %v650_v7  ;;  %v1521_v11 = vrot.slane %v1519_v55, 4  ;;  %v1524_v19 = vrot.slane %v1522_v22, 5  ;;  %v1528_v29 = vshll.u32 %v5202_v41, 16  ;;  %v1534_v32 = vrot.slane %v1532_v56, 4  ;;  %v5252_v55 = vpop.permute.xlu1 %2993 }
  0xbd   : > { %2747 = vrot.lane.b32.xlu0 %v4182_v16, %s4550_s29  ;;  %v407_v27 = vor.u32 %v405_v53, %v404_v6  ;;  %v4198_v42 = vcombine.low %v1338_v8, %v5202_v41  ;;  %v409_v20 = vrot.slane %v404_v6, 4  ;;  %v1538_v46 = vshll.u32 %v5221_v61, 16  ;;  %v5254_v22 = vld [vmem:[#allocation2 + $0x24] sm:$0xf]  ;;  %v5256_v56 = vld [vmem:[#allocation2 + $0x28] sm:$0xf] }
  0xbe   : > { %2749 = vrot.lane.b32.xlu1 %v4183_v25, %s4550_s29  ;;  %v1525_v12 = vor.u32 %v1524_v19, %v1521_v11  ;;  %v1530_v39 = vrot.slane %v1528_v29, 5  ;;  %v4118_v30 = vrot.slane %v1764_v57, 9  ;;  %v1866_v23 = vrot.slane %v5202_v41, 5  ;;  %v5246_v25 = vld [vmem:[#allocation2 + $0x1c] sm:$0xf]  ;;  %v5269_v19 = vpop.permute.xlu0 %3249 }
  0xbf   : > { %v408_v10 = vsel %vm4719_vm12, %v400_v62, %v407_v27  ;;  %v654_v13 = vsel %vm4734_vm13, %v409_v20, %v653_v45  ;;  %v1540_v49 = vrot.slane %v1538_v46, 5  ;;  %v1869_v47 = vrot.slane %v5221_v61, 5  ;;  %v656_v11 = vld [vmem:[#allocation2 + $0x6c] sm:$0xf] }
  0xc0   : > { %652 = vst.msk [vmem:[#allocation2 + $0x64] sm:$0xf] %vm183_vm0, %v408_v10  ;;  %655 = vst [vmem:[#allocation2 + $0x68] sm:$0x1] %v654_v13  ;;  %v1526_v15 = vrot.slane %v1525_v12, 4  ;;  %v1535_v8 = vor.u32 %v1534_v32, %v1530_v39  ;;  %v1868_v28 = vrot.slane %v1866_v23, 4  ;;  %v4146_v33 = vcombine.low %v5244_v9, %v5246_v25 }
  0xc1   : > { %2843 = vrot.lane.b32.xlu0 %v4198_v42, %s4552_s4  ;;  %v411_v41 = vshrl.u32 %v255_v58, 16  ;;  %v414_v52 = vshll.u32 %v255_v58, 16  ;;  %v419_v21 = vshrl.u32 %v256_v35, 16  ;;  %v422_v5 = vshll.u32 %v256_v35, 16 }
  0xc2   : > { %v1531_v51 = vsel %vm4711_vm11, %v1526_v15, %v1530_v39  ;;  %v1536_v53 = vrot.slane %v1535_v8, 4  ;;  %v1867_v62 = vsel %vm4691_vm7, %v4118_v30, %v1866_v23  ;;  %v3282_v6 = vsel %vm3279_vm14, %v4144_v18, %v5146_v60 }
  0xc3   : > { %v1340_v16 = vld [vmem:[#allocation2 + $0x60] sm:$0xf]  ;;  %v413_v7 = vrot.slane %v411_v41, 7  ;;  %v5267_v57 = vrot.slane %v419_v21, 7  ;;  %v1870_v42 = vsel %vm4691_vm7, %v1868_v28, %v1869_v47  ;;  %vm3612_vm5 = vcmask 1041408  }
  0xc4   : > { %v1543_v45 = vshrl.u32 %v1340_v16, 16  ;;  %v1546_v29 = vshll.u32 %v1340_v16, 16  ;;  %v1541_v32 = vsel %vm4711_vm11, %v1536_v53, %v1540_v49  ;;  %v1765_v27 = vld [vmem:[#allocation2 + $0x60] sm:$0xe]  ;;  %v4230_v10 = vcombine.low %v1867_v62, %v1870_v42 }
  0xc5   : > { %v1947_v20 = vld [vmem:[#allocation2 + $0x60] sm:$0xf]  ;;  %v4214_v46 = vcombine.low %v1531_v51, %v1541_v32  ;;  %v416_v43 = vor.u32 %v414_v52, %v413_v7  ;;  %v417_v0 = vrot.slane %v413_v7, 4  ;;  %v424_v18 = vor.u32 %v422_v5, %v5267_v57  ;;  %v5284_v52 = vpop.permute.xlu1 %2913 }
  0xc6   : > { %v1545_v60 = vrot.slane %v1543_v45, 4  ;;  %v1548_v58 = vrot.slane %v1546_v29, 5  ;;  %v2128_v12 = vshrl.u32 %v1947_v20, 16  ;;  %v2131_v39 = vshll.u32 %v1947_v20, 16 }
  0xc7   : > { %v1341_v30 = vld [vmem:[#allocation2 + $0x64] sm:$0xf]  ;;  %v1365_v23 = vld [vmem:[#allocation2 + $0x68] sm:$0x1]  ;;  %2923 = vrot.lane.b32.xlu0 %v4214_v46, %s4556_s8  ;;  %v4119_v35 = vrot.slane %v1765_v27, 9  ;;  %v425_v13 = vsel %vm4719_vm12, %v417_v0, %v424_v18  ;;  %v657_v49 = vsel %vm4705_vm10, %v416_v43, %v656_v11  ;;  %vm3460_vm6 = vcmask 195584  }
  0xc8   : > { %v1556_v47 = vshrl.u32 %v1341_v30, 16  ;;  %v4199_v15 = vcombine.low %v1340_v16, %v1341_v30  ;;  %v1549_v8 = vor.u32 %v1548_v58, %v1545_v60  ;;  %v1552_v28 = vshll.u32 %v1341_v30, 16  ;;  %658 = vst [vmem:[#allocation2 + $0x6c] sm:$0xf] %v657_v49  ;;  %659 = vst.msk [vmem:[#allocation2 + $0x70] sm:$0xf] %vm183_vm0, %v425_v13  ;;  %v2658_v62 = vpop.permute.xlu0 %2657 }
  0xc9   : > { %v5282_v41 = vld [vmem:[#allocation2 + $0x64] sm:$0xf]  ;;  %v1562_v21 = vshll.u32 %v1365_v23, 16  ;;  %v1873_v51 = vrot.slane %v1341_v30, 5  ;;  %v1876_v53 = vrot.slane %v1365_v23, 5  ;;  %v2130_v5 = vrot.slane %v2128_v12, 4  ;;  %v5308_v13 = vpop.permute.xlu1 %3169 }
  0xca   : > { %2845 = vrot.lane.b32.xlu1 %v4199_v15, %s4552_s4  ;;  %v1550_v7 = vrot.slane %v1549_v8, 4  ;;  %v1554_v11 = vrot.slane %v1552_v28, 5  ;;  %v1558_v45 = vrot.slane %v1556_v47, 4  ;;  %v2133_v16 = vrot.slane %v2131_v39, 5  ;;  %v660_v18 = vld [vmem:[#allocation2 + $0x74] sm:$0x1] }
  0xcb   : > { %v5289_v29 = vsel %vm4691_vm7, %v4119_v35, %v1873_v51  ;;  %v1875_v32 = vrot.slane %v1873_v51, 4  ;;  %3003 = vrot.lane.b32.xlu0 %v4230_v10, %s4554_s6  ;;  %v2141_v27 = vshrl.u32 %v5282_v41, 16  ;;  %v1564_v43 = vrot.slane %v1562_v21, 5  ;;  %v728_v10 = vld [vmem:[#allocation2 + $0x60] sm:$0xf] }
  0xcc   : > { %v1559_v46 = vor.u32 %v1558_v45, %v1554_v11  ;;  %v4246_v0 = vcombine.low %v1947_v20, %v5282_v41  ;;  %v1555_v60 = vsel %vm4711_vm11, %v1550_v7, %v1554_v11  ;;  %v426_v12 = vrot.slane %v5267_v57, 4 }
  0xcd   : > { %v1877_v58 = vsel %vm4691_vm7, %v1875_v32, %v1876_v53  ;;  %v5306_v35 = vsel %vm3328_vm15, %v3282_v6, %v5154_v26  ;;  %v2134_v20 = vor.u32 %v2133_v16, %v2130_v5  ;;  %v2137_v15 = vshll.u32 %v5282_v41, 16  ;;  %v5331_v5 = vld [vmem:[#allocation2 + $0x68] sm:$0x1] }
  0xce   : > { %v1560_v30 = vrot.slane %v1559_v46, 4  ;;  %v4231_v23 = vcombine.low %v5289_v29, %v1877_v58  ;;  %v661_v57 = vsel %vm4734_vm13, %v426_v12, %v660_v18  ;;  %v2143_v8 = vrot.slane %v2141_v27, 4  ;;  %v5324_v6 = vpop.permute.xlu0 %2911  ;;  %v5342_v58 = vld [vmem:[#allocation2 + $0x68] sm:$0x1] }
  0xcf   : > { %v5310_v49 = vld [vmem:[#allocation2 + $0x6c] sm:$0xf]  ;;  %v5312_v47 = vld [vmem:[#allocation2 + $0x70] sm:$0xf]  ;;  %3099 = vrot.lane.b32.xlu0 %v4246_v0, %s4553_s5  ;;  %v5322_v26 = vsel %vm3279_vm14, %v4145_v50, %v2658_v62  ;;  %662 = vst [vmem:[#allocation2 + $0x74] sm:$0x1] %v661_v57 }
  0xd0   : > { %v1565_v28 = vsel %vm4711_vm11, %v1560_v30, %v1564_v43  ;;  %v2152_v21 = vshrl.u32 %v5310_v49, 16  ;;  %v2155_v51 = vshll.u32 %v5310_v49, 16  ;;  %v2165_v53 = vshrl.u32 %v5312_v47, 16  ;;  %v5336_v62 = vld [vmem:[#allocation2 + $0x64] sm:$0xf] }
  0xd1   : > { %v4215_v7 = vcombine.low %v1555_v60, %v1565_v28  ;;  %v4247_v37 = vcombine.low %v5310_v49, %v5312_v47  ;;  %v2161_v2 = vshll.u32 %v5312_v47, 16  ;;  %v2135_v50 = vrot.slane %v2134_v20, 4  ;;  %v2373_v30 = vld [vmem:[#allocation2 + $0x60] sm:$0xe]  ;;  %v5345_v20 = vpop.permute.xlu1 %2659  ;;  %v731_v42 = vld [vmem:[#allocation2 + $0x70] sm:$0xf] }
  0xd2   : > { %v2154_v11 = vrot.slane %v2152_v21, 4  ;;  %v2157_v45 = vrot.slane %v2155_v51, 5  ;;  %v2167_v16 = vrot.slane %v2165_v53, 4  ;;  %v2139_v29 = vrot.slane %v2137_v15, 5 }
  0xd3   : > { %2925 = vrot.lane.b32.xlu1 %v4215_v7, %s4556_s8  ;;  %v2163_v32 = vrot.slane %v2161_v2, 5  ;;  %v2147_v27 = vshll.u32 %v5331_v5, 16  ;;  %v956_v46 = vshrl.u32 %v728_v10, 16  ;;  %v959_v43 = vshll.u32 %v728_v10, 16  ;;  %v730_v2 = vld [vmem:[#allocation2 + $0x6c] sm:$0xf] }
  0xd4   : > { %v2158_v0 = vor.u32 %v2157_v45, %v2154_v11  ;;  %v2140_v18 = vsel %vm4711_vm11, %v2135_v50, %v2139_v29  ;;  %v2144_v60 = vor.u32 %v2143_v8, %v2139_v29  ;;  %v965_v12 = vshll.u32 %v5336_v62, 16 }
  0xd5   : > { %v2168_v49 = vor.u32 %v2167_v16, %v2163_v32  ;;  %v2149_v57 = vrot.slane %v2147_v27, 5  ;;  %v958_v15 = vrot.slane %v956_v46, 4  ;;  %v961_v28 = vrot.slane %v959_v43, 5  ;;  %v5347_v21 = vpop.permute.xlu0 %3167 }
  0xd6   : > { %v2159_v51 = vrot.slane %v2158_v0, 4  ;;  %v2145_v10 = vrot.slane %v2144_v60, 4  ;;  %v967_v53 = vrot.slane %v965_v12, 5  ;;  %v969_v7 = vshrl.u32 %v5336_v62, 16  ;;  %v5351_v8 = vld [vmem:[#allocation2 + $0x74] sm:$0x1] }
  0xd7   : > { %3005 = vrot.lane.b32.xlu1 %v4231_v23, %s4554_s6  ;;  %v2169_v50 = vrot.slane %v2168_v49, 4  ;;  %v962_v11 = vor.u32 %v961_v28, %v958_v15  ;;  %v975_v45 = vshll.u32 %v5342_v58, 16  ;;  %v4134_v16 = vrot.slane %v2373_v30, 9 }
  0xd8   : > { %v2164_v29 = vsel %vm4711_vm11, %v2159_v51, %v2163_v32  ;;  %v2171_v27 = vshll.u32 %v5351_v8, 16  ;;  %v2150_v46 = vsel %vm4711_vm11, %v2145_v10, %v2149_v57  ;;  %v971_v43 = vrot.slane %v969_v7, 4  ;;  %v5363_v32 = vpop.permute.xlu1 %2661  ;;  %v753_v51 = vld [vmem:[#allocation2 + $0x74] sm:$0x1] }
  0xd9   : > { %v4262_v0 = vcombine.low %v2140_v18, %v2150_v46  ;;  %v963_v60 = vrot.slane %v962_v11, 4  ;;  %v977_v12 = vrot.slane %v975_v45, 5  ;;  %v2475_v23 = vrot.slane %v5282_v41, 5  ;;  %v5360_v49 = vpop.permute.xlu0 %2739 }
  0xda   : > { %v2173_v15 = vrot.slane %v2171_v27, 5  ;;  %v972_v28 = vor.u32 %v971_v43, %v967_v53  ;;  %v2478_v30 = vrot.slane %v5331_v5, 5  ;;  %v980_v39 = vshrl.u32 %v730_v2, 16  ;;  %v2374_v27 = vld [vmem:[#allocation2 + $0x6c] sm:$0xe] }
  0xdb   : > { %3101 = vrot.lane.b32.xlu1 %v4247_v37, %s4553_s5  ;;  %3179 = vrot.lane.b32.xlu0 %v4262_v0, %s4557_s9  ;;  %v968_v18 = vsel %vm4711_vm11, %v963_v60, %v967_v53  ;;  %v2476_v41 = vsel %vm4691_vm7, %v4134_v16, %v2475_v23  ;;  %v2477_v57 = vrot.slane %v2475_v23, 4  ;;  %v983_v10 = vshll.u32 %v730_v2, 16  ;;  %v1156_v53 = vld [vmem:[#allocation2 + $0x6c] sm:$0xe] }
  0xdc   : > { %v2174_v7 = vsel %vm4711_vm11, %v2169_v50, %v2173_v15  ;;  %v973_v5 = vrot.slane %v972_v28, 4  ;;  %v982_v11 = vrot.slane %v980_v39, 4  ;;  %v989_v45 = vshll.u32 %v731_v42, 16  ;;  %v1155_v28 = vld [vmem:[#allocation2 + $0x60] sm:$0xe] }
  0xdd   : > { %v4263_v46 = vcombine.low %v2164_v29, %v2174_v7  ;;  %v2479_v37 = vsel %vm4691_vm7, %v2477_v57, %v2478_v30  ;;  %v985_v43 = vrot.slane %v983_v10, 5  ;;  %v993_v0 = vshrl.u32 %v731_v42, 16  ;;  %v5375_v60 = vpop.permute.xlu0 %2835 }
  0xde   : > { %v978_v16 = vsel %vm4711_vm11, %v973_v5, %v977_v12  ;;  %v4278_v2 = vcombine.low %v2476_v41, %v2479_v37  ;;  %v991_v23 = vrot.slane %v989_v45, 5  ;;  %v999_v61 = vshll.u32 %v753_v51, 16  ;;  %v5383_v12 = vpop.permute.xlu1 %2741  ;;  %v257_v37 = vld [vmem:[%s4689_s28 + $0x48] sm:$0xf] }
  0xdf   : > { %3181 = vrot.lane.b32.xlu1 %v4263_v46, %s4557_s9  ;;  %v4168_v39 = vcombine.low %v968_v18, %v978_v16  ;;  %v986_v50 = vor.u32 %v985_v43, %v982_v11  ;;  %v995_v15 = vrot.slane %v993_v0, 4  ;;  %v4135_v29 = vrot.slane %v2374_v27, 9 }
  0xe0   : > { %3259 = vrot.lane.b32.xlu0 %v4278_v2, %s4555_s7  ;;  %v1001_v30 = vrot.slane %v999_v61, 5  ;;  %v2482_v57 = vrot.slane %v5312_v47, 5  ;;  %v2485_v10 = vrot.slane %v5351_v8, 5  ;;  %v4105_v7 = vrot.slane %v1156_v53, 9  ;;  %v258_v2 = vld [vmem:[%s4689_s28 + $0x4c] sm:$0xf] }
  0xe1   : > { %v987_v41 = vrot.slane %v986_v50, 4  ;;  %v996_v5 = vor.u32 %v995_v15, %v991_v23  ;;  %v1279_v45 = vrot.slane %v731_v42, 5  ;;  %v1282_v18 = vrot.slane %v753_v51, 5  ;;  %v5385_v11 = vpop.permute.xlu0 %2915 }
  0xe2   : > { %v2483_v27 = vsel %vm4691_vm7, %v4135_v29, %v2482_v57  ;;  %v2484_v46 = vrot.slane %v2482_v57, 4  ;;  %v4104_v61 = vrot.slane %v1155_v28, 9  ;;  %v1272_v47 = vrot.slane %v5336_v62, 5  ;;  %v1342_v29 = vld [vmem:[#allocation2 + $0x6c] sm:$0xf] }
  0xe3   : > { %2671 = vrot.lane.b32.xlu1 %v4168_v39, %s4551_s30  ;;  %v992_v8 = vsel %vm4711_vm11, %v987_v41, %v991_v23  ;;  %v997_v43 = vrot.slane %v996_v5, 4  ;;  %v1280_v42 = vsel %vm4691_vm7, %v4105_v7, %v1279_v45  ;;  %v1281_v51 = vrot.slane %v1279_v45, 4  ;;  %v5406_v28 = vld [vmem:[#allocation2 + $0x70] sm:$0xf]  ;;  %v5410_v5 = vpop.permute.xlu1 %2837 }
  0xe4   : > { %v2486_v0 = vsel %vm4691_vm7, %v2484_v46, %v2485_v10  ;;  %v1273_v53 = vsel %vm4691_vm7, %v4104_v61, %v1272_v47  ;;  %v1274_v16 = vrot.slane %v1272_v47, 4  ;;  %v1275_v62 = vrot.slane %v5342_v58, 5  ;;  %v663_v46 = vld [vmem:[#allocation2 + $0x78] sm:$0xf] }
  0xe5   : > { %v1002_v39 = vsel %vm4711_vm11, %v997_v43, %v1001_v30  ;;  %v4279_v50 = vcombine.low %v2483_v27, %v2486_v0  ;;  %v1283_v23 = vsel %vm4691_vm7, %v1281_v51, %v1282_v18  ;;  %v428_v15 = vshrl.u32 %v257_v37, 16  ;;  %v5412_v58 = vpop.permute.xlu0 %2995  ;;  %v667_v0 = vld [vmem:[#allocation2 + $0x80] sm:$0x1] }
  0xe6   : > { %v4169_v57 = vcombine.low %v992_v8, %v1002_v39  ;;  %v4185_v10 = vcombine.low %v1280_v42, %v1283_v23  ;;  %v1276_v7 = vsel %vm4691_vm7, %v1274_v16, %v1275_v62  ;;  %v431_v41 = vshll.u32 %v257_v37, 16 }
  0xe7   : > { %3261 = vrot.lane.b32.xlu0 %v4279_v50, %s4555_s7  ;;  %v4184_v30 = vcombine.low %v1273_v53, %v1276_v7  ;;  %v430_v45 = vrot.slane %v428_v15, 7  ;;  %v436_v27 = vshrl.u32 %v258_v2, 16  ;;  %v439_v18 = vshll.u32 %v258_v2, 16  ;;  %v1366_v2 = vld [vmem:[#allocation2 + $0x74] sm:$0x1] }
  0xe8   : > { %2673 = vrot.lane.b32.xlu1 %v4169_v57, %s4551_s30  ;;  %v1567_v61 = vshrl.u32 %v1342_v29, 16  ;;  %v1570_v47 = vshll.u32 %v1342_v29, 16  ;;  %v1580_v8 = vshrl.u32 %v5406_v28, 16  ;;  %v4200_v43 = vcombine.low %v1342_v29, %v5406_v28 }
  0xe9   : > { %v433_v37 = vor.u32 %v431_v41, %v430_v45  ;;  %v434_v42 = vrot.slane %v430_v45, 4  ;;  %v438_v51 = vrot.slane %v436_v27, 7  ;;  %v3332_v53 = vsel %vm3328_vm15, %v5322_v26, %v5226_v31  ;;  %v1766_v41 = vld [vmem:[#allocation2 + $0x6c] sm:$0xe]  ;;  %v5433_v45 = vpop.permute.xlu0 %3091 }
  0xea   : > { %v1569_v16 = vrot.slane %v1567_v61, 4  ;;  %v1572_v62 = vrot.slane %v1570_v47, 5  ;;  %v1576_v39 = vshll.u32 %v5406_v28, 16  ;;  %v3365_v15 = vsel %vm3361_vm2, %v3332_v53, %v5172_v54 }
  0xeb   : > { %2751 = vrot.lane.b32.xlu0 %v4184_v30, %s4550_s29  ;;  %v441_v50 = vor.u32 %v439_v18, %v438_v51  ;;  %v664_v23 = vsel %vm4705_vm10, %v433_v37, %v663_v46  ;;  %v443_v29 = vrot.slane %v438_v51, 4  ;;  %v3363_v57 = vsel %vm3361_vm2, %v5306_v35, %v5166_v17 }
  0xec   : > { %2753 = vrot.lane.b32.xlu1 %v4185_v10, %s4550_s29  ;;  %665 = vst [vmem:[#allocation2 + $0x78] sm:$0xf] %v664_v23  ;;  %v1573_v31 = vor.u32 %v1572_v62, %v1569_v16  ;;  %v1578_v26 = vrot.slane %v1576_v39, 5  ;;  %v1582_v7 = vrot.slane %v1580_v8, 4  ;;  %v5431_v30 = vpop.permute.xlu1 %2917  ;;  %v3398_v54 = vsel %vm3394_vm3, %v3365_v15, %v5284_v52  ;;  %v259_v16 = vld [vmem:[%s4689_s28 + $0x50] sm:$0xf] }
  0xed   : > { %v442_v27 = vsel %vm4719_vm12, %v434_v42, %v441_v50  ;;  %v668_v17 = vsel %vm4734_vm13, %v443_v29, %v667_v0  ;;  %v1586_v35 = vshll.u32 %v1366_v2, 16  ;;  %v4446_v10 = vld [vmem:[%s6448_s1 + $0x10] ss:$0 sps:$4 sm:$0x33]   ;;  %v3396_v61 = vsel %vm3394_vm3, %v3363_v57, %v5324_v6 }
  0xee   : > { %666 = vst.msk [vmem:[#allocation2 + $0x7c] sm:$0xf] %vm183_vm0, %v442_v27  ;;  %669 = vst [vmem:[#allocation2 + $0x80] sm:$0x1] %v668_v17  ;;  %v1574_v18 = vrot.slane %v1573_v31, 4  ;;  %v1583_v46 = vor.u32 %v1582_v7, %v1578_v26  ;;  %v3429_v47 = vsel %vm3427_vm4, %v3396_v61, %v5204_v48  ;;  %v4120_v8 = vrot.slane %v1766_v41, 9  ;;  %4376 = vmatprep.subr.msk.bf16.mxu0 %vm3612_vm5, %v4446_v10 }
  0xef   : > { %2847 = vrot.lane.b32.xlu0 %v4200_v43, %s4552_s4  ;;  %v1588_v52 = vrot.slane %v1586_v35, 5  ;;  %v1880_v37 = vrot.slane %v5406_v28, 5  ;;  %v1883_v0 = vrot.slane %v1366_v2, 5  ;;  %v5461_v6 = vsel %vm3279_vm14, %v4146_v33, %v5345_v20  ;;  %4377 = vmatprep.subr.msk.bf16.mxu1 %vm3612_vm5, %v4446_v10 }
  0xf0   : > { %v1579_v42 = vsel %vm4711_vm11, %v1574_v18, %v1578_v26  ;;  %v1584_v51 = vrot.slane %v1583_v46, 4  ;;  %v5454_v62 = vpop.permute.xlu1 %2997  ;;  %v6463_v53 = vcombine.low %v5254_v22, %v5256_v56  ;;  %v3462_v9 = vsel %vm3460_vm6, %v3429_v47, %v5180_v4  ;;  %v260_v46 = vld [vmem:[%s4689_s28 + $0x54] sm:$0xf]  ;;  %v670_v47 = vld [vmem:[#allocation2 + $0x84] sm:$0xf] }
  0xf1   : > { %v1881_v48 = vsel %vm4691_vm7, %v4120_v8, %v1880_v37  ;;  %v1882_v28 = vrot.slane %v1880_v37, 4  ;;  %v3614_v25 = vsel %vm3612_vm5, %v4446_v10, 0  ;;  %v5474_v33 = vpop.permute.xlu0 %3171  ;;  %vm3493_vm8 = vcmask 228352  }
  0xf2   : > { %v1589_v43 = vsel %vm4711_vm11, %v1584_v51, %v1588_v52  ;;  %v3291_v2 = vsel %vm3279_vm14, %v6463_v53, %v5363_v32  ;;  %4337 = vmatpush3.bf16.msra.mxu0 %v3614_v25  ;;  %v445_v15 = vshrl.u32 %v259_v16, 16  ;;  %4375 = vmatpush3.bf16.msra.mxu1 %v3614_v25  ;;  %v3495_v4 = vsel %vm3493_vm8, %v3462_v9, %v5347_v21 }
  0xf3   : > { %v1344_v20 = vld [vmem:[#allocation2 + $0x78] sm:$0xf]  ;;  %v4216_v39 = vcombine.low %v1579_v42, %v1589_v43  ;;  %v1884_v23 = vsel %vm4691_vm7, %v1882_v28, %v1883_v0  ;;  %v448_v41 = vshll.u32 %v259_v16, 16  ;;  %v5485_v27 = vsel %vm3328_vm15, %v3291_v2, %v5383_v12 }
  0xf4   : > { %v1767_v50 = vld [vmem:[#allocation2 + $0x78] sm:$0xe]  ;;  %v1591_v29 = vshrl.u32 %v1344_v20, 16  ;;  %v1594_v22 = vshll.u32 %v1344_v20, 16  ;;  %v5480_v32 = vpop.permute.xlu1 %3093  ;;  %v4232_v26 = vcombine.low %v1881_v48, %v1884_v23  ;;  %v447_v7 = vrot.slane %v445_v15, 7 }
  0xf5   : > { %v4121_v56 = vrot.slane %v1767_v50, 9  ;;  %v1345_v57 = vld [vmem:[#allocation2 + $0x7c] sm:$0xf]  ;;  %v1367_v31 = vld [vmem:[#allocation2 + $0x80] sm:$0x1]  ;;  %2927 = vrot.lane.b32.xlu0 %v4216_v39, %s4556_s8  ;;  %v3431_v8 = vsel %vm3427_vm4, %v3398_v54, %v5252_v55  ;;  %v453_v25 = vshrl.u32 %v260_v46, 16 }
  0xf6   : > { %v1593_v17 = vrot.slane %v1591_v29, 4  ;;  %v1596_v35 = vrot.slane %v1594_v22, 5  ;;  %v1604_v10 = vshrl.u32 %v1345_v57, 16  ;;  %v4201_v18 = vcombine.low %v1344_v20, %v1345_v57  ;;  %v1951_v12 = vld [vmem:[#allocation2 + $0x78] sm:$0xf] }
  0xf7   : > { %v1600_v61 = vshll.u32 %v1345_v57, 16  ;;  %v1610_v21 = vshll.u32 %v1367_v31, 16  ;;  %v1887_v52 = vrot.slane %v1345_v57, 5  ;;  %v1890_v51 = vrot.slane %v1367_v31, 5  ;;  %v5494_v2 = vld [vmem:[#allocation2 + $0x7c] sm:$0xf] }
  0xf8   : > { %2849 = vrot.lane.b32.xlu1 %v4201_v18, %s4552_s4  ;;  %v1597_v37 = vor.u32 %v1596_v35, %v1593_v17  ;;  %v1606_v42 = vrot.slane %v1604_v10, 4  ;;  %v450_v0 = vor.u32 %v448_v41, %v447_v7  ;;  %v5491_v16 = vpop.permute.xlu0 %3251  ;;  %v451_v53 = vrot.slane %v447_v7, 4  ;;  %v5498_v20 = vpop.permute.xlu1 %3173  ;;  %v5510_v10 = vld [vmem:[#allocation2 + $0x80] sm:$0x1]  ;;  %v4477_v1 = vld [vmem:[#allocation2 + $0x78] sm:$0xf] }
  0xf9   : > { %v1602_v48 = vrot.slane %v1600_v61, 5  ;;  %v1612_v28 = vrot.slane %v1610_v21, 5  ;;  %v1889_v43 = vrot.slane %v1887_v52, 4  ;;  %3007 = vrot.lane.b32.xlu0 %v4232_v26, %s4554_s6  ;;  %v456_v55 = vshll.u32 %v260_v46, 16 }
  0xfa   : > { %v1598_v9 = vrot.slane %v1597_v37, 4  ;;  %v671_v54 = vsel %vm4705_vm10, %v450_v0, %v670_v47  ;;  %v1888_v50 = vsel %vm4691_vm7, %v4121_v56, %v1887_v52  ;;  %v2176_v23 = vshrl.u32 %v1951_v12, 16  ;;  %v674_v47 = vld [vmem:[#allocation2 + $0x8c] sm:$0x1]  ;;  %v732_v37 = vld [vmem:[#allocation2 + $0x78] sm:$0xf] }
  0xfb   : > { %v1607_v39 = vor.u32 %v1606_v42, %v1602_v48  ;;  %672 = vst [vmem:[#allocation2 + $0x84] sm:$0xf] %v671_v54  ;;  %v2179_v15 = vshll.u32 %v1951_v12, 16  ;;  %v1891_v22 = vsel %vm4691_vm7, %v1889_v43, %v1890_v51  ;;  %v455_v57 = vrot.slane %v453_v25, 7 }
  0xfc   : > { %v1603_v29 = vsel %vm4711_vm11, %v1598_v9, %v1602_v48  ;;  %v2189_v31 = vshrl.u32 %v5494_v2, 16  ;;  %v2178_v7 = vrot.slane %v2176_v23, 4  ;;  %v4248_v17 = vcombine.low %v1951_v12, %v5494_v2  ;;  %v5526_v0 = vpop.permute.xlu1 %2663  ;;  %v5532_v48 = vld [vmem:[#allocation2 + $0x7c] sm:$0xf]  ;;  %v5545_v23 = vld [vmem:[#allocation2 + $0x80] sm:$0x1] }
  0xfd   : > { %v1608_v26 = vrot.slane %v1607_v39, 4  ;;  %v2181_v41 = vrot.slane %v2179_v15, 5  ;;  %v458_v35 = vor.u32 %v456_v55, %v455_v57  ;;  %vm3526_vm9 = vcmask 261120  }
  0xfe   : > { %vm3579_vm5 = vcmask 293888   ;;  %v3464_v56 = vsel %vm3460_vm6, %v3431_v8, %v5194_v59  ;;  %v4233_v61 = vcombine.low %v1888_v50, %v1891_v22  ;;  %3103 = vrot.lane.b32.xlu0 %v4248_v17, %s4553_s5  ;;  %v3528_v21 = vsel %vm3526_vm9, %v3495_v4, %v5232_v38  ;;  %v2375_v22 = vld [vmem:[#allocation2 + $0x78] sm:$0xe] }
  0xff   : > { %v5512_v18 = vpop.permute.xlu0 %3253  ;;  %v1613_v46 = vsel %vm4711_vm11, %v1608_v26, %v1612_v28  ;;  %v3497_v52 = vsel %vm3493_vm8, %v3464_v56, %v5308_v13  ;;  %v459_v59 = vsel %vm4719_vm12, %v451_v53, %v458_v35  ;;  %4338 = vmatprep.mubr.msk.bf16.mxu0 %vm3579_vm5, %v3528_v21  ;;  %v460_v51 = vrot.slane %v455_v57, 4 }
 0x100   : > { %v4217_v42 = vcombine.low %v1603_v29, %v1613_v46  ;;  %v3530_v8 = vsel %vm3526_vm9, %v3497_v52, %v5269_v19  ;;  %673 = vst.msk [vmem:[#allocation2 + $0x88] sm:$0xf] %vm183_vm0, %v459_v59  ;;  %v2182_v38 = vor.u32 %v2181_v41, %v2178_v7  ;;  %v2185_v13 = vshll.u32 %v5494_v2, 16  ;;  %v5555_v35 = vpop.permute.xlu1 %2665 }
 0x101   : > { %4339 = vmatmul.mubr.msk.bf16.vlgmr.msra.gmra.mrb[0].mxu0 %vm3579_vm5, %v3530_v8  ;;  %v2191_v4 = vrot.slane %v2189_v31, 4  ;;  %v2195_v12 = vshll.u32 %v5510_v10, 16  ;;  %v3334_v19 = vsel %vm3328_vm15, %v5461_v6, %v5360_v49  ;;  %v675_v43 = vsel %vm4734_vm13, %v460_v51, %v674_v47 }
 0x102   : > { %2929 = vrot.lane.b32.xlu1 %v4217_v42, %s4556_s8  ;;  %v1953_v28 = vld [vmem:[#allocation2 + $0x84] sm:$0xf]  ;;  %v3369_v53 = vsel %vm3361_vm2, %v5485_v27, %v5410_v5  ;;  %v1004_v9 = vshrl.u32 %v732_v37, 16  ;;  %676 = vst [vmem:[#allocation2 + $0x8c] sm:$0x1] %v675_v43  ;;  %v2183_v39 = vrot.slane %v2182_v38, 4  ;;  %v3367_v49 = vsel %vm3361_vm2, %v3334_v19, %v5375_v60 }
 0x103   : > { %v5543_v25 = vpop.permute.xlu0 %2743  ;;  %v2200_v55 = vshrl.u32 %v1953_v28, 16  ;;  %v2203_v54 = vshll.u32 %v1953_v28, 16  ;;  %v2187_v50 = vrot.slane %v2185_v13, 5  ;;  %v1007_v15 = vshll.u32 %v732_v37, 16 }
 0x104   : > { %v1006_v6 = vrot.slane %v1004_v9, 4  ;;  %v1013_v29 = vshll.u32 %v5532_v48, 16  ;;  %v2197_v31 = vrot.slane %v2195_v12, 5  ;;  %v1017_v41 = vshrl.u32 %v5532_v48, 16 }
 0x105   : > { %v2202_v57 = vrot.slane %v2200_v55, 4  ;;  %v2205_v5 = vrot.slane %v2203_v54, 5  ;;  %v2192_v27 = vor.u32 %v2191_v4, %v2187_v50  ;;  %v1009_v26 = vrot.slane %v1007_v15, 5 }
 0x106   : > { %3009 = vrot.lane.b32.xlu1 %v4233_v61, %s4554_s6  ;;  %v5551_v7 = vrot.slane %v1013_v29, 5  ;;  %v1023_v17 = vshll.u32 %v5545_v23, 16  ;;  %v2188_v56 = vsel %vm4711_vm11, %v2183_v39, %v2187_v50  ;;  %v4136_v21 = vrot.slane %v2375_v22, 9 }
 0x107   : > { %v2206_v60 = vor.u32 %v2205_v5, %v2202_v57  ;;  %v2193_v46 = vrot.slane %v2192_v27, 4  ;;  %v5559_v52 = vpop.permute.xlu0 %2839  ;;  %v1954_v47 = vld [vmem:[#allocation2 + $0x88] sm:$0xf]  ;;  %v1010_v37 = vor.u32 %v1009_v26, %v1006_v6  ;;  %v1019_v61 = vrot.slane %v1017_v41, 4  ;;  %v5572_v57 = vpop.permute.xlu1 %2745 }
 0x108   : > { %v1025_v42 = vrot.slane %v1023_v17, 5  ;;  %v2489_v59 = vrot.slane %v5494_v2, 5  ;;  %v2213_v8 = vshrl.u32 %v1954_v47, 16  ;;  %v4249_v51 = vcombine.low %v1953_v28, %v1954_v47  ;;  %v734_v2 = vld [vmem:[#allocation2 + $0x84] sm:$0xf] }
 0x109   : > { %v2207_v38 = vrot.slane %v2206_v60, 4  ;;  %v2209_v13 = vshll.u32 %v1954_v47, 16  ;;  %v1976_v4 = vld [vmem:[#allocation2 + $0x8c] sm:$0x1]  ;;  %v2198_v12 = vsel %vm4711_vm11, %v2193_v46, %v2197_v31  ;;  %v1011_v19 = vrot.slane %v1010_v37, 4 }
 0x10a   : > { %v1020_v43 = vor.u32 %v1019_v61, %v5551_v7  ;;  %v2492_v9 = vrot.slane %v5510_v10, 5  ;;  %3105 = vrot.lane.b32.xlu1 %v4249_v51, %s4553_s5  ;;  %v2215_v54 = vrot.slane %v2213_v8, 4  ;;  %v2219_v39 = vshll.u32 %v1976_v4, 16  ;;  %v735_v22 = vld [vmem:[#allocation2 + $0x88] sm:$0xf] }
 0x10b   : > { %v2211_v55 = vrot.slane %v2209_v13, 5  ;;  %v4264_v50 = vcombine.low %v2188_v56, %v2198_v12  ;;  %v1016_v28 = vsel %vm4711_vm11, %v1011_v19, %v5551_v7  ;;  %v2490_v15 = vsel %vm4691_vm7, %v4136_v21, %v2489_v59  ;;  %v755_v26 = vld [vmem:[#allocation2 + $0x8c] sm:$0x1]  ;;  %v2376_v46 = vld [vmem:[#allocation2 + $0x84] sm:$0xe] }
 0x10c   : > { %v1021_v6 = vrot.slane %v1020_v43, 4  ;;  %v2491_v29 = vrot.slane %v2489_v59, 4  ;;  %v2221_v27 = vrot.slane %v2219_v39, 5  ;;  %v3402_v31 = vsel %vm3394_vm3, %v3369_v53, %v5431_v30  ;;  %v1158_v12 = vld [vmem:[#allocation2 + $0x84] sm:$0xe] }
 0x10d   : > { %v2212_v10 = vsel %vm4711_vm11, %v2207_v38, %v2211_v55  ;;  %v2216_v5 = vor.u32 %v2215_v54, %v2211_v55  ;;  %3183 = vrot.lane.b32.xlu0 %v4264_v50, %s4557_s9  ;;  %v5579_v7 = vpop.permute.xlu0 %2919  ;;  %v3400_v17 = vsel %vm3394_vm3, %v3367_v49, %v5385_v11  ;;  %v1028_v60 = vshrl.u32 %v734_v2, 16 }
 0x10e   : > { %v2493_v41 = vsel %vm4691_vm7, %v2491_v29, %v2492_v9  ;;  %v1031_v56 = vshll.u32 %v734_v2, 16  ;;  %v1026_v37 = vsel %vm4711_vm11, %v1021_v6, %v1025_v42  ;;  %v1037_v59 = vshll.u32 %v735_v22, 16  ;;  %v1157_v42 = vld [vmem:[#allocation2 + $0x78] sm:$0xe] }
 0x10f   : > { %v2217_v21 = vrot.slane %v2216_v5, 4  ;;  %v4280_v61 = vcombine.low %v2490_v15, %v2493_v41  ;;  %v1030_v8 = vrot.slane %v1028_v60, 4  ;;  %v1041_v53 = vshrl.u32 %v735_v22, 16  ;;  %v5590_v54 = vpop.permute.xlu1 %2841 }
 0x110   : > { %v1033_v30 = vrot.slane %v1031_v56, 5  ;;  %v1047_v51 = vshll.u32 %v755_v26, 16  ;;  %v1039_v13 = vrot.slane %v1037_v59, 5  ;;  %v4137_v11 = vrot.slane %v2376_v46, 9 }
 0x111   : > { %v2222_v38 = vsel %vm4711_vm11, %v2217_v21, %v2221_v27  ;;  %3263 = vrot.lane.b32.xlu0 %v4280_v61, %s4555_s7  ;;  %v2496_v49 = vrot.slane %v1954_v47, 5  ;;  %v4170_v43 = vcombine.low %v1016_v28, %v1026_v37  ;;  %v1043_v55 = vrot.slane %v1041_v53, 4  ;;  %v5594_v15 = vpop.permute.xlu0 %2999  ;;  %v261_v37 = vld [vmem:[%s4689_s28 + $0x58] sm:$0xf] }
 0x112   : > { %v4265_v19 = vcombine.low %v2212_v10, %v2222_v38  ;;  %v1034_v9 = vor.u32 %v1033_v30, %v1030_v8  ;;  %v1049_v39 = vrot.slane %v1047_v51, 5  ;;  %v2499_v6 = vrot.slane %v1976_v4, 5 }
 0x113   : > { %v2497_v50 = vsel %vm4691_vm7, %v4137_v11, %v2496_v49  ;;  %v2498_v2 = vrot.slane %v2496_v49, 4  ;;  %v1044_v29 = vor.u32 %v1043_v55, %v1039_v13  ;;  %v3435_v28 = vsel %vm3427_vm4, %v3402_v31, %v5454_v62 }
 0x114   : > { %3185 = vrot.lane.b32.xlu1 %v4265_v19, %s4557_s9  ;;  %v1035_v47 = vrot.slane %v1034_v9, 4  ;;  %v4107_v10 = vrot.slane %v1158_v12, 9  ;;  %v1293_v27 = vrot.slane %v735_v22, 5  ;;  %v1296_v41 = vrot.slane %v755_v26, 5  ;;  %v262_v22 = vld [vmem:[%s4689_s28 + $0x5c] sm:$0xf] }
 0x115   : > { %v2500_v5 = vsel %vm4691_vm7, %v2498_v2, %v2499_v6  ;;  %v4106_v60 = vrot.slane %v1157_v42, 9  ;;  %v1045_v56 = vrot.slane %v1044_v29, 4  ;;  %v1286_v21 = vrot.slane %v5532_v48, 5  ;;  %v5623_v11 = vpop.permute.xlu0 %3095  ;;  %v677_v2 = vld [vmem:[#allocation2 + $0x90] sm:$0xf] }
 0x116   : > { %v1040_v4 = vsel %vm4711_vm11, %v1035_v47, %v1039_v13  ;;  %v4281_v46 = vcombine.low %v2497_v50, %v2500_v5  ;;  %v3433_v61 = vsel %vm3427_vm4, %v3400_v17, %v5412_v58  ;;  %v1294_v62 = vsel %vm4691_vm7, %v4107_v10, %v1293_v27  ;;  %v1346_v17 = vld [vmem:[#allocation2 + $0x84] sm:$0xf]  ;;  %v1347_v13 = vld [vmem:[#allocation2 + $0x88] sm:$0xf]  ;;  %v1368_v29 = vld [vmem:[#allocation2 + $0x8c] sm:$0x1] }
 0x117   : > { %v1295_v31 = vrot.slane %v1293_v27, 4  ;;  %v1289_v59 = vrot.slane %v5545_v23, 5  ;;  %v1050_v26 = vsel %vm4711_vm11, %v1045_v56, %v1049_v39  ;;  %v1287_v48 = vsel %vm4691_vm7, %v4106_v60, %v1286_v21 }
 0x118   : > { %2675 = vrot.lane.b32.xlu1 %v4170_v43, %s4551_s30  ;;  %3265 = vrot.lane.b32.xlu0 %v4281_v46, %s4555_s7  ;;  %v1288_v8 = vrot.slane %v1286_v21, 4  ;;  %v3468_v58 = vsel %vm3460_vm6, %v3435_v28, %v5480_v32  ;;  %v5619_v30 = vpop.permute.xlu1 %2921  ;;  %v4171_v53 = vcombine.low %v1040_v4, %v1050_v26  ;;  %v462_v51 = vshrl.u32 %v261_v37, 16  ;;  %v1768_v21 = vld [vmem:[#allocation2 + $0x84] sm:$0xe] }
 0x119   : > { %v1297_v23 = vsel %vm4691_vm7, %v1295_v31, %v1296_v41  ;;  %v465_v38 = vshll.u32 %v261_v37, 16  ;;  %v3466_v12 = vsel %vm3460_vm6, %v3433_v61, %v5433_v45  ;;  %v470_v19 = vshrl.u32 %v262_v22, 16  ;;  %v681_v41 = vld [vmem:[#allocation2 + $0x98] sm:$0x1] }
 0x11a   : > { %v1290_v49 = vsel %vm4691_vm7, %v1288_v8, %v1289_v59  ;;  %v473_v32 = vshll.u32 %v262_v22, 16  ;;  %v464_v9 = vrot.slane %v462_v51, 7  ;;  %v1615_v55 = vshrl.u32 %v1346_v17, 16  ;;  %v263_v8 = vld [vmem:[%s4689_s28 + $0x60] sm:$0xf] }
 0x11b   : > { %v4186_v43 = vcombine.low %v1287_v48, %v1290_v49  ;;  %v1618_v42 = vshll.u32 %v1346_v17, 16  ;;  %v4187_v39 = vcombine.low %v1294_v62, %v1297_v23  ;;  %v472_v50 = vrot.slane %v470_v19, 7  ;;  %v264_v51 = vld [vmem:[%s4689_s28 + $0x64] sm:$0xf] }
 0x11c   : > { %2677 = vrot.lane.b32.xlu1 %v4171_v53, %s4551_s30  ;;  %v1628_v6 = vshrl.u32 %v1347_v13, 16  ;;  %v4202_v47 = vcombine.low %v1346_v17, %v1347_v13  ;;  %v5630_v28 = vpop.permute.xlu1 %3001  ;;  %v467_v10 = vor.u32 %v465_v38, %v464_v9  ;;  %v468_v45 = vrot.slane %v464_v9, 4 }
 0x11d   : > { %2755 = vrot.lane.b32.xlu0 %v4186_v43, %s4550_s29  ;;  %v1617_v5 = vrot.slane %v1615_v55, 4  ;;  %v1620_v27 = vrot.slane %v1618_v42, 5  ;;  %v475_v60 = vor.u32 %v473_v32, %v472_v50  ;;  %v3501_v4 = vsel %vm3493_vm8, %v3468_v58, %v5498_v20  ;;  %v5637_v59 = vpop.permute.xlu0 %3175 }
 0x11e   : > { %v477_v56 = vrot.slane %v472_v50, 4  ;;  %v1624_v46 = vshll.u32 %v1347_v13, 16  ;;  %v678_v37 = vsel %vm4705_vm10, %v467_v10, %v677_v2  ;;  %v1630_v62 = vrot.slane %v1628_v6, 4 }
 0x11f   : > { %v1621_v61 = vor.u32 %v1620_v27, %v1617_v5  ;;  %v1634_v31 = vshll.u32 %v1368_v29, 16  ;;  %v476_v22 = vsel %vm4719_vm12, %v468_v45, %v475_v60  ;;  %679 = vst [vmem:[#allocation2 + $0x90] sm:$0xf] %v678_v37  ;;  %v3499_v20 = vsel %vm3493_vm8, %v3466_v12, %v5474_v33 }
 0x120   : > { %2757 = vrot.lane.b32.xlu1 %v4187_v39, %s4550_s29  ;;  %v682_v26 = vsel %vm4734_vm13, %v477_v56, %v681_v41  ;;  %v1626_v48 = vrot.slane %v1624_v46, 5  ;;  %680 = vst.msk [vmem:[#allocation2 + $0x94] sm:$0xf] %vm183_vm0, %v476_v22  ;;  %v3532_v53 = vsel %vm3526_vm9, %v3499_v20, %v5491_v16  ;;  %v4122_v23 = vrot.slane %v1768_v21, 9  ;;  %v5658_v32 = vpop.permute.xlu1 %3097  ;;  %v684_v22 = vld [vmem:[#allocation2 + $0x9c] sm:$0xf] }
 0x121   : > { %2851 = vrot.lane.b32.xlu0 %v4202_v47, %s4552_s4  ;;  %683 = vst [vmem:[#allocation2 + $0x98] sm:$0x1] %v682_v26  ;;  %v1622_v58 = vrot.slane %v1621_v61, 4  ;;  %v1636_v17 = vrot.slane %v1634_v31, 5  ;;  %v1894_v49 = vrot.slane %v1347_v13, 5  ;;  %v1897_v33 = vrot.slane %v1368_v29, 5  ;;  %4342 = vmatprep.mubr.msk.bf16.mxu0 %vm3579_vm5, %v3532_v53 }
 0x122   : > { %v1631_v38 = vor.u32 %v1630_v62, %v1626_v48  ;;  %v6464_v12 = vcombine.low %v5006_v3, %v5016_v14  ;;  %v3534_v16 = vsel %vm3526_vm9, %v3501_v4, %v5512_v18  ;;  %v479_v9 = vshrl.u32 %v263_v8, 16 }
 0x123   : > { %v1627_v43 = vsel %vm4711_vm11, %v1622_v58, %v1626_v48  ;;  %v482_v55 = vshll.u32 %v263_v8, 16  ;;  %v1895_v42 = vsel %vm4691_vm7, %v4122_v23, %v1894_v49  ;;  %v1896_v39 = vrot.slane %v1894_v49, 4  ;;  %4343 = vmatmul.mubr.msk.bf16.gmra.mrb[4].mxu0 %vm3579_vm5, %v3534_v16 }
 0x124   : > { %v3297_v19 = vsel %vm3279_vm14, %v6464_v12, %v5555_v35  ;;  %v1632_v13 = vrot.slane %v1631_v38, 4  ;;  %v487_v50 = vshrl.u32 %v264_v51, 16  ;;  %v6465_v3 = vcombine.low %v4969_v24, %v4985_v40  ;;  %v5674_v6 = vpop.permute.xlu0 %3255  ;;  %v5691_v37 = vpop.permute.xlu1 %3177 }
 0x125   : > { %v481_v35 = vrot.slane %v479_v9, 7  ;;  %v490_v2 = vshll.u32 %v264_v51, 16  ;;  %v3340_v18 = vsel %vm3328_vm15, %v3297_v19, %v5572_v57  ;;  %v1898_v29 = vsel %vm4691_vm7, %v1896_v39, %v1897_v33 }
 0x126   : > { %v3294_v14 = vsel %vm3279_vm14, %v6465_v3, %v5526_v0  ;;  %v1637_v47 = vsel %vm4711_vm11, %v1632_v13, %v1636_v17  ;;  %v5680_v10 = vrot.slane %v487_v50, 7  ;;  %v1348_v40 = vld [vmem:[#allocation2 + $0x90] sm:$0xf]  ;;  %v4234_v5 = vcombine.low %v1895_v42, %v1898_v29 }
 0x127   : > { %v5684_v24 = vsel %vm3328_vm15, %v3294_v14, %v5543_v25  ;;  %v4218_v0 = vcombine.low %v1627_v43, %v1637_v47  ;;  %v1769_v45 = vld [vmem:[#allocation2 + $0x90] sm:$0xe]  ;;  %v485_v27 = vrot.slane %v481_v35, 4  ;;  %v5688_v57 = vsel %vm3361_vm2, %v3340_v18, %v5590_v54  ;;  %v1349_v41 = vld [vmem:[#allocation2 + $0x94] sm:$0xf] }
 0x128   : > { %v1639_v60 = vshrl.u32 %v1348_v40, 16  ;;  %v1642_v4 = vshll.u32 %v1348_v40, 16  ;;  %v1369_v56 = vld [vmem:[#allocation2 + $0x98] sm:$0x1]  ;;  %v484_v46 = vor.u32 %v482_v55, %v481_v35  ;;  %v492_v21 = vor.u32 %v490_v2, %v5680_v10  ;;  %v1955_v8 = vld [vmem:[#allocation2 + $0x90] sm:$0xf]  ;;  %v5715_v35 = vpop.permute.xlu1 %2667 }
 0x129   : > { %v1652_v25 = vshrl.u32 %v1349_v41, 16  ;;  %v4203_v61 = vcombine.low %v1348_v40, %v1349_v41  ;;  %v1648_v62 = vshll.u32 %v1349_v41, 16  ;;  %v1658_v31 = vshll.u32 %v1369_v56, 16  ;;  %2931 = vrot.lane.b32.xlu0 %v4218_v0, %s4556_s8  ;;  %v5695_v51 = vld [vmem:[#allocation2 + $0x94] sm:$0xf] }
 0x12a   : > { %v1641_v20 = vrot.slane %v1639_v60, 4  ;;  %v1644_v26 = vrot.slane %v1642_v4, 5  ;;  %v4123_v54 = vrot.slane %v1769_v45, 9  ;;  %v1901_v48 = vrot.slane %v1349_v41, 5  ;;  %v5713_v3 = vld [vmem:[#allocation2 + $0x98] sm:$0x1] }
 0x12b   : > { %2853 = vrot.lane.b32.xlu1 %v4203_v61, %s4552_s4  ;;  %v1650_v58 = vrot.slane %v1648_v62, 5  ;;  %v1654_v17 = vrot.slane %v1652_v25, 4  ;;  %v1660_v53 = vrot.slane %v1658_v31, 5  ;;  %v1904_v23 = vrot.slane %v1369_v56, 5  ;;  %v5697_v38 = vpop.permute.xlu0 %3257  ;;  %v736_v14 = vld [vmem:[#allocation2 + $0x90] sm:$0xf] }
 0x12c   : > { %v1645_v49 = vor.u32 %v1644_v26, %v1641_v20  ;;  %v5701_v33 = vsel %vm4691_vm7, %v4123_v54, %v1901_v48  ;;  %v1903_v12 = vrot.slane %v1901_v48, 4  ;;  %v493_v19 = vsel %vm4719_vm12, %v485_v27, %v492_v21  ;;  %v688_v40 = vld [vmem:[#allocation2 + $0xa4] sm:$0x1]  ;;  %v5722_v41 = vld [vmem:[#allocation2 + $0x94] sm:$0xf] }
 0x12d   : > { %v1655_v43 = vor.u32 %v1654_v17, %v1650_v58  ;;  %3011 = vrot.lane.b32.xlu0 %v4234_v5, %s4554_s6  ;;  %v685_v16 = vsel %vm4705_vm10, %v484_v46, %v684_v22  ;;  %687 = vst.msk [vmem:[#allocation2 + $0xa0] sm:$0xf] %vm183_vm0, %v493_v19  ;;  %v2224_v9 = vshrl.u32 %v1955_v8, 16  ;;  %v2227_v55 = vshll.u32 %v1955_v8, 16  ;;  %v5728_v46 = vld [vmem:[#allocation2 + $0x98] sm:$0x1] }
 0x12e   : > { %v1646_v13 = vrot.slane %v1645_v49, 4  ;;  %v1905_v42 = vsel %vm4691_vm7, %v1903_v12, %v1904_v23  ;;  %686 = vst [vmem:[#allocation2 + $0x9c] sm:$0xf] %v685_v16  ;;  %v2237_v39 = vshrl.u32 %v5695_v51, 16  ;;  %v4250_v50 = vcombine.low %v1955_v8, %v5695_v51  ;;  %v5740_v23 = vpop.permute.xlu1 %2669 }
 0x12f   : > { %v1656_v2 = vrot.slane %v1655_v43, 4  ;;  %v4235_v18 = vcombine.low %v5701_v33, %v1905_v42  ;;  %v2226_v47 = vrot.slane %v2224_v9, 4  ;;  %v2229_v29 = vrot.slane %v2227_v55, 5  ;;  %v5730_v25 = vpop.permute.xlu0 %2747 }
 0x130   : > { %v1651_v0 = vsel %vm4711_vm11, %v1646_v13, %v1650_v58  ;;  %v494_v45 = vrot.slane %v5680_v10, 4  ;;  %v2233_v5 = vshll.u32 %v5695_v51, 16  ;;  %v2239_v27 = vrot.slane %v2237_v39, 4 }
 0x131   : > { %v1661_v60 = vsel %vm4711_vm11, %v1656_v2, %v1660_v53  ;;  %3107 = vrot.lane.b32.xlu0 %v4250_v50, %s4553_s5  ;;  %v2230_v4 = vor.u32 %v2229_v29, %v2226_v47  ;;  %v2243_v56 = vshll.u32 %v5713_v3, 16  ;;  %v1052_v21 = vshrl.u32 %v736_v14, 16  ;;  %v2377_v2 = vld [vmem:[#allocation2 + $0x90] sm:$0xe] }
 0x132   : > { %v4219_v61 = vcombine.low %v1651_v0, %v1661_v60  ;;  %v689_v10 = vsel %vm4734_vm13, %v494_v45, %v688_v40  ;;  %v2235_v62 = vrot.slane %v2233_v5, 5  ;;  %v1055_v31 = vshll.u32 %v736_v14, 16 }
 0x133   : > { %690 = vst [vmem:[#allocation2 + $0xa4] sm:$0x1] %v689_v10  ;;  %v2231_v22 = vrot.slane %v2230_v4, 4  ;;  %v2245_v20 = vrot.slane %v2243_v56, 5  ;;  %v1054_v26 = vrot.slane %v1052_v21, 4  ;;  %v1061_v54 = vshll.u32 %v5722_v41, 16  ;;  %v5747_v47 = vpop.permute.xlu0 %2843 }
 0x134   : > { %2933 = vrot.lane.b32.xlu1 %v4219_v61, %s4556_s8  ;;  %v5736_v48 = vld [vmem:[#allocation2 + $0xa0] sm:$0xf]  ;;  %v2240_v8 = vor.u32 %v2239_v27, %v2235_v62  ;;  %v1057_v58 = vrot.slane %v1055_v31, 5  ;;  %v1065_v17 = vshrl.u32 %v5722_v41, 16  ;;  %v1071_v53 = vshll.u32 %v5728_v46, 16 }
 0x135   : > { %v1957_v49 = vld [vmem:[#allocation2 + $0x9c] sm:$0xf]  ;;  %v2261_v33 = vshrl.u32 %v5736_v48, 16  ;;  %v2257_v12 = vshll.u32 %v5736_v48, 16  ;;  %v2236_v19 = vsel %vm4711_vm11, %v2231_v22, %v2235_v62  ;;  %v1063_v43 = vrot.slane %v1061_v54, 5  ;;  %v5758_v62 = vpop.permute.xlu1 %2749 }
 0x136   : > { %v2248_v16 = vshrl.u32 %v1957_v49, 16  ;;  %v2251_v9 = vshll.u32 %v1957_v49, 16  ;;  %v4251_v55 = vcombine.low %v1957_v49, %v5736_v48  ;;  %v2241_v13 = vrot.slane %v2240_v8, 4  ;;  %v738_v54 = vld [vmem:[#allocation2 + $0x9c] sm:$0xf] }
 0x137   : > { %v2259_v42 = vrot.slane %v2257_v12, 5  ;;  %v2263_v39 = vrot.slane %v2261_v33, 4  ;;  %v1058_v50 = vor.u32 %v1057_v58, %v1054_v26  ;;  %v1067_v14 = vrot.slane %v1065_v17, 4  ;;  %v739_v58 = vld [vmem:[#allocation2 + $0xa0] sm:$0xf] }
 0x138   : > { %3013 = vrot.lane.b32.xlu1 %v4235_v18, %s4554_s6  ;;  %v2250_v29 = vrot.slane %v2248_v16, 4  ;;  %v2253_v40 = vrot.slane %v2251_v9, 5  ;;  %v2246_v0 = vsel %vm4711_vm11, %v2241_v13, %v2245_v20  ;;  %v1073_v45 = vrot.slane %v1071_v53, 5 }
 0x139   : > { %v2264_v5 = vor.u32 %v2263_v39, %v2259_v42  ;;  %v4266_v27 = vcombine.low %v2236_v19, %v2246_v0  ;;  %v1059_v60 = vrot.slane %v1058_v50, 4  ;;  %v1068_v4 = vor.u32 %v1067_v14, %v1063_v43  ;;  %v5774_v19 = vpop.permute.xlu0 %2923 }
 0x13a   : > { %v5752_v56 = vld [vmem:[#allocation2 + $0xa4] sm:$0x1]  ;;  %v2254_v21 = vor.u32 %v2253_v40, %v2250_v29  ;;  %v3371_v61 = vsel %vm3361_vm2, %v5684_v24, %v5559_v52  ;;  %v4138_v10 = vrot.slane %v2377_v2, 9  ;;  %v2503_v18 = vrot.slane %v5695_v51, 5  ;;  %v1160_v40 = vld [vmem:[#allocation2 + $0x9c] sm:$0xe] }
 0x13b   : > { %v2265_v31 = vrot.slane %v2264_v5, 4  ;;  %v2267_v22 = vshll.u32 %v5752_v56, 16  ;;  %3187 = vrot.lane.b32.xlu0 %v4266_v27, %s4557_s9  ;;  %v1069_v20 = vrot.slane %v1068_v4, 4  ;;  %v1303_v26 = vrot.slane %v5728_v46, 5  ;;  %v757_v12 = vld [vmem:[#allocation2 + $0xa4] sm:$0x1] }
 0x13c   : > { %3109 = vrot.lane.b32.xlu1 %v4251_v55, %s4553_s5  ;;  %v2255_v8 = vrot.slane %v2254_v21, 4  ;;  %v2504_v52 = vsel %vm4691_vm7, %v4138_v10, %v2503_v18  ;;  %v2505_v24 = vrot.slane %v2503_v18, 4  ;;  %v2506_v51 = vrot.slane %v5713_v3, 5  ;;  %v2378_v55 = vld [vmem:[#allocation2 + $0x9c] sm:$0xe] }
 0x13d   : > { %v2269_v17 = vrot.slane %v2267_v22, 5  ;;  %v1064_v53 = vsel %vm4711_vm11, %v1059_v60, %v1063_v43  ;;  %v1074_v49 = vsel %vm4711_vm11, %v1069_v20, %v1073_v45  ;;  %v3406_v33 = vsel %vm3394_vm3, %v5688_v57, %v5619_v30  ;;  %v5792_v20 = vpop.permute.xlu0 %3003 }
 0x13e   : > { %v2260_v16 = vsel %vm4711_vm11, %v2255_v8, %v2259_v42  ;;  %v2507_v3 = vsel %vm4691_vm7, %v2505_v24, %v2506_v51  ;;  %v3404_v9 = vsel %vm3394_vm3, %v3371_v61, %v5579_v7  ;;  %v1076_v43 = vshrl.u32 %v738_v54, 16  ;;  %v5784_v42 = vpop.permute.xlu1 %2845  ;;  %v1159_v61 = vld [vmem:[#allocation2 + $0x90] sm:$0xe] }
 0x13f   : > { %v2270_v13 = vsel %vm4711_vm11, %v2265_v31, %v2269_v17  ;;  %v4282_v39 = vcombine.low %v2504_v52, %v2507_v3  ;;  %v1079_v50 = vshll.u32 %v738_v54, 16  ;;  %v1085_v30 = vshll.u32 %v739_v58, 16 }
 0x140   : > { %v4267_v57 = vcombine.low %v2260_v16, %v2270_v13  ;;  %v1078_v14 = vrot.slane %v1076_v43, 4  ;;  %v1089_v2 = vshrl.u32 %v739_v58, 16  ;;  %v1095_v29 = vshll.u32 %v757_v12, 16 }
 0x141   : > { %v4172_v0 = vcombine.low %v1064_v53, %v1074_v49  ;;  %3267 = vrot.lane.b32.xlu0 %v4282_v39, %s4555_s7  ;;  %v1081_v45 = vrot.slane %v1079_v50, 5  ;;  %v1087_v7 = vrot.slane %v1085_v30, 5  ;;  %v4139_v5 = vrot.slane %v2378_v55, 9  ;;  %v265_v53 = vld [vmem:[%s4689_s28 + $0x68] sm:$0xf] }
 0x142   : > { %3189 = vrot.lane.b32.xlu1 %v4267_v57, %s4557_s9  ;;  %v1091_v27 = vrot.slane %v1089_v2, 4  ;;  %v1310_v60 = vrot.slane %v757_v12, 5  ;;  %v2510_v4 = vrot.slane %v5736_v48, 5  ;;  %v2513_v21 = vrot.slane %v5752_v56, 5  ;;  %v1350_v39 = vld [vmem:[#allocation2 + $0x9c] sm:$0xf] }
 0x143   : > { %v1082_v10 = vor.u32 %v1081_v45, %v1078_v14  ;;  %v1097_v18 = vrot.slane %v1095_v29, 5  ;;  %v3439_v31 = vsel %vm3427_vm4, %v3406_v33, %v5630_v28  ;;  %v4109_v22 = vrot.slane %v1160_v40, 9  ;;  %v5820_v50 = vld [vmem:[#allocation2 + $0xa0] sm:$0xf]  ;;  %v5829_v29 = vpop.permute.xlu0 %3099 }
 0x144   : > { %v1092_v54 = vor.u32 %v1091_v27, %v1087_v7  ;;  %v2511_v8 = vsel %vm4691_vm7, %v4139_v5, %v2510_v4  ;;  %v2512_v52 = vrot.slane %v2510_v4, 4  ;;  %v1307_v24 = vrot.slane %v739_v58, 5  ;;  %v691_v27 = vld [vmem:[#allocation2 + $0xa8] sm:$0xf] }
 0x145   : > { %v1083_v48 = vrot.slane %v1082_v10, 4  ;;  %v3437_v56 = vsel %vm3427_vm4, %v3404_v9, %v5594_v15  ;;  %v4108_v51 = vrot.slane %v1159_v61, 9  ;;  %v1300_v17 = vrot.slane %v5722_v41, 5  ;;  %v5807_v58 = vpop.permute.xlu1 %2925  ;;  %v266_v9 = vld [vmem:[%s4689_s28 + $0x6c] sm:$0xf] }
 0x146   : > { %2679 = vrot.lane.b32.xlu1 %v4172_v0, %s4551_s30  ;;  %v1093_v28 = vrot.slane %v1092_v54, 4  ;;  %v2514_v49 = vsel %vm4691_vm7, %v2512_v52, %v2513_v21  ;;  %v1309_v33 = vrot.slane %v1307_v24, 4  ;;  %v5805_v12 = vsel %vm3460_vm6, %v3439_v31, %v5658_v32  ;;  %v695_v10 = vld [vmem:[#allocation2 + $0xb0] sm:$0x1] }
 0x147   : > { %v1088_v15 = vsel %vm4711_vm11, %v1083_v48, %v1087_v7  ;;  %v4283_v16 = vcombine.low %v2511_v8, %v2514_v49  ;;  %v1301_v41 = vsel %vm4691_vm7, %v4108_v51, %v1300_v17  ;;  %v1302_v3 = vrot.slane %v1300_v17, 4 }
 0x148   : > { %v1098_v43 = vsel %vm4711_vm11, %v1093_v28, %v1097_v18  ;;  %v1308_v55 = vsel %vm4691_vm7, %v4109_v22, %v1307_v24  ;;  %v1311_v32 = vsel %vm4691_vm7, %v1309_v33, %v1310_v60  ;;  %v496_v13 = vshrl.u32 %v265_v53, 16  ;;  %v1370_v18 = vld [vmem:[#allocation2 + $0xa4] sm:$0x1]  ;;  %v1770_v24 = vld [vmem:[#allocation2 + $0x9c] sm:$0xe] }
 0x149   : > { %v4173_v30 = vcombine.low %v1088_v15, %v1098_v43  ;;  %3269 = vrot.lane.b32.xlu0 %v4283_v16, %s4555_s7  ;;  %v1304_v57 = vsel %vm4691_vm7, %v1302_v3, %v1303_v26  ;;  %v3470_v14 = vsel %vm3460_vm6, %v3437_v56, %v5623_v11  ;;  %v499_v2 = vshll.u32 %v265_v53, 16  ;;  %v5834_v31 = vpop.permute.xlu1 %3005  ;;  %v4469_v33 = vld [vmem:[#allocation2 + $0x48] sm:$0xf]  ;;  %v4470_v15 = vld [vmem:[#allocation2 + $0x4c] sm:$0xf] }
 0x14a   : > { %v4188_v40 = vcombine.low %v1301_v41, %v1304_v57  ;;  %v498_v0 = vrot.slane %v496_v13, 7  ;;  %v504_v45 = vshrl.u32 %v266_v9, 16  ;;  %v507_v7 = vshll.u32 %v266_v9, 16  ;;  %v268_v57 = vld [vmem:[%s4689_s28 + $0x74] sm:$0xf] }
 0x14b   : > { %2681 = vrot.lane.b32.xlu1 %v4173_v30, %s4551_s30  ;;  %v4189_v5 = vcombine.low %v1308_v55, %v1311_v32  ;;  %v1663_v60 = vshrl.u32 %v1350_v39, 16  ;;  %v1666_v4 = vshll.u32 %v1350_v39, 16  ;;  %v1676_v46 = vshrl.u32 %v5820_v50, 16  ;;  %v267_v55 = vld [vmem:[%s4689_s28 + $0x70] sm:$0xf] }
 0x14c   : > { %v501_v21 = vor.u32 %v499_v2, %v498_v0  ;;  %v502_v26 = vrot.slane %v498_v0, 4  ;;  %v506_v61 = vrot.slane %v504_v45, 7  ;;  %v4204_v11 = vcombine.low %v1350_v39, %v5820_v50  ;;  %v4471_v2 = vld [vmem:[#allocation2 + $0x54] sm:$0xf] }
 0x14d   : > { %2759 = vrot.lane.b32.xlu0 %v4188_v40, %s4550_s29  ;;  %v1665_v22 = vrot.slane %v1663_v60, 4  ;;  %v1668_v54 = vrot.slane %v1666_v4, 5  ;;  %v3503_v8 = vsel %vm3493_vm8, %v3470_v14, %v5637_v59  ;;  %v1672_v52 = vshll.u32 %v5820_v50, 16  ;;  %v5843_v16 = vpop.permute.xlu0 %3179  ;;  %v4472_v40 = vld [vmem:[#allocation2 + $0x58] sm:$0xf] }
 0x14e   : > { %v509_v48 = vor.u32 %v507_v7, %v506_v61  ;;  %v692_v56 = vsel %vm4705_vm10, %v501_v21, %v691_v27  ;;  %v511_v51 = vrot.slane %v506_v61, 4  ;;  %v1678_v17 = vrot.slane %v1676_v46, 4  ;;  %v5862_v7 = vpop.permute.xlu1 %3101 }
 0x14f   : > { %2761 = vrot.lane.b32.xlu1 %v4189_v5, %s4550_s29  ;;  %693 = vst [vmem:[#allocation2 + $0xa8] sm:$0xf] %v692_v56  ;;  %v1669_v53 = vor.u32 %v1668_v54, %v1665_v22  ;;  %v1674_v28 = vrot.slane %v1672_v52, 5  ;;  %v1682_v49 = vshll.u32 %v1370_v18, 16  ;;  %v4150_v59 = vcombine.low %v4469_v33, %v4470_v15 }
 0x150   : > { %v510_v41 = vsel %vm4719_vm12, %v502_v26, %v509_v48  ;;  %v696_v3 = vsel %vm4734_vm13, %v511_v51, %v695_v10  ;;  %v3536_v9 = vsel %vm3526_vm9, %v3503_v8, %v5674_v6  ;;  %v4124_v43 = vrot.slane %v1770_v24, 9  ;;  %v698_v8 = vld [vmem:[#allocation2 + $0xb4] sm:$0xf] }
 0x151   : > { %694 = vst.msk [vmem:[#allocation2 + $0xac] sm:$0xf] %vm183_vm0, %v510_v41  ;;  %2855 = vrot.lane.b32.xlu0 %v4204_v11, %s4552_s4  ;;  %v3505_v32 = vsel %vm3493_vm8, %v5805_v12, %v5691_v37  ;;  %697 = vst [vmem:[#allocation2 + $0xb0] sm:$0x1] %v696_v3  ;;  %v1670_v13 = vrot.slane %v1669_v53, 4  ;;  %v1679_v39 = vor.u32 %v1678_v17, %v1674_v28  ;;  %v1684_v30 = vrot.slane %v1682_v49, 5 }
 0x152   : > { %4346 = vmatprep.mubr.msk.bf16.mxu0 %vm3579_vm5, %v3536_v9  ;;  %v1908_v14 = vrot.slane %v5820_v50, 5  ;;  %v1911_v6 = vrot.slane %v1370_v18, 5  ;;  %v4151_v0 = vcombine.low %v4471_v2, %v4472_v40  ;;  %v3538_v45 = vsel %vm3526_vm9, %v3505_v32, %v5697_v38  ;;  %v5877_v11 = vpop.permute.xlu0 %3259 }
 0x153   : > { %v1675_v37 = vsel %vm4711_vm11, %v1670_v13, %v1674_v28  ;;  %v1680_v12 = vrot.slane %v1679_v39, 4  ;;  %v5868_v5 = vsel %vm3279_vm14, %v4150_v59, %v5715_v35  ;;  %v513_v27 = vshrl.u32 %v267_v55, 16  ;;  %4347 = vmatmul.mubr.msk.bf16.gmra.mrb[8].mxu0 %vm3579_vm5, %v3538_v45  ;;  %v5886_v59 = vpop.permute.xlu1 %3181 }
 0x154   : > { %v1909_v50 = vsel %vm4691_vm7, %v4124_v43, %v1908_v14  ;;  %v1910_v60 = vrot.slane %v1908_v14, 4  ;;  %v516_v4 = vshll.u32 %v267_v55, 16  ;;  %v521_v46 = vshrl.u32 %v268_v57, 16 }
 0x155   : > { %v1685_v38 = vsel %vm4711_vm11, %v1680_v12, %v1684_v30  ;;  %v3303_v21 = vsel %vm3279_vm14, %v4151_v0, %v5740_v23  ;;  %v515_v26 = vrot.slane %v513_v27, 7  ;;  %v524_v61 = vshll.u32 %v268_v57, 16  ;;  %v702_v12 = vld [vmem:[#allocation2 + $0xbc] sm:$0x1] }
 0x156   : > { %v1352_v35 = vld [vmem:[#allocation2 + $0xa8] sm:$0xf]  ;;  %v4220_v10 = vcombine.low %v1675_v37, %v1685_v38  ;;  %v1912_v22 = vsel %vm4691_vm7, %v1910_v60, %v1911_v6  ;;  %v523_v54 = vrot.slane %v521_v46, 7  ;;  %v5883_v52 = vsel %vm3328_vm15, %v3303_v21, %v5758_v62 }
 0x157   : > { %v1771_v18 = vld [vmem:[#allocation2 + $0xa8] sm:$0xe]  ;;  %v1687_v24 = vshrl.u32 %v1352_v35, 16  ;;  %v1690_v48 = vshll.u32 %v1352_v35, 16  ;;  %v4236_v23 = vcombine.low %v1909_v50, %v1912_v22  ;;  %v518_v28 = vor.u32 %v516_v4, %v515_v26 }
 0x158   : > { %v4125_v56 = vrot.slane %v1771_v18, 9  ;;  %v1959_v51 = vld [vmem:[#allocation2 + $0xa8] sm:$0xf]  ;;  %v1353_v17 = vld [vmem:[#allocation2 + $0xac] sm:$0xf]  ;;  %2935 = vrot.lane.b32.xlu0 %v4220_v10, %s4556_s8  ;;  %v519_v49 = vrot.slane %v515_v26, 4  ;;  %v526_v33 = vor.u32 %v524_v61, %v523_v54  ;;  %v5916_v22 = vsel %vm3328_vm15, %v5868_v5, %v5730_v25 }
 0x159   : > { %v1371_v53 = vld [vmem:[#allocation2 + $0xb0] sm:$0x1]  ;;  %v2272_v15 = vshrl.u32 %v1959_v51, 16  ;;  %v1689_v41 = vrot.slane %v1687_v24, 4  ;;  %v1692_v3 = vrot.slane %v1690_v48, 5  ;;  %v1700_v9 = vshrl.u32 %v1353_v17, 16  ;;  %v5895_v2 = vpop.permute.xlu0 %3261 }
 0x15a   : > { %v4205_v62 = vcombine.low %v1352_v35, %v1353_v17  ;;  %v1696_v43 = vshll.u32 %v1353_v17, 16  ;;  %v1706_v55 = vshll.u32 %v1371_v53, 16  ;;  %v1915_v32 = vrot.slane %v1353_v17, 5  ;;  %v5888_v39 = vld [vmem:[#allocation2 + $0xac] sm:$0xf]  ;;  %v5909_v35 = vpop.permute.xlu1 %2671 }
 0x15b   : > { %v1918_v13 = vrot.slane %v1371_v53, 5  ;;  %v1693_v30 = vor.u32 %v1692_v3, %v1689_v41  ;;  %v1702_v57 = vrot.slane %v1700_v9, 4  ;;  %v527_v14 = vsel %vm4719_vm12, %v519_v49, %v526_v33  ;;  %v5904_v46 = vld [vmem:[#allocation2 + $0xb0] sm:$0x1]  ;;  %v5919_v24 = vld [vmem:[#allocation2 + $0xa8] sm:$0xf] }
 0x15c   : > { %2857 = vrot.lane.b32.xlu1 %v4205_v62, %s4552_s4  ;;  %v699_v6 = vsel %vm4705_vm10, %v518_v28, %v698_v8  ;;  %v1698_v40 = vrot.slane %v1696_v43, 5  ;;  %v1708_v0 = vrot.slane %v1706_v55, 5  ;;  %v5899_v45 = vsel %vm4691_vm7, %v4125_v56, %v1915_v32  ;;  %3015 = vrot.lane.b32.xlu0 %v4236_v23, %s4554_s6  ;;  %701 = vst.msk [vmem:[#allocation2 + $0xb8] sm:$0xf] %vm183_vm0, %v527_v14 }
 0x15d   : > { %v1917_v37 = vrot.slane %v1915_v32, 4  ;;  %700 = vst [vmem:[#allocation2 + $0xb4] sm:$0xf] %v699_v6  ;;  %v1694_v27 = vrot.slane %v1693_v30, 4  ;;  %v2274_v50 = vrot.slane %v2272_v15, 4  ;;  %v2275_v60 = vshll.u32 %v1959_v51, 16  ;;  %v5933_v28 = vpop.permute.xlu0 %2751 }
 0x15e   : > { %v2285_v4 = vshrl.u32 %v5888_v39, 16  ;;  %v1703_v38 = vor.u32 %v1702_v57, %v1698_v40  ;;  %v4252_v26 = vcombine.low %v1959_v51, %v5888_v39  ;;  %v528_v61 = vrot.slane %v523_v54, 4  ;;  %v5925_v51 = vld [vmem:[#allocation2 + $0xac] sm:$0xf]  ;;  %v5944_v57 = vpop.permute.xlu1 %2673 }
 0x15f   : > { %v1919_v21 = vsel %vm4691_vm7, %v1917_v37, %v1918_v13  ;;  %v1699_v10 = vsel %vm4711_vm11, %v1694_v27, %v1698_v40  ;;  %v2277_v18 = vrot.slane %v2275_v60, 5  ;;  %v2281_v8 = vshll.u32 %v5888_v39, 16  ;;  %v2379_v60 = vld [vmem:[#allocation2 + $0xa8] sm:$0xe] }
 0x160   : > { %v1704_v48 = vrot.slane %v1703_v38, 4  ;;  %3111 = vrot.lane.b32.xlu0 %v4252_v26, %s4553_s5  ;;  %v703_v54 = vsel %vm4734_vm13, %v528_v61, %v702_v12  ;;  %v2287_v56 = vrot.slane %v2285_v4, 4  ;;  %v2291_v23 = vshll.u32 %v5904_v46, 16 }
 0x161   : > { %v4237_v17 = vcombine.low %v5899_v45, %v1919_v21  ;;  %704 = vst [vmem:[#allocation2 + $0xbc] sm:$0x1] %v703_v54  ;;  %v2278_v25 = vor.u32 %v2277_v18, %v2274_v50  ;;  %v2283_v5 = vrot.slane %v2281_v8, 5  ;;  %v5931_v53 = vsel %vm3361_vm2, %v5883_v52, %v5784_v42  ;;  %v5955_v61 = vpop.permute.xlu0 %2847 }
 0x162   : > { %v1709_v49 = vsel %vm4711_vm11, %v1704_v48, %v1708_v0  ;;  %v2293_v33 = vrot.slane %v2291_v23, 5  ;;  %v1100_v15 = vshrl.u32 %v5919_v24, 16  ;;  %v1103_v41 = vshll.u32 %v5919_v24, 16  ;;  %v5950_v0 = vld [vmem:[#allocation2 + $0xb0] sm:$0x1] }
 0x163   : > { %v4221_v3 = vcombine.low %v1699_v10, %v1709_v49  ;;  %v5939_v62 = vld [vmem:[#allocation2 + $0xb8] sm:$0xf]  ;;  %v2279_v43 = vrot.slane %v2278_v25, 4  ;;  %v2288_v55 = vor.u32 %v2287_v56, %v2283_v5  ;;  %v1109_v32 = vshll.u32 %v5925_v51, 16 }
 0x164   : > { %v1961_v9 = vld [vmem:[#allocation2 + $0xb4] sm:$0xf]  ;;  %v2309_v13 = vshrl.u32 %v5939_v62, 16  ;;  %v2305_v14 = vshll.u32 %v5939_v62, 16  ;;  %v1102_v45 = vrot.slane %v1100_v15, 4  ;;  %v1105_v50 = vrot.slane %v1103_v41, 5 }
 0x165   : > { %v2296_v42 = vshrl.u32 %v1961_v9, 16  ;;  %v2299_v52 = vshll.u32 %v1961_v9, 16  ;;  %v4253_v30 = vcombine.low %v1961_v9, %v5939_v62  ;;  %2937 = vrot.lane.b32.xlu1 %v4221_v3, %s4556_s8  ;;  %v2284_v6 = vsel %vm4711_vm11, %v2279_v43, %v2283_v5  ;;  %v5964_v3 = vpop.permute.xlu1 %2753 }
 0x166   : > { %v2289_v40 = vrot.slane %v2288_v55, 4  ;;  %v2311_v27 = vrot.slane %v2309_v13, 4  ;;  %v2307_v4 = vrot.slane %v2305_v14, 5  ;;  %v1111_v21 = vrot.slane %v1109_v32, 5  ;;  %v5976_v14 = vld [vmem:[#allocation2 + $0xb8] sm:$0xf] }
 0x167   : > { %v2298_v37 = vrot.slane %v2296_v42, 4  ;;  %v2301_v12 = vrot.slane %v2299_v52, 5  ;;  %v1113_v26 = vshrl.u32 %v5925_v51, 16  ;;  %v1106_v48 = vor.u32 %v1105_v50, %v1102_v45  ;;  %v2380_v50 = vld [vmem:[#allocation2 + $0xb4] sm:$0xe] }
 0x168   : > { %v2294_v38 = vsel %vm4711_vm11, %v2289_v40, %v2293_v33  ;;  %v5957_v10 = vld [vmem:[#allocation2 + $0xbc] sm:$0x1]  ;;  %v1119_v54 = vshll.u32 %v5950_v0, 16  ;;  %v2312_v56 = vor.u32 %v2311_v27, %v2307_v4  ;;  %v4140_v5 = vrot.slane %v2379_v60, 9 }
 0x169   : > { %v2302_v18 = vor.u32 %v2301_v12, %v2298_v37  ;;  %v4268_v8 = vcombine.low %v2284_v6, %v2294_v38  ;;  %3017 = vrot.lane.b32.xlu1 %v4237_v17, %s4554_s6  ;;  %v2315_v23 = vshll.u32 %v5957_v10, 16  ;;  %v1115_v25 = vrot.slane %v1113_v26, 4  ;;  %v5967_v17 = vld [vmem:[#allocation2 + $0xb4] sm:$0xf] }
 0x16a   : > { %v1107_v33 = vrot.slane %v1106_v48, 4  ;;  %v1121_v15 = vrot.slane %v1119_v54, 5  ;;  %v2517_v41 = vrot.slane %v5888_v39, 5  ;;  %v2313_v9 = vrot.slane %v2312_v56, 4 }
 0x16b   : > { %v2303_v49 = vrot.slane %v2302_v18, 4  ;;  %3191 = vrot.lane.b32.xlu0 %v4268_v8, %s4557_s9  ;;  %v2317_v43 = vrot.slane %v2315_v23, 5  ;;  %v1116_v55 = vor.u32 %v1115_v25, %v1111_v21  ;;  %v2520_v32 = vrot.slane %v5904_v46, 5  ;;  %v5996_v8 = vpop.permute.xlu1 %2849  ;;  %v1162_v25 = vld [vmem:[#allocation2 + $0xb4] sm:$0xe] }
 0x16c   : > { %v3375_v52 = vsel %vm3361_vm2, %v5916_v22, %v5747_v47  ;;  %v2518_v13 = vsel %vm4691_vm7, %v4140_v5, %v2517_v41  ;;  %v2519_v39 = vrot.slane %v2517_v41, 4  ;;  %v1112_v6 = vsel %vm4711_vm11, %v1107_v33, %v1111_v21  ;;  %v759_v47 = vld [vmem:[#allocation2 + $0xbc] sm:$0x1]  ;;  %v5986_v22 = vpop.permute.xlu0 %2927  ;;  %v1161_v41 = vld [vmem:[#allocation2 + $0xa8] sm:$0xe] }
 0x16d   : > { %v2308_v42 = vsel %vm4711_vm11, %v2303_v49, %v2307_v4  ;;  %3113 = vrot.lane.b32.xlu1 %v4253_v30, %s4553_s5  ;;  %v2318_v46 = vsel %vm4711_vm11, %v2313_v9, %v2317_v43  ;;  %v1117_v40 = vrot.slane %v1116_v55, 4  ;;  %v3410_v45 = vsel %vm3394_vm3, %v5931_v53, %v5807_v58 }
 0x16e   : > { %v4269_v37 = vcombine.low %v2308_v42, %v2318_v46  ;;  %v2521_v12 = vsel %vm4691_vm7, %v2519_v39, %v2520_v32  ;;  %v1124_v30 = vshrl.u32 %v5967_v17, 16  ;;  %v1127_v27 = vshll.u32 %v5967_v17, 16 }
 0x16f   : > { %v1122_v60 = vsel %vm4711_vm11, %v1117_v40, %v1121_v15  ;;  %v4284_v4 = vcombine.low %v2518_v13, %v2521_v12  ;;  %v1133_v38 = vshll.u32 %v5976_v14, 16  ;;  %v1137_v58 = vshrl.u32 %v5976_v14, 16  ;;  %v269_v12 = vld [vmem:[%s4689_s28 + $0x78] sm:$0xf] }
 0x170   : > { %v4174_v53 = vcombine.low %v1112_v6, %v1122_v60  ;;  %v1126_v21 = vrot.slane %v1124_v30, 4  ;;  %v1129_v26 = vrot.slane %v1127_v27, 5  ;;  %v1143_v18 = vshll.u32 %v759_v47, 16  ;;  %v6008_v42 = vpop.permute.xlu0 %3007 }
 0x171   : > { %3193 = vrot.lane.b32.xlu1 %v4269_v37, %s4557_s9  ;;  %3271 = vrot.lane.b32.xlu0 %v4284_v4, %s4555_s7  ;;  %v1135_v48 = vrot.slane %v1133_v38, 5  ;;  %v1139_v54 = vrot.slane %v1137_v58, 4  ;;  %v4141_v56 = vrot.slane %v2380_v50, 9  ;;  %v2524_v23 = vrot.slane %v5939_v62, 5  ;;  %v270_v4 = vld [vmem:[%s4689_s28 + $0x7c] sm:$0xf] }
 0x172   : > { %v3408_v5 = vsel %vm3394_vm3, %v3375_v52, %v5774_v19  ;;  %v1130_v49 = vor.u32 %v1129_v26, %v1126_v21  ;;  %v1145_v33 = vrot.slane %v1143_v18, 5  ;;  %v2527_v15 = vrot.slane %v5957_v10, 5  ;;  %v1354_v38 = vld [vmem:[#allocation2 + $0xb4] sm:$0xf]  ;;  %v6035_v18 = vld [vmem:[#allocation2 + $0xb8] sm:$0xf] }
 0x173   : > { %v1140_v9 = vor.u32 %v1139_v54, %v1135_v48  ;;  %v2525_v43 = vsel %vm4691_vm7, %v4141_v56, %v2524_v23  ;;  %v2526_v55 = vrot.slane %v2524_v23, 4  ;;  %v3443_v32 = vsel %vm3427_vm4, %v3410_v45, %v5834_v31 }
 0x174   : > { %v1131_v62 = vrot.slane %v1130_v49, 4  ;;  %v4111_v13 = vrot.slane %v1162_v25, 9  ;;  %v1321_v19 = vrot.slane %v5976_v14, 5  ;;  %v1324_v52 = vrot.slane %v759_v47, 5  ;;  %v6020_v47 = vpop.permute.xlu1 %2929  ;;  %v6039_v23 = vpop.permute.xlu0 %3103 }
 0x175   : > { %2683 = vrot.lane.b32.xlu1 %v4174_v53, %s4551_s30  ;;  %v1141_v10 = vrot.slane %v1140_v9, 4  ;;  %v2528_v39 = vsel %vm4691_vm7, %v2526_v55, %v2527_v15  ;;  %v4110_v46 = vrot.slane %v1161_v41, 9  ;;  %v1314_v6 = vrot.slane %v5925_v51, 5  ;;  %v6045_v9 = vld [vmem:[#allocation2 + $0xbc] sm:$0x1] }
 0x176   : > { %v1136_v31 = vsel %vm4711_vm11, %v1131_v62, %v1135_v48  ;;  %v4285_v40 = vcombine.low %v2525_v43, %v2528_v39  ;;  %v1322_v45 = vsel %vm4691_vm7, %v4111_v13, %v1321_v19  ;;  %v1323_v37 = vrot.slane %v1321_v19, 4  ;;  %v705_v55 = vld [vmem:[#allocation2 + $0xc0] sm:$0xf]  ;;  %v709_v39 = vld [vmem:[#allocation2 + $0xc8] sm:$0x1] }
 0x177   : > { %v1146_v30 = vsel %vm4711_vm11, %v1141_v10, %v1145_v33  ;;  %v1315_v27 = vsel %vm4691_vm7, %v4110_v46, %v1314_v6  ;;  %v1316_v50 = vrot.slane %v1314_v6, 4  ;;  %v1317_v60 = vrot.slane %v5950_v0, 5 }
 0x178   : > { %v4175_v58 = vcombine.low %v1136_v31, %v1146_v30  ;;  %3273 = vrot.lane.b32.xlu0 %v4285_v40, %s4555_s7  ;;  %v3441_v53 = vsel %vm3427_vm4, %v3408_v5, %v5792_v20  ;;  %v1325_v21 = vsel %vm4691_vm7, %v1323_v37, %v1324_v52  ;;  %v3476_v26 = vsel %vm3460_vm6, %v3443_v32, %v5862_v7  ;;  %v6051_v19 = vpop.permute.xlu1 %3009  ;;  %v1772_v37 = vld [vmem:[#allocation2 + $0xb4] sm:$0xe] }
 0x179   : > { %v4191_v48 = vcombine.low %v1322_v45, %v1325_v21  ;;  %v1318_v0 = vsel %vm4691_vm7, %v1316_v50, %v1317_v60  ;;  %v530_v54 = vshrl.u32 %v269_v12, 16  ;;  %v533_v56 = vshll.u32 %v269_v12, 16 }
 0x17a   : > { %2685 = vrot.lane.b32.xlu1 %v4175_v58, %s4551_s30  ;;  %v4190_v25 = vcombine.low %v1315_v27, %v1318_v0  ;;  %v538_v20 = vshrl.u32 %v270_v4, 16  ;;  %v541_v5 = vshll.u32 %v270_v4, 16  ;;  %v1711_v49 = vshrl.u32 %v1354_v38, 16  ;;  %v4474_v58 = vld [vmem:[#allocation2 + $0x64] sm:$0xf]  ;;  %s4091_s30 = sshll.u32 %s169_s24, 1 }
 0x17b   : > { %v3474_v33 = vsel %vm3460_vm6, %v3441_v53, %v5829_v29  ;;  %v532_v7 = vrot.slane %v530_v54, 7  ;;  %v1714_v15 = vshll.u32 %v1354_v38, 16  ;;  %v1724_v41 = vshrl.u32 %v6035_v18, 16  ;;  %v4475_v54 = vld [vmem:[#allocation2 + $0x6c] sm:$0xf] }
 0x17c   : > { %2763 = vrot.lane.b32.xlu0 %v4190_v25, %s4550_s29  ;;  %v540_v43 = vrot.slane %v538_v20, 7  ;;  %v1713_v32 = vrot.slane %v1711_v49, 4  ;;  %v4206_v62 = vcombine.low %v1354_v38, %v6035_v18  ;;  %v3509_v13 = vsel %vm3493_vm8, %v3476_v26, %v5886_v59  ;;  %v4473_v38 = vld [vmem:[#allocation2 + $0x60] sm:$0xf]  ;;  %v6077_v20 = vpop.permute.xlu1 %3105 }
 0x17d   : > { %v535_v52 = vor.u32 %v533_v56, %v532_v7  ;;  %v536_v29 = vrot.slane %v532_v7, 4  ;;  %v1716_v10 = vrot.slane %v1714_v15, 5  ;;  %v1720_v46 = vshll.u32 %v6035_v18, 16  ;;  %v4476_v56 = vld [vmem:[#allocation2 + $0x70] sm:$0xf] }
 0x17e   : > { %2765 = vrot.lane.b32.xlu1 %v4191_v48, %s4550_s29  ;;  %v543_v6 = vor.u32 %v541_v5, %v540_v43  ;;  %v545_v31 = vrot.slane %v540_v43, 4  ;;  %v1726_v40 = vrot.slane %v1724_v41, 4  ;;  %v1730_v45 = vshll.u32 %v6045_v9, 16  ;;  %v6084_v15 = vld [vmem:[#allocation2 + $0xd0] sm:$0xf]  ;;  %s6226_s29 = scalar_lea.vmem %s6449_s2, %s4312_s26 }
 0x17f   : > { %v706_v12 = vsel %vm4705_vm10, %v535_v52, %v705_v55  ;;  %v3507_v59 = vsel %vm3493_vm8, %v3474_v33, %v5843_v16  ;;  %v1717_v30 = vor.u32 %v1716_v10, %v1713_v32  ;;  %v1722_v27 = vrot.slane %v1720_v46, 5  ;;  %v6060_v50 = vpop.permute.xlu0 %3183  ;;  %v6069_v16 = vld [vmem:[#allocation2 + $0xcc] sm:$0xf] }
 0x180   : > { %v544_v60 = vsel %vm4719_vm12, %v536_v29, %v543_v6  ;;  %707 = vst [vmem:[#allocation2 + $0xc0] sm:$0xf] %v706_v12  ;;  %2859 = vrot.lane.b32.xlu0 %v4206_v62, %s4552_s4  ;;  %v710_v4 = vsel %vm4734_vm13, %v545_v31, %v709_v39  ;;  %v4152_v34 = vcombine.low %v4473_v38, %v4474_v58  ;;  %v1732_v26 = vrot.slane %v1730_v45, 5 }
 0x181   : > { %v3540_v53 = vsel %vm3526_vm9, %v3507_v59, %v5877_v11  ;;  %708 = vst.msk [vmem:[#allocation2 + $0xc4] sm:$0xf] %vm183_vm0, %v544_v60  ;;  %711 = vst [vmem:[#allocation2 + $0xc8] sm:$0x1] %v710_v4  ;;  %v1718_v21 = vrot.slane %v1717_v30, 4  ;;  %v1727_v44 = vor.u32 %v1726_v40, %v1722_v27  ;;  %v4126_v48 = vrot.slane %v1772_v37, 9 }
 0x182   : > { %4350 = vmatprep.mubr.msk.bf16.mxu0 %vm3579_vm5, %v3540_v53  ;;  %v1922_v63 = vrot.slane %v6035_v18, 5  ;;  %v1925_v0 = vrot.slane %v6045_v9, 5  ;;  %v4153_v25 = vcombine.low %v4475_v54, %v4476_v56  ;;  %v3542_v11 = vsel %vm3526_vm9, %v3509_v13, %v5895_v2 }
 0x183   : > { %v1723_v5 = vsel %vm4711_vm11, %v1718_v21, %v1722_v27  ;;  %v1728_v49 = vrot.slane %v1727_v44, 4  ;;  %v2344_v33 = vshrl.u32 %v6069_v16, 16  ;;  %v2347_v7 = vshll.u32 %v6069_v16, 16  ;;  %4351 = vmatmul.mubr.msk.bf16.gmra.mrb[12].mxu0 %vm3579_vm5, %v3542_v11  ;;  %v6086_v41 = vpop.permute.xlu0 %3263 }
 0x184   : > { %v1924_v18 = vrot.slane %v1922_v63, 4  ;;  %v1923_v9 = vsel %vm4691_vm7, %v4126_v48, %v1922_v63  ;;  %v3306_v62 = vsel %vm3279_vm14, %v4152_v34, %v5909_v35  ;;  %v3309_v52 = vsel %vm3279_vm14, %v4153_v25, %v5944_v57 }
 0x185   : > { %v1733_v2 = vsel %vm4711_vm11, %v1728_v49, %v1732_v26  ;;  %v6092_v43 = vrot.slane %v2344_v33, 4  ;;  %v6094_v55 = vrot.slane %v2347_v7, 5  ;;  %v2357_v39 = vshrl.u32 %v6084_v15, 16  ;;  %v6124_v7 = vld [vmem:[#allocation2 + $0xd4] sm:$0x1] }
 0x186   : > { %v4222_v32 = vcombine.low %v1723_v5, %v1733_v2  ;;  %v1926_v13 = vsel %vm4691_vm7, %v1924_v18, %v1925_v0  ;;  %v4255_v46 = vcombine.low %v6069_v16, %v6084_v15  ;;  %v3348_v6 = vsel %vm3328_vm15, %v3309_v52, %v5964_v3  ;;  %v6112_v59 = vpop.permute.xlu1 %3185 }
 0x187   : > { %v1356_v29 = vld [vmem:[#allocation2 + $0xc0] sm:$0xf]  ;;  %v3346_v31 = vsel %vm3328_vm15, %v3306_v62, %v5933_v28  ;;  %v4238_v57 = vcombine.low %v1923_v9, %v1926_v13  ;;  %v2350_v12 = vor.u32 %v6094_v55, %v6092_v43  ;;  %v3381_v63 = vsel %vm3361_vm2, %v3348_v6, %v5996_v8 }
 0x188   : > { %v1773_v10 = vld [vmem:[#allocation2 + $0xc0] sm:$0xe]  ;;  %v1357_v35 = vld [vmem:[#allocation2 + $0xc4] sm:$0xf]  ;;  %v1735_v40 = vshrl.u32 %v1356_v29, 16  ;;  %v1738_v45 = vshll.u32 %v1356_v29, 16  ;;  %2939 = vrot.lane.b32.xlu0 %v4222_v32, %s4556_s8  ;;  %v3379_v8 = vsel %vm3361_vm2, %v3346_v31, %v5955_v61 }
 0x189   : > { %v1373_v37 = vld [vmem:[#allocation2 + $0xc8] sm:$0x1]  ;;  %v1748_v30 = vshrl.u32 %v1357_v35, 16  ;;  %v4207_v27 = vcombine.low %v1356_v29, %v1357_v35  ;;  %v1744_v60 = vshll.u32 %v1357_v35, 16  ;;  %v1963_v3 = vld [vmem:[#allocation2 + $0xc0] sm:$0xf] }
 0x18a   : > { %v1754_v4 = vshll.u32 %v1373_v37, 16  ;;  %v1737_v38 = vrot.slane %v1735_v40, 4  ;;  %v1740_v58 = vrot.slane %v1738_v45, 5  ;;  %v4127_v28 = vrot.slane %v1773_v10, 9  ;;  %v6114_v53 = vld [vmem:[#allocation2 + $0xc4] sm:$0xf]  ;;  %v6116_v21 = vpop.permute.xlu0 %3265  ;;  %v6130_v43 = vpop.permute.xlu1 %2675 }
 0x18b   : > { %v1929_v34 = vrot.slane %v1357_v35, 5  ;;  %2861 = vrot.lane.b32.xlu1 %v4207_v27, %s4552_s4  ;;  %v1746_v44 = vrot.slane %v1744_v60, 5  ;;  %v1750_v26 = vrot.slane %v1748_v30, 4  ;;  %v1932_v48 = vrot.slane %v1373_v37, 5  ;;  %v1981_v52 = vld [vmem:[#allocation2 + $0xc8] sm:$0x1] }
 0x18c   : > { %v1741_v0 = vor.u32 %v1740_v58, %v1737_v38  ;;  %v1756_v54 = vrot.slane %v1754_v4, 5  ;;  %3019 = vrot.lane.b32.xlu0 %v4238_v57, %s4554_s6  ;;  %v2320_v25 = vshrl.u32 %v1963_v3, 16  ;;  %v2323_v5 = vshll.u32 %v1963_v3, 16  ;;  %v2381_v4 = vld [vmem:[#allocation2 + $0xc0] sm:$0xe]  ;;  %s4308_s4 = sshll.u32 %s4600_s16, 5 }
 0x18d   : > { %v1931_v56 = vrot.slane %v1929_v34, 4  ;;  %v1751_v11 = vor.u32 %v1750_v26, %v1746_v44  ;;  %v2333_v49 = vshrl.u32 %v6114_v53, 16  ;;  %v4254_v33 = vcombine.low %v1963_v3, %v6114_v53  ;;  %v2382_v26 = vld [vmem:[#allocation2 + $0xcc] sm:$0xe]  ;;  %s3987_s16 = scalar_lea.sflag [#allocation4], %s169_s24 }
 0x18e   : > { %v1742_v18 = vrot.slane %v1741_v0, 4  ;;  %v1930_v2 = vsel %vm4691_vm7, %v4127_v28, %v1929_v34  ;;  %v2322_v9 = vrot.slane %v2320_v25, 4  ;;  %v2325_v62 = vrot.slane %v2323_v5, 5  ;;  %v6148_v0 = vpop.permute.xlu1 %2677 }
 0x18f   : > { %v1752_v55 = vrot.slane %v1751_v11, 4  ;;  %v1933_v32 = vsel %vm4691_vm7, %v1931_v56, %v1932_v48  ;;  %v2353_v13 = vshll.u32 %v6084_v15, 16  ;;  %v6135_v29 = vpop.permute.xlu0 %2755  ;;  %v2359_v6 = vrot.slane %v2357_v39, 4 }
 0x190   : > { %v1747_v10 = vsel %vm4711_vm11, %v1742_v18, %v1746_v44  ;;  %3115 = vrot.lane.b32.xlu0 %v4254_v33, %s4553_s5  ;;  %v2363_v61 = vshll.u32 %v6124_v7, 16  ;;  %v2329_v31 = vshll.u32 %v6114_v53, 16  ;;  %v2326_v45 = vor.u32 %v2325_v62, %v2322_v9 }
 0x191   : > { %v1757_v35 = vsel %vm4711_vm11, %v1752_v55, %v1756_v54  ;;  %v2355_v40 = vrot.slane %v2353_v13, 5  ;;  %v2335_v37 = vrot.slane %v2333_v49, 4  ;;  %v2351_v30 = vrot.slane %v2350_v12, 4 }
 0x192   : > { %v4223_v57 = vcombine.low %v1747_v10, %v1757_v35  ;;  %v2331_v27 = vrot.slane %v2329_v31, 5  ;;  %v2339_v60 = vshll.u32 %v1981_v52, 16  ;;  %v4239_v3 = vcombine.low %v1930_v2, %v1933_v32  ;;  %v2758_v10 = vpop.permute.xlu1 %2757 }
 0x193   : > { %v2360_v38 = vor.u32 %v2359_v6, %v2355_v40  ;;  %v2327_v58 = vrot.slane %v2326_v45, 4  ;;  %v3414_v39 = vsel %vm3394_vm3, %v3381_v63, %v6020_v47  ;;  %v2365_v28 = vrot.slane %v2363_v61, 5  ;;  %v2852_v11 = vpop.permute.xlu0 %2851 }
 0x194   : > { %2941 = vrot.lane.b32.xlu1 %v4223_v57, %s4556_s8  ;;  %v2336_v34 = vor.u32 %v2335_v37, %v2331_v27  ;;  %v2341_v44 = vrot.slane %v2339_v60, 5  ;;  %v2538_v48 = vrot.slane %v6084_v15, 5  ;;  %v4142_v54 = vrot.slane %v2381_v4, 9 }
 0x195   : > { %v2361_v12 = vrot.slane %v2360_v38, 4  ;;  %v2531_v56 = vrot.slane %v6114_v53, 5  ;;  %v3412_v25 = vsel %vm3394_vm3, %v3379_v8, %v5986_v22  ;;  %v2356_v47 = vsel %vm4711_vm11, %v2351_v30, %v2355_v40  ;;  %v4478_v40 = vld [vmem:[#allocation2 + $0x7c] sm:$0xf]  ;;  %v4480_v38 = vld [vmem:[#allocation2 + $0x88] sm:$0xf] }
 0x196   : > { %v2332_v63 = vsel %vm4711_vm11, %v2327_v58, %v2331_v27  ;;  %v2337_v5 = vrot.slane %v2336_v34, 4  ;;  %v2534_v49 = vrot.slane %v1981_v52, 5  ;;  %v4143_v33 = vrot.slane %v2382_v26, 9 }
 0x197   : > { %v2540_v18 = vrot.slane %v2538_v48, 4  ;;  %v2541_v2 = vrot.slane %v6124_v7, 5  ;;  %v2533_v9 = vrot.slane %v2531_v56, 4  ;;  %v2366_v53 = vsel %vm4711_vm11, %v2361_v12, %v2365_v28 }
 0x198   : > { %3021 = vrot.lane.b32.xlu1 %v4239_v3, %s4554_s6  ;;  %v2342_v22 = vsel %vm4711_vm11, %v2337_v5, %v2341_v44  ;;  %v2532_v8 = vsel %vm4691_vm7, %v4142_v54, %v2531_v56  ;;  %v3447_v55 = vsel %vm3427_vm4, %v3414_v39, %v6051_v19  ;;  %v3445_v7 = vsel %vm3427_vm4, %v3412_v25, %v6008_v42  ;;  %v4479_v3 = vld [vmem:[#allocation2 + $0x84] sm:$0xf] }
 0x199   : > { %v4270_v32 = vcombine.low %v2332_v63, %v2342_v22  ;;  %v2535_v62 = vsel %vm4691_vm7, %v2533_v9, %v2534_v49  ;;  %v3480_v13 = vsel %vm3460_vm6, %v3447_v55, %v6077_v20  ;;  %v3478_v36 = vsel %vm3460_vm6, %v3445_v7, %v6039_v23 }
 0x19a   : > { %v3513_v52 = vsel %vm3493_vm8, %v3480_v13, %v6112_v59  ;;  %v4286_v19 = vcombine.low %v2532_v8, %v2535_v62  ;;  %v3511_v6 = vsel %vm3493_vm8, %v3478_v36, %v6060_v50  ;;  %v4271_v23 = vcombine.low %v2356_v47, %v2366_v53 }
 0x19b   : > { %3195 = vrot.lane.b32.xlu0 %v4270_v32, %s4557_s9  ;;  %v3546_v61 = vsel %vm3526_vm9, %v3513_v52, %v6116_v21  ;;  %v2932_v42 = vpop.permute.xlu0 %2931  ;;  %v3544_v20 = vsel %vm3526_vm9, %v3511_v6, %v6086_v41  ;;  %v4158_v59 = vcombine.low %v5919_v24, %v5925_v51  ;;  %v2539_v31 = vsel %vm4691_vm7, %v4143_v33, %v2538_v48 }
 0x19c   : > { %3117 = vrot.lane.b32.xlu1 %v4255_v46, %s4553_s5  ;;  %v2542_v50 = vsel %vm4691_vm7, %v2540_v18, %v2541_v2  ;;  %4354 = vmatprep.mubr.msk.bf16.mxu1 %vm3579_vm5, %v3544_v20  ;;  %v4159_v21 = vcombine.low %v5967_v17, %v5976_v14  ;;  %v4154_v45 = vcombine.low %v4477_v1, %v4478_v40  ;;  %s171_s5 = scalar_lea.vmem [#allocation3], %s4091_s30 }
 0x19d   : > { %4355 = vmatmul.mubr.msk.bf16.vlgmr.msra.gmra.mrb[0].mxu1 %vm3579_vm5, %v3546_v61  ;;  %v4287_v16 = vcombine.low %v2539_v31, %v2542_v50  ;;  %v2854_v15 = vpop.permute.xlu1 %2853  ;;  %v4155_v58 = vcombine.low %v4479_v3, %v4480_v38  ;;  %v4481_v61 = vld [vmem:[#allocation2 + $0x90] sm:$0xf]  ;;  %v4483_v38 = vld [vmem:[#allocation2 + $0x9c] sm:$0xf]  ;;  %s4003_s6 = sshll.u32 %s171_s5, 4  ;;  %s6406_s6 = int_to_ptr.vmem [resolvable:$true] %s4003_s6 }
 0x19e   : > { %v3312_v57 = vsel %vm3279_vm14, %v4154_v45, %v6130_v43  ;;  %s4485_s10 = scalar_lea.vmem %s6406_s6, 32  ;;  %p4492_p0 = scmp.lt.s32.totalorder %s6406_s6, %s4490_s17 }
 0x19f   : > { %3275 = vrot.lane.b32.xlu0 %v4286_v19, %s4555_s7  ;;  %v3012_v41 = vpop.permute.xlu0 %3011  ;;  %v3350_v27 = vsel %vm3328_vm15, %v3312_v57, %v6135_v29  ;;  %v3315_v29 = vsel %vm3279_vm14, %v4155_v58, %v6148_v0  ;;  %v4484_v58 = vld [vmem:[#allocation2 + $0xa0] sm:$0xf]  ;;  %p4486_p11 = scmp.ne.s32.totalorder %s6406_s6, %s4485_s10  ;;  %p4493_p1 = scmp.lt.s32.totalorder %s4491_s19, %s4485_s10 }
 0x1a0   : > { %3197 = vrot.lane.b32.xlu1 %v4271_v23, %s4557_s9  ;;  %v3383_v60 = vsel %vm3361_vm2, %v3350_v27, %v2852_v11  ;;  %v3352_v48 = vsel %vm3328_vm15, %v3315_v29, %v2758_v10  ;;  %s6404_s9 = scalar_lea.hbm %s6450_s3, %s4308_s4 }
 0x1a1   : > { %v3416_v4 = vsel %vm3394_vm3, %v3383_v60, %v2932_v42  ;;  %v3385_v12 = vsel %vm3361_vm2, %v3352_v48, %v2854_v15  ;;  %v4482_v42 = vld [vmem:[#allocation2 + $0x94] sm:$0xf]  ;;  %p4487_p12 = pnand %p4486_p11, %p4617_p5  ;;  %p4494_p2 = por %p4493_p1, %p4492_p0 }
 0x1a2   : > { %v3449_v39 = vsel %vm3427_vm4, %v3416_v4, %v3012_v41  ;;  %v4156_v23 = vcombine.low %v4481_v61, %v4482_v42 }
 0x1a3   : > { %v3108_v35 = vpop.permute.xlu0 %3107  ;;  %p4488_p13 = pneg %p4487_p12 }
 0x1a4   : > { %3277 = vrot.lane.b32.xlu1 %v4287_v16, %s4555_s7  ;;  %v3482_v34 = vsel %vm3460_vm6, %v3449_v39, %v3108_v35  ;;  %v4157_v39 = vcombine.low %v4483_v38, %v4484_v58 }
 0x1a5   : > { %p4495_p3 = pnand %p4494_p2, %p4488_p13 }
 0x1a6   : > { %v2934_v46 = vpop.permute.xlu1 %2933 }
 0x1a7   : > { %v3418_v54 = vsel %vm3394_vm3, %v3385_v12, %v2934_v46 }
 0x1aa   : > { %v3014_v37 = vpop.permute.xlu1 %3013 }
 0x1ab   : > { %v3451_v25 = vsel %vm3427_vm4, %v3418_v54, %v3014_v37 }
 0x1ad   : > { %v3188_v30 = vpop.permute.xlu0 %3187 }
 0x1ae   : > { %v3110_v28 = vpop.permute.xlu1 %3109  ;;  %v3515_v44 = vsel %vm3493_vm8, %v3482_v34, %v3188_v30 }
 0x1af   : > { %v3484_v11 = vsel %vm3460_vm6, %v3451_v25, %v3110_v28 }
 0x1b3   : > { %v3268_v26 = vpop.permute.xlu0 %3267 }
 0x1b4   : > { %v3548_v43 = vsel %vm3526_vm9, %v3515_v44, %v3268_v26  ;;  %v3190_v56 = vpop.permute.xlu1 %3189 }
 0x1b5   : > { %4358 = vmatprep.mubr.msk.bf16.mxu1 %vm3579_vm5, %v3548_v43  ;;  %v3517_v47 = vsel %vm3493_vm8, %v3484_v11, %v3190_v56 }
 0x1b8   : > { %v2680_v0 = vpop.permute.xlu1 %2679 }
 0x1b9   : > { %v3318_v45 = vsel %vm3279_vm14, %v4156_v23, %v2680_v0 }
 0x1bb   : > { %v3270_v63 = vpop.permute.xlu0 %3269 }
 0x1bc   : > { %v3550_v5 = vsel %vm3526_vm9, %v3517_v47, %v3270_v63 }
 0x1bd   : > { %4359 = vmatmul.mubr.msk.bf16.gmra.mrb[4].mxu1 %vm3579_vm5, %v3550_v5  ;;  %v2682_v18 = vpop.permute.xlu1 %2681 }
 0x1be   : > { %v3321_v48 = vsel %vm3279_vm14, %v4157_v39, %v2682_v18 }
 0x1bf   : > { %v2760_v49 = vpop.permute.xlu0 %2759 }
 0x1c0   : > { %v3354_v27 = vsel %vm3328_vm15, %v3318_v45, %v2760_v49 }
 0x1c1   : > { %v2762_v9 = vpop.permute.xlu1 %2761 }
 0x1c2   : > { %v3356_v54 = vsel %vm3328_vm15, %v3321_v48, %v2762_v9 }
 0x1c3   : > { %v2856_v33 = vpop.permute.xlu0 %2855 }
 0x1c4   : > { %v3387_v4 = vsel %vm3361_vm2, %v3354_v27, %v2856_v33 }
 0x1ca   : > { %v2936_v2 = vpop.permute.xlu0 %2935 }
 0x1cb   : > { %v3420_v28 = vsel %vm3394_vm3, %v3387_v4, %v2936_v2 }
 0x1ce   : > { %v3016_v53 = vpop.permute.xlu0 %3015  ;;  %v2858_v22 = vpop.permute.xlu1 %2857 }
 0x1cf   : > { %v3453_v34 = vsel %vm3427_vm4, %v3420_v28, %v3016_v53  ;;  %v3389_v56 = vsel %vm3361_vm2, %v3356_v54, %v2858_v22 }
 0x1d2   : > { %v3112_v32 = vpop.permute.xlu0 %3111 }
 0x1d3   : > { %v3486_v26 = vsel %vm3460_vm6, %v3453_v34, %v3112_v32 }
 0x1d4   : > { %v4340_v8 = vpop.f32.mrb[0].mxu0 }
 0x1d5   : > { %3779 = vst.msk [vmem:[%s6226_s29 + $0x10] sm:$0xff] %vm3279_vm14, %v4340_v8  ;;  %v3650_v55 = vpop.f32.mrb[1].mxu0  ;;  %v3881_v52 = vmul.f32 %v4340_v8, %v4340_v8  ;;  %v3812_v31 = vsel %vm3279_vm14, %v4340_v8, 0.0 }
 0x1d6   : > { %3777 = vst.msk [vmem:[%s6226_s29] sm:$0xff] %vm3279_vm14, %v3650_v55  ;;  %v3879_v62 = vmul.f32 %v3650_v55, %v3650_v55  ;;  %v4341_v7 = vpop.f32.mrb[2].mxu0  ;;  %v3809_v10 = vsel %vm3279_vm14, %v3650_v55, 0.0 }
 0x1d7   : > { %v2938_v13 = vpop.permute.xlu1 %2937  ;;  %3780 = vst.msk [vmem:[%s6226_s29 + $0x18] sm:$0xff] %vm3279_vm14, %v4341_v7  ;;  %v3653_v36 = vpop.f32.mrb[3].mxu0  ;;  %v3882_v16 = vmul.f32 %v4341_v7, %v4341_v7  ;;  %v3914_v1 = vsel %vm3279_vm14, %v3881_v52, 0.0  ;;  %v3814_v40 = vsel %vm3279_vm14, %v4341_v7, 0.0 }
 0x1d8   : > { %3778 = vst.msk [vmem:[%s6226_s29 + $0x8] sm:$0xff] %vm3279_vm14, %v3653_v36  ;;  %v3810_v19 = vsel %vm3279_vm14, %v3653_v36, 0.0  ;;  %v3880_v6 = vmul.f32 %v3653_v36, %v3653_v36  ;;  %v3911_v50 = vsel %vm3279_vm14, %v3879_v62, 0.0  ;;  %v3422_v25 = vsel %vm3394_vm3, %v3389_v56, %v2938_v13 }
 0x1d9   : > { %v3811_v20 = vadd.f32 %v3810_v19, %v3809_v10  ;;  %v3916_v60 = vsel %vm3279_vm14, %v3882_v16, 0.0 }
 0x1da   : > { %v3912_v15 = vsel %vm3279_vm14, %v3880_v6, 0.0 }
 0x1db   : > { %v3018_v41 = vpop.permute.xlu1 %3017  ;;  %v3813_v46 = vadd.f32 %v3812_v31, %v3811_v20  ;;  %v3913_v35 = vadd.f32 %v3912_v15, %v3911_v50 }
 0x1dc   : > { %v3455_v47 = vsel %vm3427_vm4, %v3422_v25, %v3018_v41 }
 0x1dd   : > { %v3192_v37 = vpop.permute.xlu0 %3191  ;;  %v3915_v57 = vadd.f32 %v3914_v1, %v3913_v35  ;;  %v3815_v30 = vadd.f32 %v3814_v40, %v3813_v46 }
 0x1de   : > { %v3519_v43 = vsel %vm3493_vm8, %v3486_v26, %v3192_v37 }
 0x1df   : > { %v3917_v3 = vadd.f32 %v3916_v60, %v3915_v57  ;;  %v3114_v44 = vpop.permute.xlu1 %3113 }
 0x1e0   : > { %v3488_v63 = vsel %vm3460_vm6, %v3455_v47, %v3114_v44 }
 0x1e3   : > { %v3272_v29 = vpop.permute.xlu0 %3271  ;;  %v3194_v11 = vpop.permute.xlu1 %3193 }
 0x1e4   : > { %v3552_v12 = vsel %vm3526_vm9, %v3519_v43, %v3272_v29  ;;  %v3521_v5 = vsel %vm3493_vm8, %v3488_v63, %v3194_v11 }
 0x1e5   : > { %4362 = vmatprep.mubr.msk.bf16.mxu1 %vm3579_vm5, %v3552_v12 }
 0x1e7   : > { %v2684_v33 = vpop.permute.xlu1 %2683 }
 0x1e8   : > { %v3324_v60 = vsel %vm3279_vm14, %v4158_v59, %v2684_v33 }
 0x1ea   : > { %v3274_v0 = vpop.permute.xlu0 %3273 }
 0x1eb   : > { %v3554_v49 = vsel %vm3526_vm9, %v3521_v5, %v3274_v0 }
 0x1ec   : > { %4363 = vmatmul.mubr.msk.bf16.gmra.mrb[8].mxu1 %vm3579_vm5, %v3554_v49  ;;  %v2686_v2 = vpop.permute.xlu1 %2685 }
 0x1ed   : > { %v3327_v34 = vsel %vm3279_vm14, %v4159_v21, %v2686_v2 }
 0x1ee   : > { %v2764_v18 = vpop.permute.xlu0 %2763 }
 0x1ef   : > { %v3358_v4 = vsel %vm3328_vm15, %v3324_v60, %v2764_v18 }
 0x1f0   : > { %v2766_v62 = vpop.permute.xlu1 %2765 }
 0x1f1   : > { %v3360_v24 = vsel %vm3328_vm15, %v3327_v34, %v2766_v62 }
 0x1f2   : > { %v2860_v9 = vpop.permute.xlu0 %2859 }
 0x1f6   : > { %v4344_v53 = vpop.f32.mrb[4].mxu0 }
 0x1f7   : > { %3783 = vst.msk [vmem:[%s6226_s29 + $0x30] sm:$0xff] %vm3279_vm14, %v4344_v53  ;;  %v3666_v22 = vpop.f32.mrb[5].mxu0  ;;  %v3885_v52 = vmul.f32 %v4344_v53, %v4344_v53  ;;  %v3820_v23 = vsel %vm3279_vm14, %v4344_v53, 0.0 }
 0x1f8   : > { %3781 = vst.msk [vmem:[%s6226_s29 + $0x20] sm:$0xff] %vm3279_vm14, %v3666_v22  ;;  %v3816_v8 = vsel %vm3279_vm14, %v3666_v22, 0.0  ;;  %v3883_v55 = vmul.f32 %v3666_v22, %v3666_v22  ;;  %v4345_v32 = vpop.f32.mrb[6].mxu0 }
 0x1f9   : > { %v3817_v7 = vadd.f32 %v3816_v8, %v3815_v30  ;;  %3784 = vst.msk [vmem:[%s6226_s29 + $0x38] sm:$0xff] %vm3279_vm14, %v4345_v32  ;;  %v3669_v13 = vpop.f32.mrb[7].mxu0  ;;  %v3886_v20 = vmul.f32 %v4345_v32, %v4345_v32  ;;  %v3922_v15 = vsel %vm3279_vm14, %v3885_v52, 0.0  ;;  %v3822_v41 = vsel %vm3279_vm14, %v4345_v32, 0.0 }
 0x1fa   : > { %v2940_v36 = vpop.permute.xlu0 %2939  ;;  %v3918_v10 = vsel %vm3279_vm14, %v3883_v55, 0.0  ;;  %3782 = vst.msk [vmem:[%s6226_s29 + $0x28] sm:$0xff] %vm3279_vm14, %v3669_v13  ;;  %v3818_v19 = vsel %vm3279_vm14, %v3669_v13, 0.0  ;;  %v3884_v6 = vmul.f32 %v3669_v13, %v3669_v13 }
 0x1fb   : > { %v3919_v61 = vadd.f32 %v3918_v10, %v3917_v3  ;;  %v3819_v42 = vadd.f32 %v3818_v19, %v3817_v7  ;;  %v3924_v45 = vsel %vm3279_vm14, %v3886_v20, 0.0  ;;  %v3391_v3 = vsel %vm3361_vm2, %v3358_v4, %v2860_v9 }
 0x1fc   : > { %v3920_v31 = vsel %vm3279_vm14, %v3884_v6, 0.0  ;;  %v3424_v58 = vsel %vm3394_vm3, %v3391_v3, %v2940_v36 }
 0x1fd   : > { %v3821_v50 = vadd.f32 %v3820_v23, %v3819_v42  ;;  %v3921_v16 = vadd.f32 %v3920_v31, %v3919_v61  ;;  %v2862_v46 = vpop.permute.xlu1 %2861 }
 0x1fe   : > { %v3020_v40 = vpop.permute.xlu0 %3019  ;;  %v3393_v26 = vsel %vm3361_vm2, %v3360_v24, %v2862_v46 }
 0x1ff   : > { %v3923_v35 = vadd.f32 %v3922_v15, %v3921_v16  ;;  %v3823_v1 = vadd.f32 %v3822_v41, %v3821_v50  ;;  %v3457_v28 = vsel %vm3427_vm4, %v3424_v58, %v3020_v40 }
 0x201   : > { %v3925_v37 = vadd.f32 %v3924_v45, %v3923_v35 }
 0x202   : > { %v3116_v30 = vpop.permute.xlu0 %3115 }
 0x203   : > { %v3490_v44 = vsel %vm3460_vm6, %v3457_v28, %v3116_v30 }
 0x206   : > { %v2942_v57 = vpop.permute.xlu1 %2941 }
 0x207   : > { %v3426_v48 = vsel %vm3394_vm3, %v3393_v26, %v2942_v57 }
 0x20a   : > { %v3022_v27 = vpop.permute.xlu1 %3021 }
 0x20b   : > { %v3459_v17 = vsel %vm3427_vm4, %v3426_v48, %v3022_v27 }
 0x20d   : > { %v3196_v38 = vpop.permute.xlu0 %3195 }
 0x20e   : > { %v3118_v39 = vpop.permute.xlu1 %3117  ;;  %v3523_v51 = vsel %vm3493_vm8, %v3490_v44, %v3196_v38 }
 0x20f   : > { %v3492_v14 = vsel %vm3460_vm6, %v3459_v17, %v3118_v39 }
 0x211   : > { %v3276_v59 = vpop.permute.xlu0 %3275 }
 0x212   : > { %v3198_v43 = vpop.permute.xlu1 %3197  ;;  %v3556_v29 = vsel %vm3526_vm9, %v3523_v51, %v3276_v59 }
 0x213   : > { %4366 = vmatprep.mubr.msk.bf16.mxu1 %vm3579_vm5, %v3556_v29  ;;  %v3525_v21 = vsel %vm3493_vm8, %v3492_v14, %v3198_v43 }
 0x216   : > { %v3278_v12 = vpop.permute.xlu1 %3277 }
 0x217   : > { %v3558_v54 = vsel %vm3526_vm9, %v3525_v21, %v3278_v12 }
 0x218   : > { %4367 = vmatmul.mubr.msk.bf16.gmra.mrb[12].mxu1 %vm3579_vm5, %v3558_v54 }
 0x226   : > { %v4348_v56 = vpop.f32.mrb[8].mxu0 }
 0x227   : > { %3787 = vst.msk [vmem:[%s6226_s29 + $0x50] sm:$0xff] %vm3279_vm14, %v4348_v56  ;;  %v3682_v25 = vpop.f32.mrb[9].mxu0  ;;  %v3889_v49 = vmul.f32 %v4348_v56, %v4348_v56  ;;  %v3828_v22 = vsel %vm3279_vm14, %v4348_v56, 0.0 }
 0x228   : > { %3785 = vst.msk [vmem:[%s6226_s29 + $0x40] sm:$0xff] %vm3279_vm14, %v3682_v25  ;;  %v3824_v11 = vsel %vm3279_vm14, %v3682_v25, 0.0  ;;  %v3887_v47 = vmul.f32 %v3682_v25, %v3682_v25  ;;  %v4349_v63 = vpop.f32.mrb[10].mxu0 }
 0x229   : > { %v3825_v5 = vadd.f32 %v3824_v11, %v3823_v1  ;;  %3788 = vst.msk [vmem:[%s6226_s29 + $0x58] sm:$0xff] %vm3279_vm14, %v4349_v63  ;;  %v3685_v0 = vpop.f32.mrb[11].mxu0  ;;  %v3890_v8 = vmul.f32 %v4349_v63, %v4349_v63  ;;  %v3930_v7 = vsel %vm3279_vm14, %v3889_v49, 0.0  ;;  %v3830_v13 = vsel %vm3279_vm14, %v4349_v63, 0.0 }
 0x22a   : > { %v3926_v33 = vsel %vm3279_vm14, %v3887_v47, 0.0  ;;  %3786 = vst.msk [vmem:[%s6226_s29 + $0x48] sm:$0xff] %vm3279_vm14, %v3685_v0  ;;  %v3826_v18 = vsel %vm3279_vm14, %v3685_v0, 0.0  ;;  %v3888_v2 = vmul.f32 %v3685_v0, %v3685_v0 }
 0x22b   : > { %v3927_v9 = vadd.f32 %v3926_v33, %v3925_v37  ;;  %v3827_v53 = vadd.f32 %v3826_v18, %v3825_v5  ;;  %v3932_v10 = vsel %vm3279_vm14, %v3890_v8, 0.0 }
 0x22c   : > { %v3928_v55 = vsel %vm3279_vm14, %v3888_v2, 0.0 }
 0x22d   : > { %v3829_v32 = vadd.f32 %v3828_v22, %v3827_v53  ;;  %v3929_v62 = vadd.f32 %v3928_v55, %v3927_v9 }
 0x22f   : > { %v3931_v36 = vadd.f32 %v3930_v7, %v3929_v62  ;;  %v3831_v52 = vadd.f32 %v3830_v13, %v3829_v32 }
 0x231   : > { %v3933_v19 = vadd.f32 %v3932_v10, %v3931_v36 }
 0x256   : > { %v4352_v6 = vpop.f32.mrb[12].mxu0 }
 0x257   : > { %3791 = vst.msk [vmem:[%s6226_s29 + $0x70] sm:$0xff] %vm3279_vm14, %v4352_v6  ;;  %v3698_v61 = vpop.f32.mrb[13].mxu0  ;;  %v3893_v16 = vmul.f32 %v4352_v6, %v4352_v6  ;;  %v3836_v40 = vsel %vm3279_vm14, %v4352_v6, 0.0 }
 0x258   : > { %3789 = vst.msk [vmem:[%s6226_s29 + $0x60] sm:$0xff] %vm3279_vm14, %v3698_v61  ;;  %v3832_v42 = vsel %vm3279_vm14, %v3698_v61, 0.0  ;;  %v3891_v23 = vmul.f32 %v3698_v61, %v3698_v61  ;;  %v4353_v20 = vpop.f32.mrb[14].mxu0 }
 0x259   : > { %v3833_v31 = vadd.f32 %v3832_v42, %v3831_v52  ;;  %3792 = vst.msk [vmem:[%s6226_s29 + $0x78] sm:$0xff] %vm3279_vm14, %v4353_v20  ;;  %v3701_v50 = vpop.f32.mrb[15].mxu0  ;;  %v3894_v45 = vmul.f32 %v4353_v20, %v4353_v20  ;;  %v3938_v27 = vsel %vm3279_vm14, %v3893_v16, 0.0  ;;  %v3838_v60 = vsel %vm3279_vm14, %v4353_v20, 0.0 }
 0x25a   : > { %v3934_v15 = vsel %vm3279_vm14, %v3891_v23, 0.0  ;;  %3790 = vst.msk [vmem:[%s6226_s29 + $0x68] sm:$0xff] %vm3279_vm14, %v3701_v50  ;;  %v3834_v41 = vsel %vm3279_vm14, %v3701_v50, 0.0  ;;  %v3892_v46 = vmul.f32 %v3701_v50, %v3701_v50 }
 0x25b   : > { %v3935_v35 = vadd.f32 %v3934_v15, %v3933_v19  ;;  %v3835_v1 = vadd.f32 %v3834_v41, %v3833_v31  ;;  %v3940_v38 = vsel %vm3279_vm14, %v3894_v45, 0.0 }
 0x25c   : > { %v3936_v37 = vsel %vm3279_vm14, %v3892_v46, 0.0 }
 0x25d   : > { %v3837_v57 = vadd.f32 %v3836_v40, %v3835_v1  ;;  %v3937_v30 = vadd.f32 %v3936_v37, %v3935_v35 }
 0x25f   : > { %v3939_v4 = vadd.f32 %v3938_v27, %v3937_v30  ;;  %v3839_v3 = vadd.f32 %v3838_v60, %v3837_v57 }
 0x261   : > { %v3941_v58 = vadd.f32 %v3940_v38, %v3939_v4 }
 0x270   : > { %v4356_v39 = vpop.f32.mrb[0].mxu1 }
 0x271   : > { %3795 = vst.msk [vmem:[%s6226_s29 + $0x90] sm:$0xff] %vm3279_vm14, %v4356_v39  ;;  %v3714_v28 = vpop.f32.mrb[1].mxu1  ;;  %v3897_v26 = vmul.f32 %v4356_v39, %v4356_v39  ;;  %v3844_v21 = vsel %vm3279_vm14, %v4356_v39, 0.0 }
 0x272   : > { %3793 = vst.msk [vmem:[%s6226_s29 + $0x80] sm:$0xff] %vm3279_vm14, %v3714_v28  ;;  %v3840_v34 = vsel %vm3279_vm14, %v3714_v28, 0.0  ;;  %v3895_v44 = vmul.f32 %v3714_v28, %v3714_v28  ;;  %v4357_v24 = vpop.f32.mrb[2].mxu1 }
 0x273   : > { %v3841_v51 = vadd.f32 %v3840_v34, %v3839_v3  ;;  %3796 = vst.msk [vmem:[%s6226_s29 + $0x98] sm:$0xff] %vm3279_vm14, %v4357_v24  ;;  %v3717_v59 = vpop.f32.mrb[3].mxu1  ;;  %v3898_v12 = vmul.f32 %v4357_v24, %v4357_v24  ;;  %v3946_v11 = vsel %vm3279_vm14, %v3897_v26, 0.0  ;;  %v3846_v47 = vsel %vm3279_vm14, %v4357_v24, 0.0 }
 0x274   : > { %v3942_v43 = vsel %vm3279_vm14, %v3895_v44, 0.0  ;;  %3794 = vst.msk [vmem:[%s6226_s29 + $0x88] sm:$0xff] %vm3279_vm14, %v3717_v59  ;;  %v3842_v29 = vsel %vm3279_vm14, %v3717_v59, 0.0  ;;  %v3896_v48 = vmul.f32 %v3717_v59, %v3717_v59 }
 0x275   : > { %v3943_v17 = vadd.f32 %v3942_v43, %v3941_v58  ;;  %v3843_v14 = vadd.f32 %v3842_v29, %v3841_v51  ;;  %v3948_v0 = vsel %vm3279_vm14, %v3898_v12, 0.0 }
 0x276   : > { %v3944_v54 = vsel %vm3279_vm14, %v3896_v48, 0.0 }
 0x277   : > { %v3845_v56 = vadd.f32 %v3844_v21, %v3843_v14  ;;  %v3945_v25 = vadd.f32 %v3944_v54, %v3943_v17 }
 0x279   : > { %v3947_v63 = vadd.f32 %v3946_v11, %v3945_v25  ;;  %v3847_v5 = vadd.f32 %v3846_v47, %v3845_v56 }
 0x27b   : > { %v3949_v49 = vadd.f32 %v3948_v0, %v3947_v63 }
 0x290   : > { %v4360_v33 = vpop.f32.mrb[4].mxu1 }
 0x291   : > { %3799 = vst.msk [vmem:[%s6226_s29 + $0xb0] sm:$0xff] %vm3279_vm14, %v4360_v33  ;;  %v3730_v18 = vpop.f32.mrb[5].mxu1  ;;  %v3901_v55 = vmul.f32 %v4360_v33, %v4360_v33  ;;  %v3852_v52 = vsel %vm3279_vm14, %v4360_v33, 0.0 }
 0x292   : > { %3797 = vst.msk [vmem:[%s6226_s29 + $0xa0] sm:$0xff] %vm3279_vm14, %v3730_v18  ;;  %v3848_v2 = vsel %vm3279_vm14, %v3730_v18, 0.0  ;;  %v3899_v9 = vmul.f32 %v3730_v18, %v3730_v18  ;;  %v4361_v53 = vpop.f32.mrb[6].mxu1 }
 0x293   : > { %v3849_v22 = vadd.f32 %v3848_v2, %v3847_v5  ;;  %3800 = vst.msk [vmem:[%s6226_s29 + $0xb8] sm:$0xff] %vm3279_vm14, %v4361_v53  ;;  %v3733_v8 = vpop.f32.mrb[7].mxu1  ;;  %v3902_v10 = vmul.f32 %v4361_v53, %v4361_v53  ;;  %v3954_v42 = vsel %vm3279_vm14, %v3901_v55, 0.0  ;;  %v3854_v23 = vsel %vm3279_vm14, %v4361_v53, 0.0 }
 0x294   : > { %v3950_v32 = vsel %vm3279_vm14, %v3899_v9, 0.0  ;;  %3798 = vst.msk [vmem:[%s6226_s29 + $0xa8] sm:$0xff] %vm3279_vm14, %v3733_v8  ;;  %v3850_v62 = vsel %vm3279_vm14, %v3733_v8, 0.0  ;;  %v3900_v7 = vmul.f32 %v3733_v8, %v3733_v8 }
 0x295   : > { %v3951_v13 = vadd.f32 %v3950_v32, %v3949_v49  ;;  %v3851_v36 = vadd.f32 %v3850_v62, %v3849_v22  ;;  %v3956_v50 = vsel %vm3279_vm14, %v3902_v10, 0.0 }
 0x296   : > { %v3952_v19 = vsel %vm3279_vm14, %v3900_v7, 0.0 }
 0x297   : > { %v3853_v6 = vadd.f32 %v3852_v52, %v3851_v36  ;;  %v3953_v61 = vadd.f32 %v3952_v19, %v3951_v13 }
 0x299   : > { %v3955_v20 = vadd.f32 %v3954_v42, %v3953_v61  ;;  %v3855_v31 = vadd.f32 %v3854_v23, %v3853_v6 }
 0x29b   : > { %v3957_v16 = vadd.f32 %v3956_v50, %v3955_v20 }
 0x2bf   : > { %v4364_v15 = vpop.f32.mrb[8].mxu1 }
 0x2c0   : > { %3803 = vst.msk [vmem:[%s6226_s29 + $0xd0] sm:$0xff] %vm3279_vm14, %v4364_v15  ;;  %v3746_v41 = vpop.f32.mrb[9].mxu1  ;;  %v3905_v37 = vmul.f32 %v4364_v15, %v4364_v15  ;;  %v3860_v3 = vsel %vm3279_vm14, %v4364_v15, 0.0 }
 0x2c1   : > { %3801 = vst.msk [vmem:[%s6226_s29 + $0xc0] sm:$0xff] %vm3279_vm14, %v3746_v41  ;;  %v3856_v46 = vsel %vm3279_vm14, %v3746_v41, 0.0  ;;  %v3903_v35 = vmul.f32 %v3746_v41, %v3746_v41  ;;  %v4365_v1 = vpop.f32.mrb[10].mxu1 }
 0x2c2   : > { %v3857_v40 = vadd.f32 %v3856_v46, %v3855_v31  ;;  %3804 = vst.msk [vmem:[%s6226_s29 + $0xd8] sm:$0xff] %vm3279_vm14, %v4365_v1  ;;  %v3749_v45 = vpop.f32.mrb[11].mxu1  ;;  %v3906_v38 = vmul.f32 %v4365_v1, %v4365_v1  ;;  %v3962_v34 = vsel %vm3279_vm14, %v3905_v37, 0.0  ;;  %v3862_v44 = vsel %vm3279_vm14, %v4365_v1, 0.0 }
 0x2c3   : > { %v3958_v57 = vsel %vm3279_vm14, %v3903_v35, 0.0  ;;  %3802 = vst.msk [vmem:[%s6226_s29 + $0xc8] sm:$0xff] %vm3279_vm14, %v3749_v45  ;;  %v3858_v30 = vsel %vm3279_vm14, %v3749_v45, 0.0  ;;  %v3904_v27 = vmul.f32 %v3749_v45, %v3749_v45 }
 0x2c4   : > { %v3959_v60 = vadd.f32 %v3958_v57, %v3957_v16  ;;  %v3859_v4 = vadd.f32 %v3858_v30, %v3857_v40  ;;  %v3964_v59 = vsel %vm3279_vm14, %v3906_v38, 0.0 }
 0x2c5   : > { %v3960_v58 = vsel %vm3279_vm14, %v3904_v27, 0.0 }
 0x2c6   : > { %v3861_v39 = vadd.f32 %v3860_v3, %v3859_v4  ;;  %v3961_v28 = vadd.f32 %v3960_v58, %v3959_v60 }
 0x2c8   : > { %v3963_v24 = vadd.f32 %v3962_v34, %v3961_v28  ;;  %v3863_v51 = vadd.f32 %v3862_v44, %v3861_v39 }
 0x2ca   : > { %v3965_v26 = vadd.f32 %v3964_v59, %v3963_v24 }
 0x2eb   : > { %v4368_v43 = vpop.f32.mrb[12].mxu1 }
 0x2ec   : > { %3807 = vst.msk [vmem:[%s6226_s29 + $0xf0] sm:$0xff] %vm3279_vm14, %v4368_v43  ;;  %v3762_v29 = vpop.f32.mrb[13].mxu1  ;;  %v3909_v54 = vmul.f32 %v4368_v43, %v4368_v43  ;;  %v3868_v5 = vsel %vm3279_vm14, %v4368_v43, 0.0 }
 0x2ed   : > { %3805 = vst.msk [vmem:[%s6226_s29 + $0xe0] sm:$0xff] %vm3279_vm14, %v3762_v29  ;;  %v3864_v48 = vsel %vm3279_vm14, %v3762_v29, 0.0  ;;  %v3907_v17 = vmul.f32 %v3762_v29, %v3762_v29  ;;  %v4369_v14 = vpop.f32.mrb[14].mxu1 }
 0x2ee   : > { %v3865_v21 = vadd.f32 %v3864_v48, %v3863_v51  ;;  %3808 = vst.msk [vmem:[%s6226_s29 + $0xf8] sm:$0xff] %vm3279_vm14, %v4369_v14  ;;  %v3765_v12 = vpop.f32.mrb[15].mxu1  ;;  %v3910_v0 = vmul.f32 %v4369_v14, %v4369_v14  ;;  %v3970_v2 = vsel %vm3279_vm14, %v3909_v54, 0.0  ;;  %v3870_v9 = vsel %vm3279_vm14, %v4369_v14, 0.0 }
 0x2ef   : > { %v3966_v56 = vsel %vm3279_vm14, %v3907_v17, 0.0  ;;  %3806 = vst.msk [vmem:[%s6226_s29 + $0xe8] sm:$0xff] %vm3279_vm14, %v3765_v12  ;;  %v3866_v25 = vsel %vm3279_vm14, %v3765_v12, 0.0  ;;  %v3908_v11 = vmul.f32 %v3765_v12, %v3765_v12 }
 0x2f0   : > { %v3967_v47 = vadd.f32 %v3966_v56, %v3965_v26  ;;  %v3867_v63 = vadd.f32 %v3866_v25, %v3865_v21  ;;  %v3972_v8 = vsel %vm3279_vm14, %v3910_v0, 0.0 }
 0x2f1   : > { %v3968_v49 = vsel %vm3279_vm14, %v3908_v11, 0.0 }
 0x2f2   : > { %v3869_v33 = vadd.f32 %v3868_v5, %v3867_v63  ;;  %v3969_v18 = vadd.f32 %v3968_v49, %v3967_v47 }
 0x2f4   : > { %v3871_v53 = vadd.f32 %v3870_v9, %v3869_v33  ;;  %v3971_v22 = vadd.f32 %v3970_v2, %v3969_v18 }
 0x2f6   : > { %v3872_v55 = vrot.slane %v3871_v53, 4  ;;  %v3973_v32 = vadd.f32 %v3972_v8, %v3971_v22 }
 0x2f8   : > { %v3873_v62 = vadd.f32 %v3872_v55, %v3871_v53  ;;  %v3974_v7 = vrot.slane %v3973_v32, 4 }
 0x2fa   : > { %v3874_v13 = vrot.slane %v3873_v62, 2  ;;  %v3975_v36 = vadd.f32 %v3974_v7, %v3973_v32 }
 0x2fc   : > { %v3875_v52 = vadd.f32 %v3874_v13, %v3873_v62  ;;  %v3976_v10 = vrot.slane %v3975_v36, 2 }
 0x2fe   : > { %v3876_v19 = vrot.slane %v3875_v52, 1  ;;  %v3977_v6 = vadd.f32 %v3976_v10, %v3975_v36 }
 0x300   : > { %v3877_v61 = vadd.f32 %v3876_v19, %v3875_v52  ;;  %v3978_v42 = vrot.slane %v3977_v6, 1 }
 0x302   : > { %3878 = vst.msk [vmem:[%s171_s5] sm:$0x1] %vm186_vm1, %v3877_v61  ;;  %v3979_v23 = vadd.f32 %v3978_v42, %v3977_v6 }
 0x304   : > { %3980 = vst.msk [vmem:[%s171_s5 + $0x1] sm:$0x1] %vm186_vm1, %v3979_v23 }
 0x305   : > { %4498 = shalt.err (!%p4495_p3)
}
 0x306   : > { %s4499_s20 = scalar_lea.hbm %s6404_s9, 32  ;;  %s4503_s27 = scalar_lea.hbm %s6450_s3, 64 }
 0x307   : > { %p4500_p4 = scmp.ne.s32.totalorder %s6404_s9, %s4499_s20  ;;  %p4504_p9 = scmp.lt.u32.totalorder %s6404_s9, %s6450_s3 }
 0x308   : > { %p4505_p10 = scmp.lt.u32.totalorder %s4503_s27, %s4499_s20  ;;  %p4507_p12 = scmp.lt.u32.totalorder %s4499_s20, %s6404_s9 }
 0x309   : > { %p4501_p7 = pnand %p4500_p4, %p4617_p5 }
 0x30a   : > { %p4506_p11 = por %p4505_p10, %p4504_p9 }
 0x30b   : > { %p4502_p8 = pneg %p4501_p7 }
 0x30c   : > { %p4508_p13 = por %p4507_p12, %p4506_p11 }
 0x30e   : > { %p4509_p0 = pnand %p4508_p13, %p4502_p8 }
 0x310   : > { %4512 = shalt.err (!%p4509_p0)
}
 0x311   : > { %4378 = dma.vmem_to_hbm [thread:$0]  (%p4617_p5), %s6406_s6, 32, %s6404_s9, %s3987_s16  }
 0x312 PF: > { %p4384_p1 = scmp.ge.s32.totalorder %s4547_s15, 2  ;;  %s4023_s24 = sand.u32 1, %s4535_s12  }
 0x313   : > { %s4024_s30 = scalar_lea.sflag [#allocation4], %s4023_s24 }
 0x314   : > { %p4381_p2 = pnand %p4384_p1, %p4621_p6 }
 0x316   : > { %4530 = dma.done.wait (!%p4381_p2), %s4024_s30, 32  }
 0x317   : > { %4532 = vsyncadd (!%p4381_p2), %s4024_s30, 4294967264  ;;  %p14_p3 = scmp.ge.s32.totalorder %s4604_s18, 4   ;;  %s6466_s12 = smov %s4539_s13 }
 0x318   : > { %s6467_s13 = smov %s4543_s14  ;;  %s6468_s14 = smov %s4615_s21 }
 0x319   : > { %s6469_s15 = smov %s4604_s18  ;;  %16 = sbr.rel (!%p14_p3) target bundleno = 3 (0x3), region = 77 }
 0x320   :  { %4029 = vsyncpa [#allocation4], 1 }
 0x321   :  { %4031 = vsyncpa [#allocation4 + $0x1], 1 }

</bundles_post_ra>
